<compile_context>
chip_gen: v6e
topology: v6e:2x2x1
jax: 0.10.0
libtpu: 0.0.40
codegen_flags: <defaults>
</compile_context>

<pallas_src>
import functools

import jax
import jax.numpy as jnp
from jax.experimental import pallas as pl
from jax.experimental.pallas import tpu as pltpu

LANE = 128


def _round_up(a, m):
    return (a + m - 1) // m * m


def resblock_kernel(x_ref, w1_ref, w2_ref, sh_ref, o_ref, buf_ref, *,
                    C, H, W, Wp, rpi, PAD, packed):
    """One grid step = one batch tile, spatially padded and flattened.

    x_ref  : (Np, Ci)  bf16  padded input. Np = bt*rpi rows, rpi = round_up(Hp*Wp, 8).
                        packed: the C channels are replicated into 9 lane blocks [k*C,(k+1)*C);
                        unpacked: channels live in lanes [0,C).
    w1_ref : (K, Cp)   bf16  conv1 weights (BN1 scale folded), K = 128 (packed) or 9*Cp.
    w2_ref : (K, Cp)   bf16  conv2 weights (BN2 scale folded).
    sh_ref : (2, Cp)   f32   rows = [shift1, shift2] (conv bias + BN folded).
    o_ref  : (Np, Cp)  f32   output, same flat layout (halo / pad rows are garbage).
    buf_ref: (Np+2*PAD, Ci) f32 scratch: zero halo rows + staged activation for shifted loads.
    """
    Np, Ci = x_ref.shape
    Cp = o_ref.shape[1]

    # ---- interior mask from iota; float floor-division by static constants (no int div) ----
    ri = jax.lax.broadcasted_iota(jnp.int32, (Np, 1), 0).astype(jnp.float32)
    p = ri - jnp.floor((ri + 0.5) / rpi) * rpi          # row index within one image
    h = jnp.floor((p + 0.5) / Wp)                        # padded-row coordinate
    w = p - h * Wp                                       # padded-col coordinate
    interior = (h >= 1.0) & (h <= float(H)) & (w >= 1.0) & (w <= float(W))
    mask = jnp.where(interior, 1.0, 0.0)                 # (Np, 1) f32

    shift1 = sh_ref[0:1, :]
    shift2 = sh_ref[1:2, :]

    # ---- stage the bf16 input into the zero-halo f32 scratch (one cast for the whole tile) ----
    zeros_pad = jnp.zeros((PAD, Ci), jnp.float32)
    buf_ref[pl.ds(0, PAD), :] = zeros_pad                # halo rows must be finite zeros
    buf_ref[pl.ds(PAD + Np, PAD), :] = zeros_pad
    xf = x_ref[...].astype(jnp.float32)                  # residual + conv1 staging
    buf_ref[pl.ds(PAD, Np), :] = xf

    # tap k = (dh, dw) reads flat row p + (dh-1)*Wp + (dw-1); all interior taps stay in-image.
    offs = [(dh - 1) * Wp + (dw - 1) for dh in range(3) for dw in range(3)]

    if packed:
        # tap k occupies lanes [k*C, (k+1)*C) of a single 128-lane im2col block.
        lane = jax.lax.broadcasted_iota(jnp.int32, (1, Ci), 1)
        lane_masks = [
            jnp.where((lane >= k * C) & (lane < (k + 1) * C), 1.0, 0.0)
            for k in range(9)
        ]

        def conv(w_ref):
            col = buf_ref[pl.ds(PAD + offs[0], Np), :] * lane_masks[0]
            for k in range(1, 9):
                col = col + buf_ref[pl.ds(PAD + offs[k], Np), :] * lane_masks[k]
            return jnp.dot(col.astype(jnp.bfloat16), w_ref[...],
                           preferred_element_type=jnp.float32)
    else:
        def conv(w_ref):
            col = jnp.concatenate(
                [buf_ref[pl.ds(PAD + off, Np), :] for off in offs], axis=1)
            return jnp.dot(col.astype(jnp.bfloat16), w_ref[...],
                           preferred_element_type=jnp.float32)

    # conv1 -> folded BN1 -> ReLU; re-zero the halo so conv2 sees true zero padding.
    y = jnp.maximum(conv(w1_ref) + shift1, 0.0) * mask   # (Np, Cp) f32
    buf_ref[pl.ds(PAD, Np), :] = y

    # conv2 -> folded BN2; residual add in f32; final ReLU.
    z = conv(w2_ref) + shift2
    o_ref[...] = jnp.maximum(z + xf, 0.0).astype(o_ref.dtype)


def resblock_pallas(x_nchw, w1_hwio, b1, g1, be1, m1, v1,
                    w2_hwio, b2, g2, be2, m2, v2, eps=1e-5):
    """ResBlock('basic') forward, NCHW in / NCHW out (matches the PyTorch module)."""
    B, C, H, W = x_nchw.shape
    Hp, Wp = H + 2, W + 2
    Cp = _round_up(C, LANE)
    packed = (9 * C <= LANE)
    rpi = _round_up(Hp * Wp, 8)            # flat rows per image (pad to sublane multiple)
    PAD = _round_up(Wp + 1, 8)             # scratch halo rows (covers max tap offset Wp+1)

    # ---- fold BN (+ conv bias) into per-output-channel scale/shift; scale goes into W ----
    def fold(wt, b, g, be, m, v):
        scale = g / jnp.sqrt(v + eps)
        shift = scale * (b - m) + be
        return wt * scale[None, None, None, :], shift

    w1s, sh1 = fold(w1_hwio.astype(jnp.float32), b1, g1, be1, m1, v1)
    w2s, sh2 = fold(w2_hwio.astype(jnp.float32), b2, g2, be2, m2, v2)

    if packed:
        K = LANE
        # conv1: replicate output channels across the 9 lane blocks so conv2 reuses the layout.
        w1rep = jnp.broadcast_to(w1s.reshape(9, C, 1, C), (9, C, 9, C)).reshape(9 * C, 9 * C)
        w1c = jnp.zeros((K, Cp), jnp.float32).at[:9 * C, :9 * C].set(w1rep).astype(jnp.bfloat16)
        # conv2: output channels only in lanes [0, C).
        w2c = jnp.zeros((K, Cp), jnp.float32).at[:9 * C, :C].set(
            w2s.reshape(9 * C, C)).astype(jnp.bfloat16)
        sh1p = jnp.zeros((Cp,), jnp.float32).at[:9 * C].set(jnp.tile(sh1, 9))
        sh2p = jnp.zeros((Cp,), jnp.float32).at[:C].set(sh2)
    else:
        K = 9 * Cp

        def pack_w(wt):  # (3,3,C,C) HWIO -> (9*Cp, Cp), row block k = 3*dh + dw
            wp = jnp.zeros((3, 3, Cp, Cp), jnp.float32).at[:, :, :C, :C].set(wt)
            return wp.reshape(9 * Cp, Cp).astype(jnp.bfloat16)

        w1c, w2c = pack_w(w1s), pack_w(w2s)
        sh1p = jnp.zeros((Cp,), jnp.float32).at[:C].set(sh1)
        sh2p = jnp.zeros((Cp,), jnp.float32).at[:C].set(sh2)
    sh = jnp.stack([sh1p, sh2p])                                         # (2, Cp)

    # ---- NCHW -> NHWC, 1-px spatial halo, per-image flat rows padded to a multiple of 8 ----
    x = jnp.transpose(x_nchw, (0, 2, 3, 1)).astype(jnp.float32)
    xpad = jnp.pad(x, ((0, 0), (1, 1), (1, 1), (0, 0)))                  # (B, Hp, Wp, C)
    xflat = xpad.reshape(B, Hp * Wp, C)
    xflat = jnp.pad(xflat, ((0, 0), (0, rpi - Hp * Wp), (0, 0)))         # (B, rpi, C)
    if packed:
        xlanes = jnp.zeros((B, rpi, Cp), jnp.float32).at[:, :, :9 * C].set(
            jnp.tile(xflat, (1, 1, 9)))                                  # replicate channels
    else:
        xlanes = jnp.pad(xflat, ((0, 0), (0, 0), (0, Cp - C)))
    xin = xlanes.reshape(B * rpi, Cp).astype(jnp.bfloat16)               # bf16 activation DMA

    # ---- generation-aware VMEM budget + batch-tile selection ----
    try:
        vmem_cap = int(pltpu.get_tpu_info().vmem_capacity_bytes)
    except Exception:  # not on TPU / query unavailable
        vmem_cap = 64 * 1024 * 1024
    vmem_limit = min(vmem_cap * 3 // 4, 96 * 1024 * 1024)
    budget = vmem_cap * 2 // 5            # ~40% of physical VMEM for the per-tile working set

    # honest per-flat-row VMEM estimate (bytes)
    in_b = 2 * Cp * 2                     # bf16 input block, double-buffered
    out_b = 2 * Cp * 4                    # f32 output block, double-buffered
    buf_b = Cp * 4                        # f32 staging scratch
    col_b = K * 4 + K * 2                 # f32 im2col accumulation + bf16 copy
    f32_b = 4 * Cp * 4                    # matmul out / y / z / residual f32 temporaries
    row_bytes = in_b + out_b + buf_b + col_b + f32_b
    fixed = 2 * K * Cp * 2 * 2 + 2 * PAD * Cp * 4 + 4 * Cp * 4  # weights (dbl-buf), halo, shifts

    max_bt = max(1, min(B, (budget - fixed) // (row_bytes * rpi)))
    if B >= 2:                            # >=2 grid steps: v7x megacore sharding + pipelining
        max_bt = min(max_bt, max(1, B // 2))
    bt = 1
    for d in range(1, B + 1):             # largest divisor of B that fits the budget
        if B % d == 0 and d <= max_bt:
            bt = d
    # TODO(synk): if a single image exceeds the budget, add H-strip tiling (1-row halo) as a
    # second grid axis instead of just relying on a raised vmem limit.
    Np = bt * rpi
    grid = (B // bt,)
    vmem_limit = int(min(max(vmem_limit, fixed + row_bytes * Np + (2 << 20)),
                         vmem_cap * 9 // 10))

    kernel = functools.partial(resblock_kernel, C=C, H=H, W=W, Wp=Wp,
                               rpi=rpi, PAD=PAD, packed=packed)

    out_flat = pl.pallas_call(
        kernel,
        out_shape=jax.ShapeDtypeStruct((B * rpi, Cp), jnp.float32),
        grid_spec=pltpu.PrefetchScalarGridSpec(
            num_scalar_prefetch=0,
            grid=grid,
            in_specs=[
                pl.BlockSpec((Np, Cp), lambda b: (b, 0)),        # x (flat, padded, bf16)
                pl.BlockSpec((K, Cp), lambda b: (0, 0)),         # W1 (packed, scale folded)
                pl.BlockSpec((K, Cp), lambda b: (0, 0)),         # W2 (packed, scale folded)
                pl.BlockSpec((2, Cp), lambda b: (0, 0)),         # shifts
            ],
            out_specs=pl.BlockSpec((Np, Cp), lambda b: (b, 0)),
            scratch_shapes=[pltpu.VMEM((Np + 2 * PAD, Cp), jnp.float32)],
        ),
        compiler_params=pltpu.CompilerParams(
            dimension_semantics=("parallel",),
            vmem_limit_bytes=vmem_limit),
    )(xin, w1c, w2c, sh)

    out = out_flat.reshape(B, rpi, Cp)[:, :Hp * Wp, :].reshape(B, Hp, Wp, Cp)
    out = out[:, 1:H + 1, 1:W + 1, :C]                   # drop halo + channel padding
    return jnp.transpose(out, (0, 3, 1, 2))              # back to NCHW


def resblock_ref(x_nchw, w1_hwio, b1, g1, be1, m1, v1, w2_hwio, b2, g2, be2, m2, v2,
                 eps=1e-5):
    """Pure-JAX f32 reference (inference-mode BN), NCHW in / NCHW out."""
    x = jnp.transpose(x_nchw, (0, 2, 3, 1)).astype(jnp.float32)
    dn = ('NHWC', 'HWIO', 'NHWC')

    y = jax.lax.conv_general_dilated(x, w1_hwio, (1, 1), 'SAME',
                                     dimension_numbers=dn) + b1
    y = g1 * (y - m1) / jnp.sqrt(v1 + eps) + be1
    y = jnp.maximum(y, 0.0)

    z = jax.lax.conv_general_dilated(y, w2_hwio, (1, 1), 'SAME',
                                     dimension_numbers=dn) + b2
    z = g2 * (z - m2) / jnp.sqrt(v2 + eps) + be2

    out = jnp.maximum(z + x, 0.0)
    return jnp.transpose(out, (0, 3, 1, 2))


if __name__ == "__main__":
    B, C, H, W = 2, 4, 16, 16

    key = jax.random.PRNGKey(0)
    ks = jax.random.split(key, 13)

    # Deterministic synthetic parameters (shapes match nn.Conv2d(C,C,3) + BatchNorm2d(C)).
    w1 = 0.1 * jax.random.normal(ks[0], (3, 3, C, C), jnp.float32)   # HWIO
    b1 = 0.1 * jax.random.normal(ks[1], (C,), jnp.float32)
    g1 = 1.0 + 0.1 * jax.random.normal(ks[2], (C,), jnp.float32)
    be1 = 0.1 * jax.random.normal(ks[3], (C,), jnp.float32)
    m1 = 0.1 * jax.random.normal(ks[4], (C,), jnp.float32)
    v1 = 1.0 + 0.5 * jax.random.uniform(ks[5], (C,), jnp.float32)

    w2 = 0.1 * jax.random.normal(ks[6], (3, 3, C, C), jnp.float32)
    b2 = 0.1 * jax.random.normal(ks[7], (C,), jnp.float32)
    g2 = 1.0 + 0.1 * jax.random.normal(ks[8], (C,), jnp.float32)
    be2 = 0.1 * jax.random.normal(ks[9], (C,), jnp.float32)
    m2 = 0.1 * jax.random.normal(ks[10], (C,), jnp.float32)
    v2 = 1.0 + 0.5 * jax.random.uniform(ks[11], (C,), jnp.float32)

    x = jax.random.normal(ks[12], (B, C, H, W), jnp.float32)         # NCHW like PyTorch

    fwd = jax.jit(resblock_pallas)
    out = jax.block_until_ready(fwd(x, w1, b1, g1, be1, m1, v1,
                                    w2, b2, g2, be2, m2, v2))

    ref = resblock_ref(x, w1, b1, g1, be1, m1, v1, w2, b2, g2, be2, m2, v2)
    assert out.shape == (B, C, H, W)
    # bf16 activation DMA + bf16 MXU operands with f32 accumulation -> loose comparison.
    err = jnp.max(jnp.abs(out - ref))
    assert jnp.allclose(out, ref, atol=4e-2, rtol=4e-2), f"max abs err {err}"

    print("KERNEL_OK")
</pallas_src>

<mosaic_0001>
module attributes {stable_mosaic.version = 11 : i64} {
  func.func @resblock_kernel(%arg0: i32, %arg1: memref<328x128xbf16, #tpu.memory_space<vmem>>, %arg2: memref<128x128xbf16, #tpu.memory_space<vmem>>, %arg3: memref<128x128xbf16, #tpu.memory_space<vmem>>, %arg4: memref<2x128xf32, #tpu.memory_space<vmem>>, %arg5: memref<328x128xf32, #tpu.memory_space<vmem>>, %arg6: memref<376x128xf32, #tpu.memory_space<vmem>>) attributes {dimension_semantics = [#tpu.dimension_semantics<parallel>], iteration_bounds = array<i64: 2>, scalar_prefetch = 0 : i64, scratch_operands = 1 : i64, tpu.core_type = #tpu.core_type<tc>, window_params = [{transform_indices = @transform_0, window_bounds = array<i64: 328, 128>}, {pipeline_mode = #tpu.pipeline_mode<synchronous>, transform_indices = @transform_1, window_bounds = array<i64: 128, 128>}, {pipeline_mode = #tpu.pipeline_mode<synchronous>, transform_indices = @transform_2, window_bounds = array<i64: 128, 128>}, {pipeline_mode = #tpu.pipeline_mode<synchronous>, transform_indices = @transform_3, window_bounds = array<i64: 2, 128>}, {transform_indices = @transform_4, window_bounds = array<i64: 328, 128>}]} {
    %0 = tpu.iota {dimensions = array<i32: 0>} : vector<328x1xi32>
    %1 = arith.sitofp %0 : vector<328x1xi32> to vector<328x1xf32>
    %cst = arith.constant 5.000000e-01 : f32
    %2 = vector.broadcast %cst : f32 to vector<328x1xf32>
    %3 = arith.addf %1, %2 : vector<328x1xf32>
    %cst_0 = arith.constant 3.280000e+02 : f32
    %4 = vector.broadcast %cst_0 : f32 to vector<328x1xf32>
    %5 = arith.divf %3, %4 : vector<328x1xf32>
    %6 = math.floor %5 : vector<328x1xf32>
    %cst_1 = arith.constant 3.280000e+02 : f32
    %7 = vector.broadcast %cst_1 : f32 to vector<328x1xf32>
    %8 = arith.mulf %6, %7 : vector<328x1xf32>
    %9 = arith.subf %1, %8 : vector<328x1xf32>
    %cst_2 = arith.constant 5.000000e-01 : f32
    %10 = vector.broadcast %cst_2 : f32 to vector<328x1xf32>
    %11 = arith.addf %9, %10 : vector<328x1xf32>
    %cst_3 = arith.constant 1.800000e+01 : f32
    %12 = vector.broadcast %cst_3 : f32 to vector<328x1xf32>
    %13 = arith.divf %11, %12 : vector<328x1xf32>
    %14 = math.floor %13 : vector<328x1xf32>
    %cst_4 = arith.constant 1.800000e+01 : f32
    %15 = vector.broadcast %cst_4 : f32 to vector<328x1xf32>
    %16 = arith.mulf %14, %15 : vector<328x1xf32>
    %17 = arith.subf %9, %16 : vector<328x1xf32>
    %cst_5 = arith.constant 1.000000e+00 : f32
    %18 = vector.broadcast %cst_5 : f32 to vector<328x1xf32>
    %19 = arith.cmpf oge, %14, %18 : vector<328x1xf32>
    %cst_6 = arith.constant 1.600000e+01 : f32
    %20 = vector.broadcast %cst_6 : f32 to vector<328x1xf32>
    %21 = arith.cmpf ole, %14, %20 : vector<328x1xf32>
    %22 = arith.andi %19, %21 : vector<328x1xi1>
    %cst_7 = arith.constant 1.000000e+00 : f32
    %23 = vector.broadcast %cst_7 : f32 to vector<328x1xf32>
    %24 = arith.cmpf oge, %17, %23 : vector<328x1xf32>
    %25 = arith.andi %22, %24 : vector<328x1xi1>
    %cst_8 = arith.constant 1.600000e+01 : f32
    %26 = vector.broadcast %cst_8 : f32 to vector<328x1xf32>
    %27 = arith.cmpf ole, %17, %26 : vector<328x1xf32>
    %28 = arith.andi %25, %27 : vector<328x1xi1>
    %cst_9 = arith.constant 1.000000e+00 : f32
    %cst_10 = arith.constant 0.000000e+00 : f32
    %29 = vector.broadcast %cst_9 : f32 to vector<328x1xf32>
    %30 = vector.broadcast %cst_10 : f32 to vector<328x1xf32>
    %31 = arith.select %28, %29, %30 : vector<328x1xi1>, vector<328x1xf32>
    %c0 = arith.constant 0 : index
    %c0_11 = arith.constant 0 : index
    %32 = vector.load %arg4[%c0, %c0_11] : memref<2x128xf32, #tpu.memory_space<vmem>>, vector<1x128xf32>
    %c1 = arith.constant 1 : index
    %c0_12 = arith.constant 0 : index
    %33 = vector.load %arg4[%c1, %c0_12] : memref<2x128xf32, #tpu.memory_space<vmem>>, vector<1x128xf32>
    %cst_13 = arith.constant 0.000000e+00 : f32
    %34 = vector.broadcast %cst_13 : f32 to vector<24x128xf32>
    %c0_14 = arith.constant 0 : index
    %c0_15 = arith.constant 0 : index
    %35 = vector.load %arg6[%c0_14, %c0_15] : memref<376x128xf32, #tpu.memory_space<vmem>>, vector<24x128xf32>
    tpu.vector_store %arg6[%c0_14, %c0_15], %34 {strides = array<i32>} : memref<376x128xf32, #tpu.memory_space<vmem>>, vector<24x128xf32>,
    %c352 = arith.constant 352 : index
    %c0_16 = arith.constant 0 : index
    %36 = vector.load %arg6[%c352, %c0_16] : memref<376x128xf32, #tpu.memory_space<vmem>>, vector<24x128xf32>
    tpu.vector_store %arg6[%c352, %c0_16], %34 {strides = array<i32>} : memref<376x128xf32, #tpu.memory_space<vmem>>, vector<24x128xf32>,
    %c0_17 = arith.constant 0 : index
    %c0_18 = arith.constant 0 : index
    %37 = vector.load %arg1[%c0_17, %c0_18] : memref<328x128xbf16, #tpu.memory_space<vmem>>, vector<328x128xbf16>
    %38 = arith.extf %37 : vector<328x128xbf16> to vector<328x128xf32>
    %c24 = arith.constant 24 : index
    %c0_19 = arith.constant 0 : index
    %39 = vector.load %arg6[%c24, %c0_19] : memref<376x128xf32, #tpu.memory_space<vmem>>, vector<328x128xf32>
    tpu.vector_store %arg6[%c24, %c0_19], %38 {strides = array<i32>} : memref<376x128xf32, #tpu.memory_space<vmem>>, vector<328x128xf32>,
    %40 = tpu.iota {dimensions = array<i32: 1>} : vector<1x128xi32>
    %c0_i32 = arith.constant 0 : i32
    %41 = vector.broadcast %c0_i32 : i32 to vector<1x128xi32>
    %42 = arith.cmpi sge, %40, %41 : vector<1x128xi32>
    %c4_i32 = arith.constant 4 : i32
    %43 = vector.broadcast %c4_i32 : i32 to vector<1x128xi32>
    %44 = arith.cmpi slt, %40, %43 : vector<1x128xi32>
    %45 = arith.andi %42, %44 : vector<1x128xi1>
    %cst_20 = arith.constant 1.000000e+00 : f32
    %cst_21 = arith.constant 0.000000e+00 : f32
    %46 = vector.broadcast %cst_20 : f32 to vector<1x128xf32>
    %47 = vector.broadcast %cst_21 : f32 to vector<1x128xf32>
    %48 = arith.select %45, %46, %47 : vector<1x128xi1>, vector<1x128xf32>
    %c4_i32_22 = arith.constant 4 : i32
    %49 = vector.broadcast %c4_i32_22 : i32 to vector<1x128xi32>
    %50 = arith.cmpi sge, %40, %49 : vector<1x128xi32>
    %c8_i32 = arith.constant 8 : i32
    %51 = vector.broadcast %c8_i32 : i32 to vector<1x128xi32>
    %52 = arith.cmpi slt, %40, %51 : vector<1x128xi32>
    %53 = arith.andi %50, %52 : vector<1x128xi1>
    %cst_23 = arith.constant 1.000000e+00 : f32
    %cst_24 = arith.constant 0.000000e+00 : f32
    %54 = vector.broadcast %cst_23 : f32 to vector<1x128xf32>
    %55 = vector.broadcast %cst_24 : f32 to vector<1x128xf32>
    %56 = arith.select %53, %54, %55 : vector<1x128xi1>, vector<1x128xf32>
    %c8_i32_25 = arith.constant 8 : i32
    %57 = vector.broadcast %c8_i32_25 : i32 to vector<1x128xi32>
    %58 = arith.cmpi sge, %40, %57 : vector<1x128xi32>
    %c12_i32 = arith.constant 12 : i32
    %59 = vector.broadcast %c12_i32 : i32 to vector<1x128xi32>
    %60 = arith.cmpi slt, %40, %59 : vector<1x128xi32>
    %61 = arith.andi %58, %60 : vector<1x128xi1>
    %cst_26 = arith.constant 1.000000e+00 : f32
    %cst_27 = arith.constant 0.000000e+00 : f32
    %62 = vector.broadcast %cst_26 : f32 to vector<1x128xf32>
    %63 = vector.broadcast %cst_27 : f32 to vector<1x128xf32>
    %64 = arith.select %61, %62, %63 : vector<1x128xi1>, vector<1x128xf32>
    %c12_i32_28 = arith.constant 12 : i32
    %65 = vector.broadcast %c12_i32_28 : i32 to vector<1x128xi32>
    %66 = arith.cmpi sge, %40, %65 : vector<1x128xi32>
    %c16_i32 = arith.constant 16 : i32
    %67 = vector.broadcast %c16_i32 : i32 to vector<1x128xi32>
    %68 = arith.cmpi slt, %40, %67 : vector<1x128xi32>
    %69 = arith.andi %66, %68 : vector<1x128xi1>
    %cst_29 = arith.constant 1.000000e+00 : f32
    %cst_30 = arith.constant 0.000000e+00 : f32
    %70 = vector.broadcast %cst_29 : f32 to vector<1x128xf32>
    %71 = vector.broadcast %cst_30 : f32 to vector<1x128xf32>
    %72 = arith.select %69, %70, %71 : vector<1x128xi1>, vector<1x128xf32>
    %c16_i32_31 = arith.constant 16 : i32
    %73 = vector.broadcast %c16_i32_31 : i32 to vector<1x128xi32>
    %74 = arith.cmpi sge, %40, %73 : vector<1x128xi32>
    %c20_i32 = arith.constant 20 : i32
    %75 = vector.broadcast %c20_i32 : i32 to vector<1x128xi32>
    %76 = arith.cmpi slt, %40, %75 : vector<1x128xi32>
    %77 = arith.andi %74, %76 : vector<1x128xi1>
    %cst_32 = arith.constant 1.000000e+00 : f32
    %cst_33 = arith.constant 0.000000e+00 : f32
    %78 = vector.broadcast %cst_32 : f32 to vector<1x128xf32>
    %79 = vector.broadcast %cst_33 : f32 to vector<1x128xf32>
    %80 = arith.select %77, %78, %79 : vector<1x128xi1>, vector<1x128xf32>
    %c20_i32_34 = arith.constant 20 : i32
    %81 = vector.broadcast %c20_i32_34 : i32 to vector<1x128xi32>
    %82 = arith.cmpi sge, %40, %81 : vector<1x128xi32>
    %c24_i32 = arith.constant 24 : i32
    %83 = vector.broadcast %c24_i32 : i32 to vector<1x128xi32>
    %84 = arith.cmpi slt, %40, %83 : vector<1x128xi32>
    %85 = arith.andi %82, %84 : vector<1x128xi1>
    %cst_35 = arith.constant 1.000000e+00 : f32
    %cst_36 = arith.constant 0.000000e+00 : f32
    %86 = vector.broadcast %cst_35 : f32 to vector<1x128xf32>
    %87 = vector.broadcast %cst_36 : f32 to vector<1x128xf32>
    %88 = arith.select %85, %86, %87 : vector<1x128xi1>, vector<1x128xf32>
    %c24_i32_37 = arith.constant 24 : i32
    %89 = vector.broadcast %c24_i32_37 : i32 to vector<1x128xi32>
    %90 = arith.cmpi sge, %40, %89 : vector<1x128xi32>
    %c28_i32 = arith.constant 28 : i32
    %91 = vector.broadcast %c28_i32 : i32 to vector<1x128xi32>
    %92 = arith.cmpi slt, %40, %91 : vector<1x128xi32>
    %93 = arith.andi %90, %92 : vector<1x128xi1>
    %cst_38 = arith.constant 1.000000e+00 : f32
    %cst_39 = arith.constant 0.000000e+00 : f32
    %94 = vector.broadcast %cst_38 : f32 to vector<1x128xf32>
    %95 = vector.broadcast %cst_39 : f32 to vector<1x128xf32>
    %96 = arith.select %93, %94, %95 : vector<1x128xi1>, vector<1x128xf32>
    %c28_i32_40 = arith.constant 28 : i32
    %97 = vector.broadcast %c28_i32_40 : i32 to vector<1x128xi32>
    %98 = arith.cmpi sge, %40, %97 : vector<1x128xi32>
    %c32_i32 = arith.constant 32 : i32
    %99 = vector.broadcast %c32_i32 : i32 to vector<1x128xi32>
    %100 = arith.cmpi slt, %40, %99 : vector<1x128xi32>
    %101 = arith.andi %98, %100 : vector<1x128xi1>
    %cst_41 = arith.constant 1.000000e+00 : f32
    %cst_42 = arith.constant 0.000000e+00 : f32
    %102 = vector.broadcast %cst_41 : f32 to vector<1x128xf32>
    %103 = vector.broadcast %cst_42 : f32 to vector<1x128xf32>
    %104 = arith.select %101, %102, %103 : vector<1x128xi1>, vector<1x128xf32>
    %c32_i32_43 = arith.constant 32 : i32
    %105 = vector.broadcast %c32_i32_43 : i32 to vector<1x128xi32>
    %106 = arith.cmpi sge, %40, %105 : vector<1x128xi32>
    %c36_i32 = arith.constant 36 : i32
    %107 = vector.broadcast %c36_i32 : i32 to vector<1x128xi32>
    %108 = arith.cmpi slt, %40, %107 : vector<1x128xi32>
    %109 = arith.andi %106, %108 : vector<1x128xi1>
    %cst_44 = arith.constant 1.000000e+00 : f32
    %cst_45 = arith.constant 0.000000e+00 : f32
    %110 = vector.broadcast %cst_44 : f32 to vector<1x128xf32>
    %111 = vector.broadcast %cst_45 : f32 to vector<1x128xf32>
    %112 = arith.select %109, %110, %111 : vector<1x128xi1>, vector<1x128xf32>
    %c5 = arith.constant 5 : index
    %c0_46 = arith.constant 0 : index
    %113 = vector.load %arg6[%c5, %c0_46] : memref<376x128xf32, #tpu.memory_space<vmem>>, vector<328x128xf32>
    %114 = vector.broadcast %48 : vector<1x128xf32> to vector<328x128xf32>
    %115 = arith.mulf %113, %114 : vector<328x128xf32>
    %c6 = arith.constant 6 : index
    %c0_47 = arith.constant 0 : index
    %116 = vector.load %arg6[%c6, %c0_47] : memref<376x128xf32, #tpu.memory_space<vmem>>, vector<328x128xf32>
    %117 = vector.broadcast %56 : vector<1x128xf32> to vector<328x128xf32>
    %118 = arith.mulf %116, %117 : vector<328x128xf32>
    %119 = arith.addf %115, %118 : vector<328x128xf32>
    %c7 = arith.constant 7 : index
    %c0_48 = arith.constant 0 : index
    %120 = vector.load %arg6[%c7, %c0_48] : memref<376x128xf32, #tpu.memory_space<vmem>>, vector<328x128xf32>
    %121 = vector.broadcast %64 : vector<1x128xf32> to vector<328x128xf32>
    %122 = arith.mulf %120, %121 : vector<328x128xf32>
    %123 = arith.addf %119, %122 : vector<328x128xf32>
    %c23 = arith.constant 23 : index
    %c0_49 = arith.constant 0 : index
    %124 = vector.load %arg6[%c23, %c0_49] : memref<376x128xf32, #tpu.memory_space<vmem>>, vector<328x128xf32>
    %125 = vector.broadcast %72 : vector<1x128xf32> to vector<328x128xf32>
    %126 = arith.mulf %124, %125 : vector<328x128xf32>
    %127 = arith.addf %123, %126 : vector<328x128xf32>
    %c24_50 = arith.constant 24 : index
    %c0_51 = arith.constant 0 : index
    %128 = vector.load %arg6[%c24_50, %c0_51] : memref<376x128xf32, #tpu.memory_space<vmem>>, vector<328x128xf32>
    %129 = vector.broadcast %80 : vector<1x128xf32> to vector<328x128xf32>
    %130 = arith.mulf %128, %129 : vector<328x128xf32>
    %131 = arith.addf %127, %130 : vector<328x128xf32>
    %c25 = arith.constant 25 : index
    %c0_52 = arith.constant 0 : index
    %132 = vector.load %arg6[%c25, %c0_52] : memref<376x128xf32, #tpu.memory_space<vmem>>, vector<328x128xf32>
    %133 = vector.broadcast %88 : vector<1x128xf32> to vector<328x128xf32>
    %134 = arith.mulf %132, %133 : vector<328x128xf32>
    %135 = arith.addf %131, %134 : vector<328x128xf32>
    %c41 = arith.constant 41 : index
    %c0_53 = arith.constant 0 : index
    %136 = vector.load %arg6[%c41, %c0_53] : memref<376x128xf32, #tpu.memory_space<vmem>>, vector<328x128xf32>
    %137 = vector.broadcast %96 : vector<1x128xf32> to vector<328x128xf32>
    %138 = arith.mulf %136, %137 : vector<328x128xf32>
    %139 = arith.addf %135, %138 : vector<328x128xf32>
    %c42 = arith.constant 42 : index
    %c0_54 = arith.constant 0 : index
    %140 = vector.load %arg6[%c42, %c0_54] : memref<376x128xf32, #tpu.memory_space<vmem>>, vector<328x128xf32>
    %141 = vector.broadcast %104 : vector<1x128xf32> to vector<328x128xf32>
    %142 = arith.mulf %140, %141 : vector<328x128xf32>
    %143 = arith.addf %139, %142 : vector<328x128xf32>
    %c43 = arith.constant 43 : index
    %c0_55 = arith.constant 0 : index
    %144 = vector.load %arg6[%c43, %c0_55] : memref<376x128xf32, #tpu.memory_space<vmem>>, vector<328x128xf32>
    %145 = vector.broadcast %112 : vector<1x128xf32> to vector<328x128xf32>
    %146 = arith.mulf %144, %145 : vector<328x128xf32>
    %147 = arith.addf %143, %146 : vector<328x128xf32>
    %148 = arith.truncf %147 : vector<328x128xf32> to vector<328x128xbf16>
    %c0_56 = arith.constant 0 : index
    %c0_57 = arith.constant 0 : index
    %149 = vector.load %arg2[%c0_56, %c0_57] : memref<128x128xbf16, #tpu.memory_space<vmem>>, vector<128x128xbf16>
    %cst_58 = arith.constant dense<0.000000e+00> : vector<328x128xf32>
    %150 = tpu.matmul %148, %149, %cst_58 {dimension_numbers = #tpu.dot_dimension_numbers<[1], [0], [0], [1], [0, 0, 1, 1], [], []>} : vector<328x128xbf16>, vector<128x128xbf16>, vector<328x128xf32> -> vector<328x128xf32>
    %151 = vector.broadcast %32 : vector<1x128xf32> to vector<328x128xf32>
    %152 = arith.addf %150, %151 : vector<328x128xf32>
    %cst_59 = arith.constant 0.000000e+00 : f32
    %153 = vector.broadcast %cst_59 : f32 to vector<328x128xf32>
    %154 = arith.maximumf %152, %153 : vector<328x128xf32>
    %155 = vector.broadcast %31 : vector<328x1xf32> to vector<328x128xf32>
    %156 = arith.mulf %154, %155 : vector<328x128xf32>
    %c24_60 = arith.constant 24 : index
    %c0_61 = arith.constant 0 : index
    %157 = vector.load %arg6[%c24_60, %c0_61] : memref<376x128xf32, #tpu.memory_space<vmem>>, vector<328x128xf32>
    tpu.vector_store %arg6[%c24_60, %c0_61], %156 {strides = array<i32>} : memref<376x128xf32, #tpu.memory_space<vmem>>, vector<328x128xf32>,
    %c5_62 = arith.constant 5 : index
    %c0_63 = arith.constant 0 : index
    %158 = vector.load %arg6[%c5_62, %c0_63] : memref<376x128xf32, #tpu.memory_space<vmem>>, vector<328x128xf32>
    %159 = vector.broadcast %48 : vector<1x128xf32> to vector<328x128xf32>
    %160 = arith.mulf %158, %159 : vector<328x128xf32>
    %c6_64 = arith.constant 6 : index
    %c0_65 = arith.constant 0 : index
    %161 = vector.load %arg6[%c6_64, %c0_65] : memref<376x128xf32, #tpu.memory_space<vmem>>, vector<328x128xf32>
    %162 = vector.broadcast %56 : vector<1x128xf32> to vector<328x128xf32>
    %163 = arith.mulf %161, %162 : vector<328x128xf32>
    %164 = arith.addf %160, %163 : vector<328x128xf32>
    %c7_66 = arith.constant 7 : index
    %c0_67 = arith.constant 0 : index
    %165 = vector.load %arg6[%c7_66, %c0_67] : memref<376x128xf32, #tpu.memory_space<vmem>>, vector<328x128xf32>
    %166 = vector.broadcast %64 : vector<1x128xf32> to vector<328x128xf32>
    %167 = arith.mulf %165, %166 : vector<328x128xf32>
    %168 = arith.addf %164, %167 : vector<328x128xf32>
    %c23_68 = arith.constant 23 : index
    %c0_69 = arith.constant 0 : index
    %169 = vector.load %arg6[%c23_68, %c0_69] : memref<376x128xf32, #tpu.memory_space<vmem>>, vector<328x128xf32>
    %170 = vector.broadcast %72 : vector<1x128xf32> to vector<328x128xf32>
    %171 = arith.mulf %169, %170 : vector<328x128xf32>
    %172 = arith.addf %168, %171 : vector<328x128xf32>
    %c24_70 = arith.constant 24 : index
    %c0_71 = arith.constant 0 : index
    %173 = vector.load %arg6[%c24_70, %c0_71] : memref<376x128xf32, #tpu.memory_space<vmem>>, vector<328x128xf32>
    %174 = vector.broadcast %80 : vector<1x128xf32> to vector<328x128xf32>
    %175 = arith.mulf %173, %174 : vector<328x128xf32>
    %176 = arith.addf %172, %175 : vector<328x128xf32>
    %c25_72 = arith.constant 25 : index
    %c0_73 = arith.constant 0 : index
    %177 = vector.load %arg6[%c25_72, %c0_73] : memref<376x128xf32, #tpu.memory_space<vmem>>, vector<328x128xf32>
    %178 = vector.broadcast %88 : vector<1x128xf32> to vector<328x128xf32>
    %179 = arith.mulf %177, %178 : vector<328x128xf32>
    %180 = arith.addf %176, %179 : vector<328x128xf32>
    %c41_74 = arith.constant 41 : index
    %c0_75 = arith.constant 0 : index
    %181 = vector.load %arg6[%c41_74, %c0_75] : memref<376x128xf32, #tpu.memory_space<vmem>>, vector<328x128xf32>
    %182 = vector.broadcast %96 : vector<1x128xf32> to vector<328x128xf32>
    %183 = arith.mulf %181, %182 : vector<328x128xf32>
    %184 = arith.addf %180, %183 : vector<328x128xf32>
    %c42_76 = arith.constant 42 : index
    %c0_77 = arith.constant 0 : index
    %185 = vector.load %arg6[%c42_76, %c0_77] : memref<376x128xf32, #tpu.memory_space<vmem>>, vector<328x128xf32>
    %186 = vector.broadcast %104 : vector<1x128xf32> to vector<328x128xf32>
    %187 = arith.mulf %185, %186 : vector<328x128xf32>
    %188 = arith.addf %184, %187 : vector<328x128xf32>
    %c43_78 = arith.constant 43 : index
    %c0_79 = arith.constant 0 : index
    %189 = vector.load %arg6[%c43_78, %c0_79] : memref<376x128xf32, #tpu.memory_space<vmem>>, vector<328x128xf32>
    %190 = vector.broadcast %112 : vector<1x128xf32> to vector<328x128xf32>
    %191 = arith.mulf %189, %190 : vector<328x128xf32>
    %192 = arith.addf %188, %191 : vector<328x128xf32>
    %193 = arith.truncf %192 : vector<328x128xf32> to vector<328x128xbf16>
    %c0_80 = arith.constant 0 : index
    %c0_81 = arith.constant 0 : index
    %194 = vector.load %arg3[%c0_80, %c0_81] : memref<128x128xbf16, #tpu.memory_space<vmem>>, vector<128x128xbf16>
    %cst_82 = arith.constant dense<0.000000e+00> : vector<328x128xf32>
    %195 = tpu.matmul %193, %194, %cst_82 {dimension_numbers = #tpu.dot_dimension_numbers<[1], [0], [0], [1], [0, 0, 1, 1], [], []>} : vector<328x128xbf16>, vector<128x128xbf16>, vector<328x128xf32> -> vector<328x128xf32>
    %196 = vector.broadcast %33 : vector<1x128xf32> to vector<328x128xf32>
    %197 = arith.addf %195, %196 : vector<328x128xf32>
    %198 = arith.addf %197, %38 : vector<328x128xf32>
    %cst_83 = arith.constant 0.000000e+00 : f32
    %199 = vector.broadcast %cst_83 : f32 to vector<328x128xf32>
    %200 = arith.maximumf %198, %199 : vector<328x128xf32>
    %c0_84 = arith.constant 0 : index
    %c0_85 = arith.constant 0 : index
    %201 = vector.load %arg5[%c0_84, %c0_85] : memref<328x128xf32, #tpu.memory_space<vmem>>, vector<328x128xf32>
    tpu.vector_store %arg5[%c0_84, %c0_85], %200 {strides = array<i32>} : memref<328x128xf32, #tpu.memory_space<vmem>>, vector<328x128xf32>,
    return
  }
  func.func @transform_0(%arg0: i32) -> (i32, i32) {
    %c0_i32 = arith.constant 0 : i32
    %c0_i32_0 = arith.constant 0 : i32
    return %arg0, %c0_i32 : i32, i32
  }
  func.func @transform_1(%arg0: i32) -> (i32, i32) {
    %c0_i32 = arith.constant 0 : i32
    %c0_i32_0 = arith.constant 0 : i32
    %c0_i32_1 = arith.constant 0 : i32
    return %c0_i32, %c0_i32_0 : i32, i32
  }
  func.func @transform_2(%arg0: i32) -> (i32, i32) {
    %c0_i32 = arith.constant 0 : i32
    %c0_i32_0 = arith.constant 0 : i32
    %c0_i32_1 = arith.constant 0 : i32
    return %c0_i32, %c0_i32_0 : i32, i32
  }
  func.func @transform_3(%arg0: i32) -> (i32, i32) {
    %c0_i32 = arith.constant 0 : i32
    %c0_i32_0 = arith.constant 0 : i32
    %c0_i32_1 = arith.constant 0 : i32
    return %c0_i32, %c0_i32_0 : i32, i32
  }
  func.func @transform_4(%arg0: i32) -> (i32, i32) {
    %c0_i32 = arith.constant 0 : i32
    %c0_i32_0 = arith.constant 0 : i32
    return %arg0, %c0_i32 : i32, i32
  }
}

</mosaic_0001>

<bundles_post_ra>
// kernel: tile.13
= control target key start
LH: loop header
LB: loop body
LE: loop exit
PB: predicated region body
PF: predicated region fallthrough
CT: control target
= control target key end

     0   :  { %s28_s0 = inlined_call_operand.vmem [shape: f32[4], index: 0, kind: input, shape index: {}]   ;;  %s29_s1 = inlined_call_operand.vmem [shape: f32[9,4], index: 1, kind: output, shape index: {}]  }
   0x1   :  { %v4_v0 = vld [vmem:[%s28_s0] ss:$0 sm:$0xff] }
   0x2   :  { %5 = vst [vmem:[%s29_s1] sm:$0xff] %v4_v0  ;;  %8 = vst [vmem:[%s29_s1 + $0x8] sm:$0xff] %v4_v0 }

// kernel: resblock_pallas.1
= control target key start
LH: loop header
LB: loop body
LE: loop exit
PB: predicated region body
PF: predicated region fallthrough
CT: control target
= control target key end

     0   :  { %s4504_s15 = smov 0   ;;  %s7268_s0 = inlined_call_operand.vmem [shape: bf16[656,128], index: 0, kind: input, shape index: {}]   ;;  %s7269_s1 = inlined_call_operand.vmem [shape: bf16[128,128], index: 1, kind: input, shape index: {}]   ;;  %s7270_s2 = inlined_call_operand.vmem [shape: bf16[128,128], index: 2, kind: input, shape index: {}]   ;;  %s7271_s3 = inlined_call_operand.vmem [shape: f32[2,128], index: 3, kind: input, shape index: {}]   ;;  %s7272_s4 = inlined_call_operand.vmem [shape: f32[656,128], index: 4, kind: output, shape index: {}]  }
   0x1 LB: > { %s4050_s16 = sadd.s32 4294967295, %s4475_s15   ;;  %p4054_p0 = scmp.ge.s32.totalorder %s4475_s15, 1  ;;  %s4475_s15 = sphi %s4504_s15, %s14_s15  }
   0x2   : > { %p163_p1 = scmp.lt.s32.totalorder %s4475_s15, 3 }
   0x4   : > { %p164_p2 = pnand %p4054_p0, %p163_p1 }
   0x6   : > { %167 = sbr.rel (%p164_p2) target bundleno = 819 (0x333), region = 36 }
   0xb   : > { %v4444_v0 = vld [vmem:[%s7269_s1 + $0x38] sm:$0xff]   ;;  %v7273_v1 = vlaneseq  ;;  %v7280_v2 = vmov 0.0   ;;  %v4445_v3 = vld [vmem:[%s7269_s1 + $0x30] sm:$0xff]   ;;  %vm4478_vm0 = vmmov 0   ;;  %s189_s21 = smul.u32 41, %s4050_s16  ;;  %v4446_v5 = vld [vmem:[%s7269_s1 + $0x28] sm:$0xff]  }
   0xc   : > { %4234 = vmatprep.subr.bf16.mxu0 %v7280_v2  ;;  %1027 = vst [vmem:[#allocation2] sm:$0xff] %v7280_v2  ;;  %1028 = vst [vmem:[#allocation2 + $0x8] sm:$0xff] %v7280_v2  ;;  %4334 = vmatprep.subr.bf16.mxu1 %v7280_v2  ;;  %v4447_v8 = vld [vmem:[%s7269_s1 + $0x20] sm:$0xff]   ;;  %v4448_v26 = vld [vmem:[%s7269_s1 + $0x18] sm:$0xff]  }
   0xd   : > { %1029 = vst [vmem:[#allocation2 + $0x10] sm:$0xff] %v7280_v2  ;;  %1030 = vst [vmem:[#allocation2 + $0x160] sm:$0xff] %v7280_v2  ;;  %4235 = vmatpush3.bf16.msra.mxu0 %v4444_v0  ;;  %4250 = vmatprep.mubr.msk.bf16.mxu0 %vm4478_vm0, %v7280_v2  ;;  %v4530_v4 = vand.u32 127, %v7273_v1  ;;  %p190_p3 = scmp.lt.s32.totalorder %s189_s21, 81  ;;  %v4449_v45 = vld [vmem:[%s7269_s1 + $0x10] sm:$0xff]   ;;  %v4450_v54 = vld [vmem:[%s7269_s1 + $0x8] sm:$0xff]  }
   0xe   : > { %1031 = vst [vmem:[#allocation2 + $0x168] sm:$0xff] %v7280_v2  ;;  %1032 = vst [vmem:[#allocation2 + $0x170] sm:$0xff] %v7280_v2  ;;  %4236 = vmatprep.subr.bf16.mxu0 %v7280_v2  ;;  %4350 = vmatprep.mubr.msk.bf16.mxu1 %vm4478_vm0, %v7280_v2 }
   0xf   : > { %vm1159_vm1 = vcmp.lt.s32.totalorder %v4530_v4, 4  ;;  %s7503_s21 = smov (!%p190_p3, %s189_s21), 81  ;;  %vm1162_vm2 = vcmp.ge.s32.totalorder %v4530_v4, 4  ;;  %vm1163_vm3 = vcmp.lt.s32.totalorder %v4530_v4, 8  ;;  %vm1166_vm4 = vcmp.ge.s32.totalorder %v4530_v4, 8 }
  0x10   : > { %v4542_v6 = vsel %vm1159_vm1, 1.0, %v7280_v2  ;;  %s4055_s24 = sshll.u32 %s7503_s21, 2  ;;  %vm1167_vm5 = vcmp.lt.s32.totalorder %v4530_v4, 12  ;;  %vm1164_vm6 = vmand %vm1162_vm2, %vm1163_vm3  ;;  %vm1170_vm7 = vcmp.ge.s32.totalorder %v4530_v4, 12  ;;  %vm1171_vm8 = vcmp.lt.s32.totalorder %v4530_v4, 16  ;;  %s4056_s14 = sshll.u32 %s7503_s21, 3 }
  0x11   : > { %4237 = vmatpush3.bf16.msra.mxu0 %v4445_v3  ;;  %s4555_s29 = scalar_lea.vmem %s7268_s0, %s4055_s24  ;;  %vm1174_vm9 = vcmp.ge.s32.totalorder %v4530_v4, 16  ;;  %vm1175_vm10 = vcmp.lt.s32.totalorder %v4530_v4, 20  ;;  %v4565_v13 = vsel %vm1164_vm6, 1.0, %v7280_v2  ;;  %vm1178_vm11 = vcmp.ge.s32.totalorder %v4530_v4, 20  ;;  %vm1168_vm13 = vmand %vm1166_vm4, %vm1167_vm5  ;;  %s7135_s17 = scalar_lea.vmem %s7272_s4, %s4056_s14 }
  0x12   : > { %4238 = vmatprep.subr.bf16.mxu0 %v7280_v2  ;;  %v4078_v10 = vld [vmem:[%s4555_s29] sm:$0xff]   ;;  %v4157_v11 = vld [vmem:[%s4555_s29 + $0x8] sm:$0xff]   ;;  %v4158_v12 = vld [vmem:[%s4555_s29 + $0x10] sm:$0xff]   ;;  %vm1179_vm12 = vcmp.lt.s32.totalorder %v4530_v4, 24  ;;  %v4586_v22 = vsel %vm1168_vm13, 1.0, %v7280_v2  ;;  %vm1182_vm15 = vcmp.ge.s32.totalorder %v4530_v4, 24 }
  0x13   : > { %v1194_v7 = vld [vmem:[#allocation2 + $0x5] sm:$0xff]  ;;  %v4571_v15 = vunpack.c.l.bf16 %v4078_v10  ;;  %v4573_v16 = vunpack.c.h.bf16 %v4078_v10  ;;  %v4575_v17 = vunpack.c.l.bf16 %v4157_v11  ;;  %v4577_v18 = vunpack.c.h.bf16 %v4157_v11  ;;  %vm1172_vm14 = vmand %vm1170_vm7, %vm1171_vm8  ;;  %v4159_v30 = vld [vmem:[%s4555_s29 + $0x18] sm:$0xff]  }
  0x14   : > { %v1195_v9 = vld [vmem:[#allocation2 + $0xd] sm:$0xff]  ;;  %v1235_v14 = vmul.f32 %v1194_v7, %v4542_v6  ;;  %v4583_v21 = vunpack.c.l.bf16 %v4158_v12  ;;  %vm1183_vm1 = vcmp.lt.s32.totalorder %v4530_v4, 28  ;;  %v4599_v25 = vsel %vm1172_vm14, 1.0, %v7280_v2  ;;  %vm1176_vm2 = vmand %vm1174_vm9, %vm1175_vm10  ;;  %v4160_v39 = vld [vmem:[%s4555_s29 + $0x20] sm:$0xff]  }
  0x15   : > { %4239 = vmatpush3.bf16.msra.mxu0 %v4446_v5  ;;  %7319 = vst [vmem:[#allocation3_spill] sm:$0xff] %v4571_v15  ;;  %7320 = vst [vmem:[#allocation4_spill] sm:$0xff] %v4573_v16  ;;  %v1276_v19 = vld [vmem:[#allocation2 + $0x6] sm:$0xff]  ;;  %v1277_v20 = vld [vmem:[#allocation2 + $0xe] sm:$0xff]  ;;  %vm1186_vm3 = vcmp.ge.s32.totalorder %v4530_v4, 28  ;;  %vm1187_vm4 = vcmp.lt.s32.totalorder %v4530_v4, 32  ;;  %v1236_v28 = vmul.f32 %v1195_v9, %v4542_v6  ;;  %v4657_v42 = vunpack.c.h.bf16 %v4158_v12 }
  0x16   : > { %4240 = vmatprep.subr.bf16.mxu0 %v7280_v2  ;;  %7321 = vst [vmem:[#allocation5_spill] sm:$0xff] %v4575_v17  ;;  %7322 = vst [vmem:[#allocation6_spill] sm:$0xff] %v4577_v18  ;;  %v1399_v23 = vld [vmem:[#allocation2 + $0x7] sm:$0xff]  ;;  %v1400_v24 = vld [vmem:[#allocation2 + $0xf] sm:$0xff]  ;;  %vm1190_vm5 = vcmp.ge.s32.totalorder %v4530_v4, 32  ;;  %v4613_v27 = vsel %vm1176_vm2, 1.0, %v7280_v2  ;;  %v1317_v29 = vmul.f32 %v1276_v19, %v4565_v13  ;;  %v1318_v32 = vmul.f32 %v1277_v20, %v4565_v13 }
  0x17   : > { %7323 = vst [vmem:[#allocation7_spill] sm:$0xff] %v4583_v21  ;;  %1115 = vst [vmem:[#allocation2 + $0x18] sm:$0xff] %v4571_v15  ;;  %vm1191_vm7 = vcmp.lt.s32.totalorder %v4530_v4, 36  ;;  %v1440_v33 = vmul.f32 %v1399_v23, %v4586_v22  ;;  %v1441_v34 = vmul.f32 %v1400_v24, %v4586_v22  ;;  %v4643_v37 = vmul.f32 %v4571_v15, %v4613_v27  ;;  %v4662_v44 = vld [vmem:[%s4555_s29 + $0x28] sm:$0xff]  }
  0x18   : > { %1116 = vst [vmem:[#allocation2 + $0x20] sm:$0xff] %v4573_v16  ;;  %1117 = vst [vmem:[#allocation2 + $0x28] sm:$0xff] %v4575_v17  ;;  %v1358_v36 = vadd.f32 %v1317_v29, %v1235_v14  ;;  %v4647_v38 = vmul.f32 %v4573_v16, %v4613_v27  ;;  %v1359_v41 = vadd.f32 %v1318_v32, %v1236_v28  ;;  %v4659_v43 = vunpack.c.l.bf16 %v4159_v30  ;;  %v4451_v32 = vld [vmem:[%s7269_s1] sm:$0xff]  }
  0x19   : > { %1118 = vst [vmem:[#allocation2 + $0x30] sm:$0xff] %v4577_v18  ;;  %4241 = vmatpush3.bf16.msra.mxu0 %v4447_v8  ;;  %1119 = vst [vmem:[#allocation2 + $0x38] sm:$0xff] %v4583_v21  ;;  %v4672_v48 = vmul.f32 %v4575_v17, %v4613_v27  ;;  %v4676_v49 = vmul.f32 %v4577_v18, %v4613_v27  ;;  %v4681_v51 = vunpack.c.h.bf16 %v4159_v30  ;;  %v4683_v52 = vunpack.c.l.bf16 %v4160_v39 }
  0x1a   : > { %vm1180_vm6 = vmand %vm1178_vm11, %vm1179_vm12  ;;  %4242 = vmatprep.subr.bf16.mxu0 %v7280_v2  ;;  %7324 = vst [vmem:[#allocation8_spill] sm:$0xff] %v4657_v42  ;;  %v1481_v47 = vadd.f32 %v1440_v33, %v1358_v36  ;;  %v1482_v50 = vadd.f32 %v1441_v34, %v1359_v41  ;;  %v4687_v53 = vmul.f32 %v4583_v21, %v4613_v27  ;;  %v4696_v59 = vunpack.c.h.bf16 %v4160_v39 }
  0x1b   : > { %v4625_v31 = vsel %vm1180_vm6, 1.0, %v7280_v2  ;;  %vm1184_vm8 = vmand %vm1182_vm15, %vm1183_vm1  ;;  %7325 = vst [vmem:[#allocation9_spill] sm:$0xff] %v4659_v43  ;;  %v4694_v58 = vmul.f32 %v4657_v42, %v4613_v27  ;;  %v4699_v60 = vunpack.c.l.bf16 %v4662_v44  ;;  %v4703_v61 = vmul.f32 %v4659_v43, %v4613_v27 }
  0x1c   : > { %v4635_v35 = vsel %vm1184_vm8, 1.0, %v7280_v2  ;;  %vm1188_vm9 = vmand %vm1186_vm3, %vm1187_vm4  ;;  %1120 = vst [vmem:[#allocation2 + $0x40] sm:$0xff] %v4657_v42 }
  0x1d   : > { %v4651_v40 = vsel %vm1188_vm9, 1.0, %v7280_v2  ;;  %vm1192_vm10 = vmand %vm1190_vm5, %vm1191_vm7  ;;  %4243 = vmatpush3.bf16.msra.mxu0 %v4448_v26  ;;  %1121 = vst [vmem:[#allocation2 + $0x48] sm:$0xff] %v4659_v43 }
  0x1e   : > { %v4668_v46 = vsel %vm1192_vm10, 1.0, %v7280_v2  ;;  %4244 = vmatprep.subr.bf16.mxu0 %v7280_v2  ;;  %7326 = vst [vmem:[#allocation10_spill] sm:$0xff] %v4681_v51  ;;  %7327 = vst [vmem:[#allocation11_spill] sm:$0xff] %v4683_v52  ;;  %v1401_v55 = vld [vmem:[#allocation2 + $0x17] sm:$0xff] }
  0x1f   : > { %v1402_v56 = vld [vmem:[#allocation2 + $0x1f] sm:$0xff]  ;;  %7328 = vst [vmem:[#allocation12_spill] sm:$0xff] %v4696_v59  ;;  %7329 = vst [vmem:[#allocation13_spill] sm:$0xff] %v4699_v60  ;;  %v1524_v62 = vmul.f32 %v1401_v55, %v4599_v25  ;;  %v1442_v7 = vmul.f32 %v1401_v55, %v4586_v22  ;;  %v1196_v29 = vld [vmem:[#allocation2 + $0x15] sm:$0xff] }
  0x20   : > { %v1729_v57 = vld [vmem:[#allocation2 + $0x19] sm:$0xff]  ;;  %v1525_v63 = vmul.f32 %v1402_v56, %v4599_v25  ;;  %v1730_v0 = vld [vmem:[#allocation2 + $0x21] sm:$0xff]  ;;  %v1731_v3 = vld [vmem:[#allocation2 + $0x29] sm:$0xff]  ;;  %1122 = vst [vmem:[#allocation2 + $0x50] sm:$0xff] %v4681_v51  ;;  %v1443_v19 = vmul.f32 %v1402_v56, %v4586_v22  ;;  %v1237_v36 = vmul.f32 %v1196_v29, %v4542_v6 }
  0x21   : > { %v1732_v4 = vld [vmem:[#allocation2 + $0x31] sm:$0xff]  ;;  %v1770_v5 = vmul.f32 %v1729_v57, %v4625_v31  ;;  %1123 = vst [vmem:[#allocation2 + $0x58] sm:$0xff] %v4683_v52  ;;  %4245 = vmatpush3.bf16.msra.mxu0 %v4449_v45  ;;  %v1771_v8 = vmul.f32 %v1730_v0, %v4625_v31  ;;  %v1854_v9 = vmul.f32 %v1731_v3, %v4635_v35  ;;  %1124 = vst [vmem:[#allocation2 + $0x60] sm:$0xff] %v4696_v59  ;;  %v1197_v30 = vld [vmem:[#allocation2 + $0x1d] sm:$0xff] }
  0x22   : > { %v1855_v10 = vmul.f32 %v1732_v4, %v4635_v35  ;;  %v1936_v11 = vld [vmem:[#allocation2 + $0x2a] sm:$0xff]  ;;  %v1937_v12 = vld [vmem:[#allocation2 + $0x32] sm:$0xff]  ;;  %1125 = vst [vmem:[#allocation2 + $0x68] sm:$0xff] %v4699_v60  ;;  %4246 = vmatprep.subr.bf16.mxu0 %v7280_v2  ;;  %v1565_v20 = vadd.f32 %v1524_v62, %v1481_v47  ;;  %v1566_v23 = vadd.f32 %v1525_v63, %v1482_v50  ;;  %v1279_v45 = vld [vmem:[#allocation2 + $0x1e] sm:$0xff] }
  0x23   : > { %v2059_v14 = vld [vmem:[#allocation2 + $0x2b] sm:$0xff]  ;;  %v1977_v24 = vmul.f32 %v1936_v11, %v4651_v40  ;;  %v1978_v26 = vmul.f32 %v1937_v12, %v4651_v40  ;;  %v2060_v28 = vld [vmem:[#allocation2 + $0x33] sm:$0xff]  ;;  %v1238_v39 = vmul.f32 %v1197_v30, %v4542_v6  ;;  %v1320_v57 = vmul.f32 %v1279_v45, %v4565_v13  ;;  %v2061_v1 = vld [vmem:[#allocation2 + $0x3b] sm:$0xff] }
  0x24   : > { %v2100_v33 = vmul.f32 %v2059_v14, %v4668_v46  ;;  %v2101_v34 = vmul.f32 %v2060_v28, %v4668_v46  ;;  %v1278_v41 = vld [vmem:[#allocation2 + $0x16] sm:$0xff]  ;;  %v1403_v47 = vld [vmem:[#allocation2 + $0x27] sm:$0xff]  ;;  %v1688_v50 = vadd.f32 %v4643_v37, %v1565_v20  ;;  %v1689_v55 = vadd.f32 %v4647_v38, %v1566_v23 }
  0x25   : > { %v1319_v56 = vmul.f32 %v1278_v41, %v4565_v13  ;;  %v1404_v62 = vld [vmem:[#allocation2 + $0x2f] sm:$0xff]  ;;  %v1198_v63 = vld [vmem:[#allocation2 + $0x25] sm:$0xff]  ;;  %4247 = vmatpush3.bf16.msra.mxu0 %v4450_v54  ;;  %v1526_v11 = vmul.f32 %v1403_v47, %v4599_v25  ;;  %v1733_v14 = vld [vmem:[#allocation2 + $0x39] sm:$0xff]  ;;  %v1772_v29 = vmul.f32 %v1731_v3, %v4625_v31  ;;  %v1773_v37 = vmul.f32 %v1732_v4, %v4625_v31 }
  0x26   : > { %v1199_v0 = vld [vmem:[#allocation2 + $0x2d] sm:$0xff]  ;;  %v1527_v12 = vmul.f32 %v1404_v62, %v4599_v25  ;;  %v1734_v28 = vld [vmem:[#allocation2 + $0x41] sm:$0xff]  ;;  %4248 = vmatprep.subr.bf16.mxu0 %v7280_v2  ;;  %v1811_v38 = vadd.f32 %v1770_v5, %v1688_v50  ;;  %v1812_v23 = vadd.f32 %v1771_v8, %v1689_v55  ;;  %v1361_v41 = vadd.f32 %v1320_v57, %v1238_v39 }
  0x27   : > { %v1938_v20 = vld [vmem:[#allocation2 + $0x3a] sm:$0xff]  ;;  %v1360_v30 = vadd.f32 %v1319_v56, %v1237_v36  ;;  %v1939_v45 = vld [vmem:[#allocation2 + $0x42] sm:$0xff]  ;;  %v1856_v43 = vmul.f32 %v1733_v14, %v4635_v35  ;;  %v1857_v42 = vmul.f32 %v1734_v28, %v4635_v35  ;;  %v1281_v5 = vld [vmem:[#allocation2 + $0x2e] sm:$0xff]  ;;  %v2102_v8 = vmul.f32 %v2061_v1, %v4668_v46 }
  0x28   : > { %v2062_v54 = vld [vmem:[#allocation2 + $0x43] sm:$0xff]  ;;  %v1979_v21 = vmul.f32 %v1938_v20, %v4651_v40  ;;  %v1980_v3 = vmul.f32 %v1939_v45, %v4651_v40  ;;  %v1895_v18 = vadd.f32 %v1854_v9, %v1811_v38  ;;  %v1896_v4 = vadd.f32 %v1855_v10, %v1812_v23  ;;  %v1405_v45 = vld [vmem:[#allocation2 + $0x37] sm:$0xff] }
  0x29   : > { %v1483_v17 = vadd.f32 %v1442_v7, %v1360_v30  ;;  %v1484_v16 = vadd.f32 %v1443_v19, %v1361_v41  ;;  %v1280_v2 = vld [vmem:[#allocation2 + $0x26] sm:$0xff]  ;;  %4249 = vmatpush3.bf16.msra.mxu0 %v4451_v32  ;;  %v2103_v36 = vmul.f32 %v2062_v54, %v4668_v46  ;;  %v1239_v39 = vmul.f32 %v1198_v63, %v4542_v6  ;;  %v2064_v54 = vld [vmem:[#allocation2 + $0x53] sm:$0xff] }
  0x2a   : > { %v1240_v50 = vmul.f32 %v1199_v0, %v4542_v6  ;;  %v2018_v55 = vadd.f32 %v1977_v24, %v1895_v18  ;;  %v2019_v56 = vadd.f32 %v1978_v26, %v1896_v4  ;;  %v1406_v9 = vld [vmem:[#allocation2 + $0x3f] sm:$0xff]  ;;  %v1321_v7 = vmul.f32 %v1280_v2, %v4565_v13  ;;  %v4750_v18 = vld [vmem:[#allocation2 + $0x49] sm:$0xff]  ;;  %v1736_v26 = vld [vmem:[#allocation2 + $0x51] sm:$0xff] }
  0x2b   : > { %v1567_v57 = vadd.f32 %v1526_v11, %v1483_v17  ;;  %v1568_v20 = vadd.f32 %v1527_v12, %v1484_v16  ;;  %v1322_v10 = vmul.f32 %v1281_v5, %v4565_v13  ;;  %v1444_v19 = vmul.f32 %v1403_v47, %v4586_v22  ;;  %v1940_v11 = vld [vmem:[#allocation2 + $0x4a] sm:$0xff]  ;;  %v1200_v4 = vld [vmem:[#allocation2 + $0x35] sm:$0xff] }
  0x2c   : > { %v1445_v1 = vmul.f32 %v1404_v62, %v4586_v22  ;;  %v2141_v32 = vadd.f32 %v2100_v33, %v2018_v55  ;;  %v2142_v38 = vadd.f32 %v2101_v34, %v2019_v56  ;;  %v1362_v17 = vadd.f32 %v1321_v7, %v1239_v39  ;;  %v1941_v34 = vld [vmem:[#allocation2 + $0x52] sm:$0xff]  ;;  %v1283_v7 = vld [vmem:[#allocation2 + $0x3e] sm:$0xff] }
  0x2d   : > { %v1690_v63 = vadd.f32 %v4672_v48, %v1567_v57  ;;  %v1691_v0 = vadd.f32 %v4676_v49, %v1568_v20  ;;  %v1363_v16 = vadd.f32 %v1322_v10, %v1240_v50  ;;  %v1528_v24 = vmul.f32 %v1405_v45, %v4599_v25  ;;  %v2063_v62 = vld [vmem:[#allocation2 + $0x4b] sm:$0xff] }
  0x2e   : > { %v1529_v2 = vmul.f32 %v1406_v9, %v4599_v25  ;;  %v2182_v12 = vpack.c.bf16 %v2142_v38, %v2141_v32  ;;  %v1774_v33 = vmul.f32 %v1733_v14, %v4625_v31  ;;  %v1485_v48 = vadd.f32 %v1444_v19, %v1362_v17  ;;  %v1282_v14 = vld [vmem:[#allocation2 + $0x36] sm:$0xff] }
  0x2f   : > { %v1813_v47 = vadd.f32 %v1772_v29, %v1690_v63  ;;  %v1814_v23 = vadd.f32 %v1773_v37, %v1691_v0  ;;  %v1486_v30 = vadd.f32 %v1445_v1, %v1363_v16  ;;  %v1775_v49 = vmul.f32 %v1734_v28, %v4625_v31  ;;  %v1201_v37 = vld [vmem:[#allocation2 + $0x3d] sm:$0xff]  ;;  %v4766_v1 = vld [vmem:[#allocation2 + $0x47] sm:$0xff]  ;;  %v4768_v32 = vld [vmem:[#allocation2 + $0x4f] sm:$0xff] }
  0x30   : > { %v1858_v41 = vmul.f32 %v4750_v18, %v4635_v35  ;;  %4251 = vmatmul.mubr.bf16.vlgmr.msra.gmra.mxu0 %v2182_v12  ;;  %v1859_v50 = vmul.f32 %v1736_v26, %v4635_v35  ;;  %v1981_v29 = vmul.f32 %v1940_v11, %v4651_v40  ;;  %v7330_v55 = vmov 0.0   ;;  %v4774_v16 = vld [vmem:[#allocation2 + $0x59] sm:$0xff]  ;;  %v4778_v11 = vld [vmem:[#allocation2 + $0x61] sm:$0xff] }
  0x31   : > { %v1897_v5 = vadd.f32 %v1856_v43, %v1813_v47  ;;  %v1898_v39 = vadd.f32 %v1857_v42, %v1814_v23  ;;  %4254 = vmatprep.mubr.msk.bf16.mxu0 %vm4478_vm0, %v7330_v55  ;;  %v1569_v56 = vadd.f32 %v1528_v24, %v1485_v48  ;;  %v1570_v57 = vadd.f32 %v1529_v2, %v1486_v30 }
  0x32   : > { %v1982_v28 = vmul.f32 %v1941_v34, %v4651_v40  ;;  %v2104_v20 = vmul.f32 %v2063_v62, %v4668_v46  ;;  %v2105_v42 = vmul.f32 %v2064_v54, %v4668_v46  ;;  %v1241_v43 = vmul.f32 %v1200_v4, %v4542_v6  ;;  %v1943_v34 = vld [vmem:[#allocation2 + $0x62] sm:$0xff] }
  0x33   : > { %v2020_v10 = vadd.f32 %v1979_v21, %v1897_v5  ;;  %v2021_v19 = vadd.f32 %v1980_v3, %v1898_v39  ;;  %v1692_v38 = vadd.f32 %v4687_v53, %v1569_v56  ;;  %v1693_v63 = vadd.f32 %v4694_v58, %v1570_v57  ;;  %v1942_v58 = vld [vmem:[#allocation2 + $0x5a] sm:$0xff]  ;;  %v4162_v57 = vld [vmem:[%s4555_s29 + $0x30] sm:$0xff]  }
  0x34   : > { %v1242_v0 = vmul.f32 %v1201_v37, %v4542_v6  ;;  %v1323_v17 = vmul.f32 %v1282_v14, %v4565_v13  ;;  %v1324_v24 = vmul.f32 %v1283_v7, %v4565_v13  ;;  %v1446_v2 = vmul.f32 %v1405_v45, %v4586_v22  ;;  %v2065_v62 = vld [vmem:[#allocation2 + $0x5b] sm:$0xff]  ;;  %v2066_v37 = vld [vmem:[#allocation2 + $0x63] sm:$0xff] }
  0x35   : > { %v2143_v21 = vadd.f32 %v2102_v8, %v2020_v10  ;;  %v2144_v3 = vadd.f32 %v2103_v36, %v2021_v19  ;;  %v1815_v12 = vadd.f32 %v1774_v33, %v1692_v38  ;;  %v1816_v47 = vadd.f32 %v1775_v49, %v1693_v63  ;;  %v1202_v7 = vld [vmem:[#allocation2 + $0x45] sm:$0xff] }
  0x36   : > { %v1364_v23 = vadd.f32 %v1323_v17, %v1241_v43  ;;  %v1447_v53 = vmul.f32 %v1406_v9, %v4586_v22  ;;  %v1365_v30 = vadd.f32 %v1324_v24, %v1242_v0  ;;  %v1530_v8 = vmul.f32 %v4766_v1, %v4599_v25  ;;  %v1203_v43 = vld [vmem:[#allocation2 + $0x4d] sm:$0xff] }
  0x37   : > { %v2183_v48 = vpack.c.bf16 %v2144_v3, %v2143_v21  ;;  %v1531_v36 = vmul.f32 %v4768_v32, %v4599_v25  ;;  %v1899_v45 = vadd.f32 %v1858_v41, %v1815_v12  ;;  %v1900_v54 = vadd.f32 %v1859_v50, %v1816_v47  ;;  %v1284_v38 = vld [vmem:[#allocation2 + $0x46] sm:$0xff]  ;;  %v1285_v17 = vld [vmem:[#allocation2 + $0x4e] sm:$0xff]  ;;  %v1409_v12 = vld [vmem:[#allocation2 + $0x57] sm:$0xff] }
  0x38   : > { %v1487_v4 = vadd.f32 %v1446_v2, %v1364_v23  ;;  %v1654_v33 = vmul.f32 %v4681_v51, %v4613_v27  ;;  %v1488_v9 = vadd.f32 %v1447_v53, %v1365_v30  ;;  %v1776_v49 = vmul.f32 %v4750_v18, %v4625_v31  ;;  %v1410_v47 = vld [vmem:[#allocation2 + $0x5f] sm:$0xff] }
  0x39   : > { %4255 = vmatmul.mubr.bf16.gmra.mxu0 %v2183_v48  ;;  %v1777_v5 = vmul.f32 %v1736_v26, %v4625_v31  ;;  %v1860_v39 = vmul.f32 %v4774_v16, %v4635_v35  ;;  %v2022_v41 = vadd.f32 %v1981_v29, %v1899_v45  ;;  %v2023_v50 = vadd.f32 %v1982_v28, %v1900_v54 }
  0x3a   : > { %4258 = vmatprep.mubr.msk.bf16.mxu0 %vm4478_vm0, %v7330_v55  ;;  %v1571_v14 = vadd.f32 %v1530_v8, %v1487_v4  ;;  %v1861_v56 = vmul.f32 %v4778_v11, %v4635_v35  ;;  %v1572_v10 = vadd.f32 %v1531_v36, %v1488_v9  ;;  %v1983_v18 = vmul.f32 %v1942_v58, %v4651_v40  ;;  %v4820_v36 = vld [vmem:[%s4555_s29 + $0x38] sm:$0xff]  }
  0x3b   : > { %v1984_v26 = vmul.f32 %v1943_v34, %v4651_v40  ;;  %v2106_v19 = vmul.f32 %v2065_v62, %v4668_v46  ;;  %v2145_v63 = vadd.f32 %v2104_v20, %v2022_v41  ;;  %v2146_v0 = vadd.f32 %v2105_v42, %v2023_v50  ;;  %v1205_v9 = vld [vmem:[#allocation2 + $0x5d] sm:$0xff] }
  0x3c   : > { %v1694_v29 = vadd.f32 %v4703_v61, %v1571_v14  ;;  %v2107_v28 = vmul.f32 %v2066_v37, %v4668_v46  ;;  %v1695_v21 = vadd.f32 %v1654_v33, %v1572_v10  ;;  %v4803_v3 = vunpack.c.h.bf16 %v4662_v44  ;;  %v1204_v33 = vld [vmem:[#allocation2 + $0x55] sm:$0xff]  ;;  %v1287_v41 = vld [vmem:[#allocation2 + $0x5e] sm:$0xff]  ;;  %v4837_v10 = vld [vmem:[#allocation2 + $0x67] sm:$0xff] }
  0x3d   : > { %v4805_v24 = vunpack.c.l.bf16 %v4162_v57  ;;  %v1243_v2 = vmul.f32 %v1202_v7, %v4542_v6  ;;  %v2184_v23 = vpack.c.bf16 %v2146_v0, %v2145_v63  ;;  %v1244_v20 = vmul.f32 %v1203_v43, %v4542_v6  ;;  %v1286_v37 = vld [vmem:[#allocation2 + $0x56] sm:$0xff] }
  0x3e   : > { %7331 = vst [vmem:[#allocation14_spill] sm:$0xff] %v4803_v3  ;;  %v1817_v53 = vadd.f32 %v1776_v49, %v1694_v29  ;;  %v1325_v61 = vmul.f32 %v1284_v38, %v4565_v13  ;;  %v1818_v42 = vadd.f32 %v1777_v5, %v1695_v21  ;;  %1126 = vst [vmem:[#allocation2 + $0x70] sm:$0xff] %v4803_v3  ;;  %v4835_v7 = vunpack.c.l.bf16 %v4820_v36 }
  0x3f   : > { %7332 = vst [vmem:[#allocation15_spill] sm:$0xff] %v4805_v24  ;;  %1127 = vst [vmem:[#allocation2 + $0x78] sm:$0xff] %v4805_v24  ;;  %v1326_v44 = vmul.f32 %v1285_v17, %v4565_v13  ;;  %v1448_v58 = vmul.f32 %v4766_v1, %v4586_v22  ;;  %v1449_v34 = vmul.f32 %v4768_v32, %v4586_v22 }
  0x40   : > { %v1901_v62 = vadd.f32 %v1860_v39, %v1817_v53  ;;  %v1366_v48 = vadd.f32 %v1325_v61, %v1243_v2  ;;  %v1532_v30 = vmul.f32 %v1409_v12, %v4599_v25  ;;  %v1533_v8 = vmul.f32 %v1410_v47, %v4599_v25  ;;  %7334 = vst [vmem:[#allocation17_spill] sm:$0xff] %v4835_v7 }
  0x41   : > { %4259 = vmatmul.mubr.bf16.gmra.mxu0 %v2184_v23  ;;  %v1902_v45 = vadd.f32 %v1861_v56, %v1818_v42  ;;  %v1367_v54 = vadd.f32 %v1326_v44, %v1244_v20  ;;  %v1655_v4 = vmul.f32 %v4683_v52, %v4613_v27  ;;  %v1656_v1 = vmul.f32 %v4696_v59, %v4613_v27 }
  0x42   : > { %4262 = vmatprep.mubr.msk.bf16.mxu0 %vm4478_vm0, %v7330_v55  ;;  %v2024_v32 = vadd.f32 %v1983_v18, %v1901_v62  ;;  %v1489_v49 = vadd.f32 %v1448_v58, %v1366_v48  ;;  %v1778_v5 = vmul.f32 %v4774_v16, %v4625_v31  ;;  %v1779_v39 = vmul.f32 %v4778_v11, %v4625_v31 }
  0x43   : > { %v2025_v50 = vadd.f32 %v1984_v26, %v1902_v45  ;;  %v1490_v14 = vadd.f32 %v1449_v34, %v1367_v54  ;;  %v4832_v56 = vunpack.c.h.bf16 %v4162_v57  ;;  %v1245_v38 = vmul.f32 %v1204_v33, %v4542_v6  ;;  %1129 = vst [vmem:[#allocation2 + $0x88] sm:$0xff] %v4835_v7 }
  0x44   : > { %v2147_v43 = vadd.f32 %v2106_v19, %v2024_v32  ;;  %v1573_v18 = vadd.f32 %v1532_v30, %v1489_v49  ;;  %v1246_v16 = vmul.f32 %v1205_v9, %v4542_v6  ;;  %v1327_v11 = vmul.f32 %v1286_v37, %v4565_v13 }
  0x45   : > { %7333 = vst [vmem:[#allocation16_spill] sm:$0xff] %v4832_v56  ;;  %v2148_v63 = vadd.f32 %v2107_v28, %v2025_v50  ;;  %v1574_v0 = vadd.f32 %v1533_v8, %v1490_v14  ;;  %1128 = vst [vmem:[#allocation2 + $0x80] sm:$0xff] %v4832_v56  ;;  %v1328_v57 = vmul.f32 %v1287_v41, %v4565_v13  ;;  %v1739_v29 = vld [vmem:[#allocation2 + $0x69] sm:$0xff] }
  0x46   : > { %v1696_v26 = vadd.f32 %v1655_v4, %v1573_v18  ;;  %v1740_v17 = vld [vmem:[#allocation2 + $0x71] sm:$0xff]  ;;  %v1450_v19 = vmul.f32 %v1409_v12, %v4586_v22  ;;  %v1451_v2 = vmul.f32 %v1410_v47, %v4586_v22  ;;  %v1534_v28 = vmul.f32 %v4837_v10, %v4599_v25  ;;  %v4856_v4 = vld [vmem:[%s4555_s29 + $0x40] sm:$0xff]  }
  0x47   : > { %v1944_v21 = vld [vmem:[#allocation2 + $0x6a] sm:$0xff]  ;;  %v2185_v23 = vpack.c.bf16 %v2148_v63, %v2147_v43  ;;  %v1697_v53 = vadd.f32 %v1656_v1, %v1574_v0  ;;  %v1862_v20 = vmul.f32 %v1739_v29, %v4635_v35  ;;  %v1863_v61 = vmul.f32 %v1740_v17, %v4635_v35  ;;  %v1945_v42 = vld [vmem:[#allocation2 + $0x72] sm:$0xff] }
  0x48   : > { %v2067_v44 = vld [vmem:[#allocation2 + $0x6b] sm:$0xff]  ;;  %v2068_v58 = vld [vmem:[#allocation2 + $0x73] sm:$0xff]  ;;  %v1819_v34 = vadd.f32 %v1778_v5, %v1696_v26  ;;  %v1985_v62 = vmul.f32 %v1944_v21, %v4651_v40  ;;  %v1986_v12 = vmul.f32 %v1945_v42, %v4651_v40  ;;  %v1368_v45 = vadd.f32 %v1327_v11, %v1245_v38 }
  0x49   : > { %v2108_v47 = vmul.f32 %v2067_v44, %v4668_v46  ;;  %v1412_v48 = vld [vmem:[#allocation2 + $0x6f] sm:$0xff]  ;;  %4263 = vmatmul.mubr.bf16.gmra.mxu0 %v2185_v23  ;;  %v1820_v30 = vadd.f32 %v1779_v39, %v1697_v53  ;;  %v2109_v8 = vmul.f32 %v2068_v58, %v4668_v46  ;;  %v1369_v54 = vadd.f32 %v1328_v57, %v1246_v16  ;;  %v1206_v41 = vld [vmem:[#allocation2 + $0x65] sm:$0xff] }
  0x4a   : > { %4266 = vmatprep.mubr.msk.bf16.mxu0 %vm4478_vm0, %v7330_v55  ;;  %v1903_v1 = vadd.f32 %v1862_v20, %v1819_v34  ;;  %v1535_v33 = vmul.f32 %v1412_v48, %v4599_v25  ;;  %v1657_v9 = vmul.f32 %v4699_v60, %v4613_v27  ;;  %v1658_v32 = vmul.f32 %v4803_v3, %v4613_v27  ;;  %v1207_v50 = vld [vmem:[#allocation2 + $0x6d] sm:$0xff]  ;;  %v4880_v34 = vld [vmem:[#allocation2 + $0x77] sm:$0xff] }
  0x4b   : > { %v1904_v49 = vadd.f32 %v1863_v61, %v1820_v30  ;;  %v1491_v5 = vadd.f32 %v1450_v19, %v1368_v45  ;;  %v1492_v39 = vadd.f32 %v1451_v2, %v1369_v54  ;;  %v1780_v37 = vmul.f32 %v1739_v29, %v4625_v31  ;;  %v1288_v14 = vld [vmem:[#allocation2 + $0x66] sm:$0xff] }
  0x4c   : > { %v2026_v43 = vadd.f32 %v1985_v62, %v1903_v1  ;;  %v1741_v18 = vld [vmem:[#allocation2 + $0x79] sm:$0xff]  ;;  %v1742_v38 = vld [vmem:[#allocation2 + $0x81] sm:$0xff]  ;;  %v1781_v16 = vmul.f32 %v1740_v17, %v4625_v31  ;;  %v4868_v0 = vunpack.c.h.bf16 %v4820_v36  ;;  %v4871_v11 = vunpack.c.l.bf16 %v4856_v4  ;;  %v1289_v36 = vld [vmem:[#allocation2 + $0x6e] sm:$0xff] }
  0x4d   : > { %v1946_v63 = vld [vmem:[#allocation2 + $0x7a] sm:$0xff]  ;;  %v2027_v57 = vadd.f32 %v1986_v12, %v1904_v49  ;;  %v1575_v26 = vadd.f32 %v1534_v28, %v1491_v5  ;;  %v1576_v21 = vadd.f32 %v1535_v33, %v1492_v39  ;;  %v1864_v29 = vmul.f32 %v1741_v18, %v4635_v35  ;;  %v1947_v19 = vld [vmem:[#allocation2 + $0x82] sm:$0xff] }
  0x4e   : > { %7335 = vst [vmem:[#allocation18_spill] sm:$0xff] %v4868_v0  ;;  %7336 = vst [vmem:[#allocation19_spill] sm:$0xff] %v4871_v11  ;;  %v2069_v2 = vld [vmem:[#allocation2 + $0x7b] sm:$0xff]  ;;  %v2070_v23 = vld [vmem:[#allocation2 + $0x83] sm:$0xff]  ;;  %v2149_v53 = vadd.f32 %v2108_v47, %v2026_v43  ;;  %v1865_v20 = vmul.f32 %v1742_v38, %v4635_v35  ;;  %v1987_v17 = vmul.f32 %v1946_v63, %v4651_v40 }
  0x4f   : > { %v1988_v61 = vmul.f32 %v1947_v19, %v4651_v40  ;;  %1130 = vst [vmem:[#allocation2 + $0x90] sm:$0xff] %v4868_v0  ;;  %1131 = vst [vmem:[#allocation2 + $0x98] sm:$0xff] %v4871_v11  ;;  %v2150_v42 = vadd.f32 %v2109_v8, %v2027_v57  ;;  %v1698_v28 = vadd.f32 %v1657_v9, %v1575_v26  ;;  %v1414_v45 = vld [vmem:[#allocation2 + $0x7f] sm:$0xff]  ;;  %v1208_v63 = vld [vmem:[#allocation2 + $0x75] sm:$0xff] }
  0x50   : > { %v1699_v44 = vadd.f32 %v1658_v32, %v1576_v21  ;;  %v2110_v58 = vmul.f32 %v2069_v2, %v4668_v46  ;;  %v2111_v62 = vmul.f32 %v2070_v23, %v4668_v46  ;;  %v1247_v12 = vmul.f32 %v1206_v41, %v4542_v6 }
  0x51   : > { %v1248_v47 = vmul.f32 %v1207_v50, %v4542_v6  ;;  %v1329_v30 = vmul.f32 %v1288_v14, %v4565_v13  ;;  %v2186_v54 = vpack.c.bf16 %v2150_v42, %v2149_v53  ;;  %v1821_v1 = vadd.f32 %v1780_v37, %v1698_v28 }
  0x52   : > { %v1822_v33 = vadd.f32 %v1781_v16, %v1699_v44  ;;  %v1330_v8 = vmul.f32 %v1289_v36, %v4565_v13  ;;  %v1452_v32 = vmul.f32 %v4837_v10, %v4586_v22  ;;  %v1453_v49 = vmul.f32 %v1412_v48, %v4586_v22  ;;  %v4901_v16 = vld [vmem:[%s4555_s29 + $0x48] sm:$0xff]  }
  0x53   : > { %v1370_v9 = vadd.f32 %v1329_v30, %v1247_v12  ;;  %v1536_v5 = vmul.f32 %v4880_v34, %v4599_v25  ;;  %4267 = vmatmul.mubr.bf16.gmra.mxu0 %v2186_v54  ;;  %v1905_v39 = vadd.f32 %v1864_v29, %v1821_v1  ;;  %v1537_v14 = vmul.f32 %v1414_v45, %v4599_v25  ;;  %v1209_v30 = vld [vmem:[#allocation2 + $0x7d] sm:$0xff] }
  0x54   : > { %v1906_v41 = vadd.f32 %v1865_v20, %v1822_v33  ;;  %v1371_v50 = vadd.f32 %v1330_v8, %v1248_v47  ;;  %4270 = vmatprep.mubr.msk.bf16.mxu0 %vm4478_vm0, %v7330_v55  ;;  %v1659_v43 = vmul.f32 %v4805_v24, %v4613_v27  ;;  %v1660_v10 = vmul.f32 %v4832_v56, %v4613_v27  ;;  %v1290_v54 = vld [vmem:[#allocation2 + $0x76] sm:$0xff]  ;;  %v1291_v1 = vld [vmem:[#allocation2 + $0x7e] sm:$0xff] }
  0x55   : > { %v1493_v37 = vadd.f32 %v1452_v32, %v1370_v9  ;;  %v1782_v48 = vmul.f32 %v1741_v18, %v4625_v31  ;;  %v2028_v57 = vadd.f32 %v1987_v17, %v1905_v39  ;;  %v1783_v2 = vmul.f32 %v1742_v38, %v4625_v31  ;;  %v1415_v32 = vld [vmem:[#allocation2 + $0x87] sm:$0xff] }
  0x56   : > { %v2029_v26 = vadd.f32 %v1988_v61, %v1906_v41  ;;  %v1494_v21 = vadd.f32 %v1453_v49, %v1371_v50  ;;  %v1743_v29 = vld [vmem:[#allocation2 + $0x89] sm:$0xff]  ;;  %v1744_v19 = vld [vmem:[#allocation2 + $0x91] sm:$0xff]  ;;  %v4911_v9 = vunpack.c.h.bf16 %v4856_v4  ;;  %v1250_v50 = vmul.f32 %v1209_v30, %v4542_v6 }
  0x57   : > { %v1948_v23 = vld [vmem:[#allocation2 + $0x8a] sm:$0xff]  ;;  %v1577_v53 = vadd.f32 %v1536_v5, %v1493_v37  ;;  %v1866_v20 = vmul.f32 %v1743_v29, %v4635_v35  ;;  %v1867_v36 = vmul.f32 %v1744_v19, %v4635_v35  ;;  %v1949_v42 = vld [vmem:[#allocation2 + $0x92] sm:$0xff]  ;;  %v2151_v12 = vadd.f32 %v2110_v58, %v2028_v57 }
  0x58   : > { %v1989_v28 = vmul.f32 %v1948_v23, %v4651_v40  ;;  %v2071_v18 = vld [vmem:[#allocation2 + $0x8b] sm:$0xff]  ;;  %v2072_v44 = vld [vmem:[#allocation2 + $0x93] sm:$0xff]  ;;  %v2152_v47 = vadd.f32 %v2111_v62, %v2029_v26  ;;  %v1578_v17 = vadd.f32 %v1537_v14, %v1494_v21  ;;  %v1990_v61 = vmul.f32 %v1949_v42, %v4651_v40  ;;  %7337 = vst [vmem:[#allocation20_spill] sm:$0xff] %v4911_v9 }
  0x59   : > { %v1700_v38 = vadd.f32 %v1659_v43, %v1577_v53  ;;  %v2112_v33 = vmul.f32 %v2071_v18, %v4668_v46  ;;  %v2113_v8 = vmul.f32 %v2072_v44, %v4668_v46  ;;  %v4914_v58 = vunpack.c.l.bf16 %v4901_v16  ;;  %v4917_v39 = vld [vmem:[#allocation2 + $0x8f] sm:$0xff]  ;;  %1132 = vst [vmem:[#allocation2 + $0xa0] sm:$0xff] %v4911_v9 }
  0x5a   : > { %v2187_v49 = vpack.c.bf16 %v2152_v47, %v2151_v12  ;;  %v1701_v5 = vadd.f32 %v1660_v10, %v1578_v17  ;;  %v1249_v62 = vmul.f32 %v1208_v63, %v4542_v6  ;;  %v1331_v14 = vmul.f32 %v1290_v54, %v4565_v13  ;;  %v4933_v23 = vld [vmem:[%s4555_s29 + $0x50] sm:$0xff]   ;;  %v1292_v47 = vld [vmem:[#allocation2 + $0x86] sm:$0xff] }
  0x5b   : > { %7338 = vst [vmem:[#allocation21_spill] sm:$0xff] %v4914_v58  ;;  %v1823_v41 = vadd.f32 %v1782_v48, %v1700_v38  ;;  %v1332_v4 = vmul.f32 %v1291_v1, %v4565_v13  ;;  %1133 = vst [vmem:[#allocation2 + $0xa8] sm:$0xff] %v4914_v58  ;;  %v1454_v43 = vmul.f32 %v4880_v34, %v4586_v22  ;;  %v1211_v18 = vld [vmem:[#allocation2 + $0x8d] sm:$0xff]  ;;  %v4942_v54 = vunpack.c.h.bf16 %v4901_v16 }
  0x5c   : > { %4271 = vmatmul.mubr.bf16.gmra.mxu0 %v2187_v49  ;;  %v1824_v37 = vadd.f32 %v1783_v2, %v1701_v5  ;;  %v1455_v10 = vmul.f32 %v1414_v45, %v4586_v22  ;;  %v1538_v48 = vmul.f32 %v1415_v32, %v4599_v25  ;;  %v1372_v57 = vadd.f32 %v1331_v14, %v1249_v62  ;;  %v1210_v2 = vld [vmem:[#allocation2 + $0x85] sm:$0xff]  ;;  %v1293_v17 = vld [vmem:[#allocation2 + $0x8e] sm:$0xff]  ;;  %v4949_v5 = vld [vmem:[#allocation2 + $0x97] sm:$0xff] }
  0x5d   : > { %4274 = vmatprep.mubr.msk.bf16.mxu0 %vm4478_vm0, %v7330_v55  ;;  %v1907_v63 = vadd.f32 %v1866_v20, %v1823_v41  ;;  %v1373_v26 = vadd.f32 %v1332_v4, %v1250_v50  ;;  %v1539_v21 = vmul.f32 %v4917_v39, %v4599_v25  ;;  %v1661_v34 = vmul.f32 %v4835_v7, %v4613_v27 }
  0x5e   : > { %v1908_v53 = vadd.f32 %v1867_v36, %v1824_v37  ;;  %v1662_v45 = vmul.f32 %v4868_v0, %v4613_v27  ;;  %v1784_v42 = vmul.f32 %v1743_v29, %v4625_v31  ;;  %v1495_v20 = vadd.f32 %v1454_v43, %v1372_v57  ;;  %7339 = vst [vmem:[#allocation22_spill] sm:$0xff] %v4942_v54 }
  0x5f   : > { %v2030_v55 = vadd.f32 %v1989_v28, %v1907_v63  ;;  %v1496_v44 = vadd.f32 %v1455_v10, %v1373_v26  ;;  %v1785_v12 = vmul.f32 %v1744_v19, %v4625_v31  ;;  %v4945_v36 = vunpack.c.l.bf16 %v4933_v23  ;;  %1134 = vst [vmem:[#allocation2 + $0xb0] sm:$0xff] %v4942_v54 }
  0x60   : > { %v2031_v30 = vadd.f32 %v1990_v61, %v1908_v53  ;;  %v1251_v1 = vmul.f32 %v1210_v2, %v4542_v6  ;;  %v1579_v49 = vadd.f32 %v1538_v48, %v1495_v20  ;;  %v1252_v28 = vmul.f32 %v1211_v18, %v4542_v6  ;;  %v1745_v19 = vld [vmem:[#allocation2 + $0x99] sm:$0xff] }
  0x61   : > { %7340 = vst [vmem:[#allocation23_spill] sm:$0xff] %v4945_v36  ;;  %v2153_v38 = vadd.f32 %v2112_v33, %v2030_v55  ;;  %v1580_v29 = vadd.f32 %v1539_v21, %v1496_v44  ;;  %v1950_v41 = vld [vmem:[#allocation2 + $0x9a] sm:$0xff]  ;;  %1135 = vst [vmem:[#allocation2 + $0xb8] sm:$0xff] %v4945_v36  ;;  %v1333_v16 = vmul.f32 %v1292_v47, %v4565_v13 }
  0x62   : > { %v2154_v62 = vadd.f32 %v2113_v8, %v2031_v30  ;;  %v2073_v50 = vld [vmem:[#allocation2 + $0x9b] sm:$0xff]  ;;  %v1334_v61 = vmul.f32 %v1293_v17, %v4565_v13  ;;  %v1456_v33 = vmul.f32 %v1415_v32, %v4586_v22  ;;  %v1702_v14 = vadd.f32 %v1661_v34, %v1579_v49  ;;  %v2074_v48 = vld [vmem:[#allocation2 + $0xa3] sm:$0xff] }
  0x63   : > { %v1703_v4 = vadd.f32 %v1662_v45, %v1580_v29  ;;  %v1746_v37 = vld [vmem:[#allocation2 + $0xa1] sm:$0xff]  ;;  %v1868_v43 = vmul.f32 %v1745_v19, %v4635_v35  ;;  %v1991_v8 = vmul.f32 %v1950_v41, %v4651_v40  ;;  %v2114_v21 = vmul.f32 %v2073_v50, %v4668_v46  ;;  %v4978_v29 = vld [vmem:[%s4555_s29 + $0x58] sm:$0xff]  }
  0x64   : > { %v1951_v10 = vld [vmem:[#allocation2 + $0xa2] sm:$0xff]  ;;  %v2188_v63 = vpack.c.bf16 %v2154_v62, %v2153_v38  ;;  %v1869_v57 = vmul.f32 %v1746_v37, %v4635_v35  ;;  %v1825_v53 = vadd.f32 %v1784_v42, %v1702_v14  ;;  %v2115_v32 = vmul.f32 %v2074_v48, %v4668_v46 }
  0x65   : > { %v1992_v26 = vmul.f32 %v1951_v10, %v4651_v40  ;;  %v1418_v2 = vld [vmem:[#allocation2 + $0x9f] sm:$0xff]  ;;  %v1826_v18 = vadd.f32 %v1785_v12, %v1703_v4  ;;  %v1374_v34 = vadd.f32 %v1333_v16, %v1251_v1  ;;  %v1375_v45 = vadd.f32 %v1334_v61, %v1252_v28  ;;  %v1212_v28 = vld [vmem:[#allocation2 + $0x95] sm:$0xff] }
  0x66   : > { %4275 = vmatmul.mubr.bf16.gmra.mxu0 %v2188_v63  ;;  %v1457_v55 = vmul.f32 %v4917_v39, %v4586_v22  ;;  %v1540_v20 = vmul.f32 %v4949_v5, %v4599_v25  ;;  %v1541_v44 = vmul.f32 %v1418_v2, %v4599_v25  ;;  %v4967_v47 = vld [vmem:[#allocation2] sm:$0xff]  ;;  %v1909_v42 = vadd.f32 %v1868_v43, %v1825_v53  ;;  %v1747_v61 = vld [vmem:[#allocation2 + $0xa9] sm:$0xff] }
  0x67   : > { %4278 = vmatprep.mubr.msk.bf16.mxu0 %vm4478_vm0, %v4967_v47  ;;  %v1910_v12 = vadd.f32 %v1869_v57, %v1826_v18  ;;  %v1497_v17 = vadd.f32 %v1456_v33, %v1374_v34  ;;  %v1663_v30 = vmul.f32 %v4871_v11, %v4613_v27  ;;  %v1664_v39 = vmul.f32 %v4911_v9, %v4613_v27  ;;  %v1213_v62 = vld [vmem:[#allocation2 + $0x9d] sm:$0xff]  ;;  %v1952_v14 = vld [vmem:[#allocation2 + $0xaa] sm:$0xff] }
  0x68   : > { %v1498_v1 = vadd.f32 %v1457_v55, %v1375_v45  ;;  %v1786_v38 = vmul.f32 %v1745_v19, %v4625_v31  ;;  %v1787_v49 = vmul.f32 %v1746_v37, %v4625_v31  ;;  %v2032_v41 = vadd.f32 %v1991_v8, %v1909_v42  ;;  %v1748_v33 = vld [vmem:[#allocation2 + $0xb1] sm:$0xff]  ;;  %v4993_v42 = vld [vmem:[#allocation2 + $0xa7] sm:$0xff] }
  0x69   : > { %v2033_v50 = vadd.f32 %v1992_v26, %v1910_v12  ;;  %v1581_v16 = vadd.f32 %v1540_v20, %v1497_v17  ;;  %v4981_v4 = vunpack.c.h.bf16 %v4933_v23  ;;  %v1870_v10 = vmul.f32 %v1747_v61, %v4635_v35  ;;  %v1953_v48 = vld [vmem:[#allocation2 + $0xb2] sm:$0xff]  ;;  %v1295_v23 = vld [vmem:[#allocation2 + $0x9e] sm:$0xff] }
  0x6a   : > { %v1582_v43 = vadd.f32 %v1541_v44, %v1498_v1  ;;  %v1871_v19 = vmul.f32 %v1748_v33, %v4635_v35  ;;  %v1993_v37 = vmul.f32 %v1952_v14, %v4651_v40  ;;  %v2075_v63 = vld [vmem:[#allocation2 + $0xab] sm:$0xff]  ;;  %v2076_v57 = vld [vmem:[#allocation2 + $0xb3] sm:$0xff]  ;;  %v2155_v53 = vadd.f32 %v2114_v21, %v2032_v41 }
  0x6b   : > { %7341 = vst [vmem:[#allocation24_spill] sm:$0xff] %v4981_v4  ;;  %v2156_v8 = vadd.f32 %v2115_v32, %v2033_v50  ;;  %v1704_v26 = vadd.f32 %v1663_v30, %v1581_v16  ;;  %v1994_v18 = vmul.f32 %v1953_v48, %v4651_v40  ;;  %1136 = vst [vmem:[#allocation2 + $0xc0] sm:$0xff] %v4981_v4  ;;  %v1294_v34 = vld [vmem:[#allocation2 + $0x96] sm:$0xff]  ;;  %v4991_v44 = vunpack.c.l.bf16 %v4978_v29 }
  0x6c   : > { %v1705_v45 = vadd.f32 %v1664_v39, %v1582_v43  ;;  %v2116_v55 = vmul.f32 %v2075_v63, %v4668_v46  ;;  %v2117_v20 = vmul.f32 %v2076_v57, %v4668_v46  ;;  %v4995_v12 = vld [vmem:[#allocation2 + $0xaf] sm:$0xff]  ;;  %v1253_v17 = vmul.f32 %v1212_v28, %v4542_v6 }
  0x6d   : > { %7342 = vst [vmem:[#allocation25_spill] sm:$0xff] %v4991_v44  ;;  %v2189_v21 = vpack.c.bf16 %v2156_v8, %v2155_v53  ;;  %v1827_v32 = vadd.f32 %v1786_v38, %v1704_v26  ;;  %v1254_v30 = vmul.f32 %v1213_v62, %v4542_v6  ;;  %1137 = vst [vmem:[#allocation2 + $0xc8] sm:$0xff] %v4991_v44  ;;  %v1215_v8 = vld [vmem:[#allocation2 + $0xad] sm:$0xff] }
  0x6e   : > { %v1828_v1 = vadd.f32 %v1787_v49, %v1705_v45  ;;  %v1335_v39 = vmul.f32 %v1294_v34, %v4565_v13  ;;  %v1336_v41 = vmul.f32 %v1295_v23, %v4565_v13  ;;  %v1458_v50 = vmul.f32 %v4949_v5, %v4586_v22  ;;  %v5014_v5 = vld [vmem:[%s4555_s29 + $0x60] sm:$0xff]   ;;  %v1297_v34 = vld [vmem:[#allocation2 + $0xae] sm:$0xff] }
  0x6f   : > { %4279 = vmatmul.mubr.bf16.gmra.mxu0 %v2189_v21  ;;  %v1911_v16 = vadd.f32 %v1870_v10, %v1827_v32  ;;  %v1459_v14 = vmul.f32 %v1418_v2, %v4586_v22  ;;  %v1542_v38 = vmul.f32 %v4993_v42, %v4599_v25  ;;  %v1543_v28 = vmul.f32 %v4995_v12, %v4599_v25  ;;  %v1214_v10 = vld [vmem:[#allocation2 + $0xa5] sm:$0xff] }
  0x70   : > { %4282 = vmatprep.mubr.msk.bf16.mxu0 %vm4478_vm0, %v4967_v47  ;;  %v1912_v49 = vadd.f32 %v1871_v19, %v1828_v1  ;;  %v1376_v62 = vadd.f32 %v1335_v39, %v1253_v17  ;;  %v1377_v43 = vadd.f32 %v1336_v41, %v1254_v30  ;;  %v1665_v48 = vmul.f32 %v4914_v58, %v4613_v27  ;;  %v1296_v26 = vld [vmem:[#allocation2 + $0xa6] sm:$0xff] }
  0x71   : > { %v2034_v63 = vadd.f32 %v1993_v37, %v1911_v16  ;;  %v1666_v2 = vmul.f32 %v4942_v54, %v4613_v27  ;;  %v1788_v57 = vmul.f32 %v1747_v61, %v4625_v31  ;;  %v1789_v53 = vmul.f32 %v1748_v33, %v4625_v31 }
  0x72   : > { %v2035_v19 = vadd.f32 %v1994_v18, %v1912_v49  ;;  %v1499_v23 = vadd.f32 %v1458_v50, %v1376_v62  ;;  %v1500_v45 = vadd.f32 %v1459_v14, %v1377_v43  ;;  %v1749_v21 = vld [vmem:[#allocation2 + $0xb9] sm:$0xff]  ;;  %v5021_v30 = vunpack.c.h.bf16 %v4978_v29 }
  0x73   : > { %v1954_v32 = vld [vmem:[#allocation2 + $0xba] sm:$0xff]  ;;  %v2157_v37 = vadd.f32 %v2116_v55, %v2034_v63  ;;  %v1872_v1 = vmul.f32 %v1749_v21, %v4635_v35  ;;  %v5027_v18 = vunpack.c.l.bf16 %v5014_v5  ;;  %v1255_v29 = vmul.f32 %v1214_v10, %v4542_v6 }
  0x74   : > { %v2077_v17 = vld [vmem:[#allocation2 + $0xbb] sm:$0xff]  ;;  %7343 = vst [vmem:[#allocation26_spill] sm:$0xff] %v5021_v30  ;;  %v1995_v39 = vmul.f32 %v1954_v32, %v4651_v40  ;;  %v2158_v33 = vadd.f32 %v2117_v20, %v2035_v19  ;;  %v1583_v41 = vadd.f32 %v1542_v38, %v1499_v23  ;;  %v1584_v16 = vadd.f32 %v1543_v28, %v1500_v45  ;;  %v2078_v49 = vld [vmem:[#allocation2 + $0xc3] sm:$0xff] }
  0x75   : > { %v2118_v61 = vmul.f32 %v2077_v17, %v4668_v46  ;;  %7344 = vst [vmem:[#allocation27_spill] sm:$0xff] %v5027_v18  ;;  %1138 = vst [vmem:[#allocation2 + $0xd0] sm:$0xff] %v5021_v30  ;;  %v1750_v50 = vld [vmem:[#allocation2 + $0xc1] sm:$0xff]  ;;  %v1256_v55 = vmul.f32 %v1215_v8, %v4542_v6  ;;  %v1337_v62 = vmul.f32 %v1296_v26, %v4565_v13  ;;  %v1421_v19 = vld [vmem:[#allocation2 + $0xb7] sm:$0xff] }
  0x76   : > { %v1955_v14 = vld [vmem:[#allocation2 + $0xc2] sm:$0xff]  ;;  %v1338_v43 = vmul.f32 %v1297_v34, %v4565_v13  ;;  %v2190_v63 = vpack.c.bf16 %v2158_v33, %v2157_v37  ;;  %v1706_v20 = vadd.f32 %v1665_v48, %v1583_v41  ;;  %v1707_v38 = vadd.f32 %v1666_v2, %v1584_v16  ;;  %1139 = vst [vmem:[#allocation2 + $0xd8] sm:$0xff] %v5027_v18 }
  0x77   : > { %v1873_v28 = vmul.f32 %v1750_v50, %v4635_v35  ;;  %v1422_v23 = vld [vmem:[#allocation2 + $0xbf] sm:$0xff]  ;;  %v1996_v45 = vmul.f32 %v1955_v14, %v4651_v40  ;;  %v2119_v10 = vmul.f32 %v2078_v49, %v4668_v46  ;;  %v1378_v32 = vadd.f32 %v1337_v62, %v1255_v29  ;;  %v5043_v2 = vld [vmem:[%s4555_s29 + $0x68] sm:$0xff]  }
  0x78   : > { %v1379_v8 = vadd.f32 %v1338_v43, %v1256_v55  ;;  %4283 = vmatmul.mubr.bf16.gmra.mxu0 %v2190_v63  ;;  %v1829_v26 = vadd.f32 %v1788_v57, %v1706_v20  ;;  %v1830_v17 = vadd.f32 %v1789_v53, %v1707_v38  ;;  %v1460_v34 = vmul.f32 %v4993_v42, %v4586_v22 }
  0x79   : > { %v1461_v48 = vmul.f32 %v4995_v12, %v4586_v22  ;;  %4286 = vmatprep.mubr.msk.bf16.mxu0 %vm4478_vm0, %v4967_v47  ;;  %v1544_v37 = vmul.f32 %v1421_v19, %v4599_v25  ;;  %v1545_v33 = vmul.f32 %v1422_v23, %v4599_v25  ;;  %v1667_v41 = vmul.f32 %v4945_v36, %v4613_v27  ;;  %v1216_v12 = vld [vmem:[#allocation2 + $0xb5] sm:$0xff] }
  0x7a   : > { %v1668_v57 = vmul.f32 %v4981_v4, %v4613_v27  ;;  %v1913_v53 = vadd.f32 %v1872_v1, %v1829_v26  ;;  %v1914_v42 = vadd.f32 %v1873_v28, %v1830_v17  ;;  %v1501_v16 = vadd.f32 %v1460_v34, %v1378_v32  ;;  %v1217_v32 = vld [vmem:[#allocation2 + $0xbd] sm:$0xff] }
  0x7b   : > { %v1502_v14 = vadd.f32 %v1461_v48, %v1379_v8  ;;  %v1790_v29 = vmul.f32 %v1749_v21, %v4625_v31  ;;  %v1791_v55 = vmul.f32 %v1750_v50, %v4625_v31  ;;  %v5056_v63 = vunpack.c.h.bf16 %v5014_v5  ;;  %v1298_v8 = vld [vmem:[#allocation2 + $0xb6] sm:$0xff] }
  0x7c   : > { %v1751_v49 = vld [vmem:[#allocation2 + $0xc9] sm:$0xff]  ;;  %v5059_v20 = vunpack.c.l.bf16 %v5043_v2  ;;  %v2036_v38 = vadd.f32 %v1995_v39, %v1913_v53  ;;  %v2037_v4 = vadd.f32 %v1996_v45, %v1914_v42  ;;  %v1585_v1 = vadd.f32 %v1544_v37, %v1501_v16  ;;  %v1299_v53 = vld [vmem:[#allocation2 + $0xbe] sm:$0xff] }
  0x7d   : > { %v1956_v62 = vld [vmem:[#allocation2 + $0xca] sm:$0xff]  ;;  %7345 = vst [vmem:[#allocation28_spill] sm:$0xff] %v5056_v63  ;;  %v1586_v28 = vadd.f32 %v1545_v33, %v1502_v14  ;;  %v1874_v17 = vmul.f32 %v1751_v49, %v4635_v35  ;;  %v1957_v21 = vld [vmem:[#allocation2 + $0xd2] sm:$0xff]  ;;  %1140 = vst [vmem:[#allocation2 + $0xe0] sm:$0xff] %v5056_v63  ;;  %v1257_v5 = vmul.f32 %v1216_v12, %v4542_v6 }
  0x7e   : > { %v2079_v43 = vld [vmem:[#allocation2 + $0xcb] sm:$0xff]  ;;  %7346 = vst [vmem:[#allocation29_spill] sm:$0xff] %v5059_v20  ;;  %v1997_v50 = vmul.f32 %v1956_v62, %v4651_v40  ;;  %v2080_v34 = vld [vmem:[#allocation2 + $0xd3] sm:$0xff]  ;;  %1141 = vst [vmem:[#allocation2 + $0xe8] sm:$0xff] %v5059_v20  ;;  %v2159_v39 = vadd.f32 %v2118_v61, %v2036_v38  ;;  %v2160_v45 = vadd.f32 %v2119_v10, %v2037_v4 }
  0x7f   : > { %v1752_v26 = vld [vmem:[#allocation2 + $0xd1] sm:$0xff]  ;;  %v2120_v48 = vmul.f32 %v2079_v43, %v4668_v46  ;;  %v1708_v37 = vadd.f32 %v1667_v41, %v1585_v1  ;;  %v1709_v33 = vadd.f32 %v1668_v57, %v1586_v28  ;;  %v5067_v42 = vld [vmem:[#allocation2 + $0xc7] sm:$0xff]  ;;  %v1998_v14 = vmul.f32 %v1957_v21, %v4651_v40 }
  0x80   : > { %v1875_v16 = vmul.f32 %v1752_v26, %v4635_v35  ;;  %v2121_v62 = vmul.f32 %v2080_v34, %v4668_v46  ;;  %v1258_v43 = vmul.f32 %v1217_v32, %v4542_v6  ;;  %v5073_v36 = vld [vmem:[#allocation2 + $0xcf] sm:$0xff]  ;;  %v2191_v54 = vpack.c.bf16 %v2160_v45, %v2159_v39  ;;  %v4452_v38 = vld [vmem:[%s7270_s2 + $0x38] sm:$0xff]  }
  0x81   : > { %v1831_v58 = vadd.f32 %v1790_v29, %v1708_v37  ;;  %v1832_v12 = vadd.f32 %v1791_v55, %v1709_v33  ;;  %v1339_v4 = vmul.f32 %v1298_v8, %v4565_v13  ;;  %v1340_v61 = vmul.f32 %v1299_v53, %v4565_v13  ;;  %v5094_v21 = vld [vmem:[%s4555_s29 + $0x70] sm:$0xff]   ;;  %4335 = vmatpush3.bf16.msra.mxu1 %v4452_v38 }
  0x82   : > { %v1462_v10 = vmul.f32 %v1421_v19, %v4586_v22  ;;  %v1463_v41 = vmul.f32 %v1422_v23, %v4586_v22  ;;  %v1546_v57 = vmul.f32 %v5067_v42, %v4599_v25  ;;  %4287 = vmatmul.mubr.bf16.gmra.mxu0 %v2191_v54  ;;  %v1547_v28 = vmul.f32 %v5073_v36, %v4599_v25  ;;  %v1301_v38 = vld [vmem:[#allocation2 + $0xce] sm:$0xff] }
  0x83   : > { %v1915_v1 = vadd.f32 %v1874_v17, %v1831_v58  ;;  %v1916_v29 = vadd.f32 %v1875_v16, %v1832_v12  ;;  %v1380_v55 = vadd.f32 %v1339_v4, %v1257_v5  ;;  %4290 = vmatprep.mubr.msk.bf16.mxu0 %vm4478_vm0, %v4967_v47  ;;  %v1381_v19 = vadd.f32 %v1340_v61, %v1258_v43  ;;  %v1218_v58 = vld [vmem:[#allocation2 + $0xc5] sm:$0xff] }
  0x84   : > { %v1669_v23 = vmul.f32 %v4991_v44, %v4613_v27  ;;  %v1670_v32 = vmul.f32 %v5021_v30, %v4613_v27  ;;  %v1792_v8 = vmul.f32 %v1751_v49, %v4625_v31  ;;  %v1753_v5 = vld [vmem:[#allocation2 + $0xd9] sm:$0xff]  ;;  %v1793_v45 = vmul.f32 %v1752_v26, %v4625_v31  ;;  %4336 = vmatprep.subr.bf16.mxu1 %v4967_v47  ;;  %v1219_v26 = vld [vmem:[#allocation2 + $0xcd] sm:$0xff] }
  0x85   : > { %v2038_v54 = vadd.f32 %v1997_v50, %v1915_v1  ;;  %v2039_v17 = vadd.f32 %v1998_v14, %v1916_v29  ;;  %v1503_v34 = vadd.f32 %v1462_v10, %v1380_v55  ;;  %v1754_v39 = vld [vmem:[#allocation2 + $0xe1] sm:$0xff]  ;;  %v1504_v33 = vadd.f32 %v1463_v41, %v1381_v19 }
  0x86   : > { %v1958_v37 = vld [vmem:[#allocation2 + $0xda] sm:$0xff]  ;;  %v1876_v53 = vmul.f32 %v1753_v5, %v4635_v35  ;;  %v1877_v16 = vmul.f32 %v1754_v39, %v4635_v35  ;;  %v1959_v43 = vld [vmem:[#allocation2 + $0xe2] sm:$0xff]  ;;  %v5105_v19 = vunpack.c.h.bf16 %v5043_v2  ;;  %v1260_v2 = vmul.f32 %v1219_v26, %v4542_v6 }
  0x87   : > { %v1999_v49 = vmul.f32 %v1958_v37, %v4651_v40  ;;  %v2081_v12 = vld [vmem:[#allocation2 + $0xdb] sm:$0xff]  ;;  %v2082_v4 = vld [vmem:[#allocation2 + $0xe3] sm:$0xff]  ;;  %v2161_v50 = vadd.f32 %v2120_v48, %v2038_v54  ;;  %v2162_v14 = vadd.f32 %v2121_v62, %v2039_v17  ;;  %v1587_v61 = vadd.f32 %v1546_v57, %v1503_v34 }
  0x88   : > { %v2000_v10 = vmul.f32 %v1959_v43, %v4651_v40  ;;  %v1300_v1 = vld [vmem:[#allocation2 + $0xc6] sm:$0xff]  ;;  %v1588_v41 = vadd.f32 %v1547_v28, %v1504_v33  ;;  %v2122_v29 = vmul.f32 %v2081_v12, %v4668_v46  ;;  %v2123_v55 = vmul.f32 %v2082_v4, %v4668_v46  ;;  %7347 = vst [vmem:[#allocation30_spill] sm:$0xff] %v5105_v19  ;;  %v1425_v37 = vld [vmem:[#allocation2 + $0xd7] sm:$0xff] }
  0x89   : > { %v2192_v30 = vpack.c.bf16 %v2162_v14, %v2161_v50  ;;  %v1710_v44 = vadd.f32 %v1669_v23, %v1587_v61  ;;  %v5108_v48 = vunpack.c.l.bf16 %v5094_v21  ;;  %v1259_v62 = vmul.f32 %v1218_v58, %v4542_v6  ;;  %v5111_v57 = vld [vmem:[#allocation2 + $0xdf] sm:$0xff]  ;;  %v4453_v28 = vld [vmem:[%s7270_s2 + $0x30] sm:$0xff]   ;;  %1142 = vst [vmem:[#allocation2 + $0xf0] sm:$0xff] %v5105_v19 }
  0x8a   : > { %v1711_v54 = vadd.f32 %v1670_v32, %v1588_v41  ;;  %v1341_v17 = vmul.f32 %v1300_v1, %v4565_v13  ;;  %v1342_v23 = vmul.f32 %v1301_v38, %v4565_v13  ;;  %v1464_v58 = vmul.f32 %v5067_v42, %v4586_v22  ;;  %v1221_v61 = vld [vmem:[#allocation2 + $0xdd] sm:$0xff]  ;;  %4337 = vmatpush3.bf16.msra.mxu1 %v4453_v28 }
  0x8b   : > { %7348 = vst [vmem:[#allocation31_spill] sm:$0xff] %v5108_v48  ;;  %4291 = vmatmul.mubr.bf16.gmra.mxu0 %v2192_v30  ;;  %v1833_v34 = vadd.f32 %v1792_v8, %v1710_v44  ;;  %1143 = vst [vmem:[#allocation2 + $0xf8] sm:$0xff] %v5108_v48  ;;  %v1465_v33 = vmul.f32 %v5073_v36, %v4586_v22  ;;  %v1548_v32 = vmul.f32 %v1425_v37, %v4599_v25  ;;  %v5131_v44 = vld [vmem:[%s4555_s29 + $0x78] sm:$0xff]  }
  0x8c   : > { %4294 = vmatprep.mubr.msk.bf16.mxu0 %vm4478_vm0, %v4967_v47  ;;  %v1834_v43 = vadd.f32 %v1793_v45, %v1711_v54  ;;  %v1382_v12 = vadd.f32 %v1341_v17, %v1259_v62  ;;  %v1383_v4 = vadd.f32 %v1342_v23, %v1260_v2  ;;  %v1549_v30 = vmul.f32 %v5111_v57, %v4599_v25  ;;  %v1220_v8 = vld [vmem:[#allocation2 + $0xd5] sm:$0xff]  ;;  %v4454_v45 = vld [vmem:[%s7270_s2 + $0x28] sm:$0xff]   ;;  %v1303_v62 = vld [vmem:[#allocation2 + $0xde] sm:$0xff] }
  0x8d   : > { %v1917_v50 = vadd.f32 %v1876_v53, %v1833_v34  ;;  %v1671_v42 = vmul.f32 %v5027_v18, %v4613_v27  ;;  %v1672_v36 = vmul.f32 %v5056_v63, %v4613_v27  ;;  %v1794_v14 = vmul.f32 %v1753_v5, %v4625_v31  ;;  %v1302_v53 = vld [vmem:[#allocation2 + $0xd6] sm:$0xff]  ;;  %4338 = vmatprep.subr.bf16.mxu1 %v4967_v47 }
  0x8e   : > { %v1918_v26 = vadd.f32 %v1877_v16, %v1834_v43  ;;  %v1505_v1 = vadd.f32 %v1464_v58, %v1382_v12  ;;  %v1506_v38 = vadd.f32 %v1465_v33, %v1383_v4  ;;  %v1795_v41 = vmul.f32 %v1754_v39, %v4625_v31  ;;  %v5151_v58 = vld [vmem:[#allocation2 + $0xe7] sm:$0xff]  ;;  %4339 = vmatpush3.bf16.msra.mxu1 %v4454_v45 }
  0x8f   : > { %v2040_v54 = vadd.f32 %v1999_v49, %v1917_v50  ;;  %v5144_v2 = vunpack.c.h.bf16 %v5094_v21  ;;  %v5147_v5 = vunpack.c.l.bf16 %v5131_v44  ;;  %v1261_v28 = vmul.f32 %v1220_v8, %v4542_v6  ;;  %v4455_v39 = vld [vmem:[%s7270_s2 + $0x20] sm:$0xff]   ;;  %4340 = vmatprep.subr.bf16.mxu1 %v4967_v47 }
  0x90   : > { %v2041_v17 = vadd.f32 %v2000_v10, %v1918_v26  ;;  %v1589_v23 = vadd.f32 %v1548_v32, %v1505_v1  ;;  %v1590_v16 = vadd.f32 %v1549_v30, %v1506_v38  ;;  %v1262_v34 = vmul.f32 %v1221_v61, %v4542_v6  ;;  %v1755_v33 = vld [vmem:[#allocation2 + $0xe9] sm:$0xff] }
  0x91   : > { %7349 = vst [vmem:[#allocation32_spill] sm:$0xff] %v5144_v2  ;;  %7350 = vst [vmem:[#allocation33_spill] sm:$0xff] %v5147_v5  ;;  %v2163_v49 = vadd.f32 %v2122_v29, %v2040_v54  ;;  %v1960_v21 = vld [vmem:[#allocation2 + $0xea] sm:$0xff]  ;;  %v1343_v10 = vmul.f32 %v1302_v53, %v4565_v13  ;;  %v1344_v32 = vmul.f32 %v1303_v62, %v4565_v13 }
  0x92   : > { %v2083_v43 = vld [vmem:[#allocation2 + $0xeb] sm:$0xff]  ;;  %1144 = vst [vmem:[#allocation2 + $0x100] sm:$0xff] %v5144_v2  ;;  %1145 = vst [vmem:[#allocation2 + $0x108] sm:$0xff] %v5147_v5  ;;  %v1466_v12 = vmul.f32 %v1425_v37, %v4586_v22  ;;  %v2164_v4 = vadd.f32 %v2123_v55, %v2041_v17  ;;  %v1712_v30 = vadd.f32 %v1671_v42, %v1589_v23  ;;  %v2084_v26 = vld [vmem:[#allocation2 + $0xf3] sm:$0xff]  ;;  %4341 = vmatpush3.bf16.msra.mxu1 %v4455_v39 }
  0x93   : > { %v1713_v8 = vadd.f32 %v1672_v36, %v1590_v16  ;;  %v1756_v50 = vld [vmem:[#allocation2 + $0xf1] sm:$0xff]  ;;  %v1878_v29 = vmul.f32 %v1755_v33, %v4635_v35  ;;  %v2001_v38 = vmul.f32 %v1960_v21, %v4651_v40  ;;  %v2124_v62 = vmul.f32 %v2083_v43, %v4668_v46  ;;  %4342 = vmatprep.subr.bf16.mxu1 %v4967_v47 }
  0x94   : > { %v1961_v61 = vld [vmem:[#allocation2 + $0xf2] sm:$0xff]  ;;  %v1879_v1 = vmul.f32 %v1756_v50, %v4635_v35  ;;  %v2193_v55 = vpack.c.bf16 %v2164_v4, %v2163_v49  ;;  %v1835_v42 = vadd.f32 %v1794_v14, %v1712_v30  ;;  %v2125_v45 = vmul.f32 %v2084_v26, %v4668_v46 }
  0x95   : > { %v2002_v53 = vmul.f32 %v1961_v61, %v4651_v40  ;;  %v5167_v37 = vld [vmem:[#allocation2 + $0xef] sm:$0xff]  ;;  %v1836_v36 = vadd.f32 %v1795_v41, %v1713_v8  ;;  %v1384_v54 = vadd.f32 %v1343_v10, %v1261_v28  ;;  %v1385_v17 = vadd.f32 %v1344_v32, %v1262_v34  ;;  %v4456_v21 = vld [vmem:[%s7270_s2 + $0x18] sm:$0xff]   ;;  %v5187_v10 = vld [vmem:[%s4555_s29 + $0x80] sm:$0xff]  }
  0x96   : > { %v1467_v23 = vmul.f32 %v5111_v57, %v4586_v22  ;;  %v1550_v16 = vmul.f32 %v5151_v58, %v4599_v25  ;;  %4295 = vmatmul.mubr.bf16.gmra.mxu0 %v2193_v55  ;;  %v1919_v49 = vadd.f32 %v1878_v29, %v1835_v42  ;;  %v1551_v41 = vmul.f32 %v5167_v37, %v4599_v25  ;;  %v1222_v32 = vld [vmem:[#allocation2 + $0xe5] sm:$0xff]  ;;  %v1223_v4 = vld [vmem:[#allocation2 + $0xed] sm:$0xff] }
  0x97   : > { %v1920_v14 = vadd.f32 %v1879_v1, %v1836_v36  ;;  %v1673_v28 = vmul.f32 %v5059_v20, %v4613_v27  ;;  %4298 = vmatprep.mubr.msk.bf16.mxu0 %vm4478_vm0, %v4967_v47  ;;  %v1507_v57 = vadd.f32 %v1466_v12, %v1384_v54  ;;  %v1674_v39 = vmul.f32 %v5105_v19, %v4613_v27  ;;  %v4457_v30 = vld [vmem:[%s7270_s2 + $0x10] sm:$0xff]  }
  0x98   : > { %v1508_v34 = vadd.f32 %v1467_v23, %v1385_v17  ;;  %v1796_v43 = vmul.f32 %v1755_v33, %v4625_v31  ;;  %v2042_v8 = vadd.f32 %v2001_v38, %v1919_v49  ;;  %v1797_v12 = vmul.f32 %v1756_v50, %v4625_v31  ;;  %4343 = vmatpush3.bf16.msra.mxu1 %v4456_v21  ;;  %v1305_v19 = vld [vmem:[#allocation2 + $0xee] sm:$0xff]  ;;  %v5205_v20 = vld [vmem:[#allocation2 + $0xf7] sm:$0xff] }
  0x99   : > { %v2043_v29 = vadd.f32 %v2002_v53, %v1920_v14  ;;  %v1757_v61 = vld [vmem:[#allocation2 + $0xf9] sm:$0xff]  ;;  %v1758_v26 = vld [vmem:[#allocation2 + $0x101] sm:$0xff]  ;;  %v5194_v55 = vunpack.c.h.bf16 %v5131_v44  ;;  %v1591_v33 = vadd.f32 %v1550_v16, %v1507_v57  ;;  %4344 = vmatprep.subr.bf16.mxu1 %v4967_v47  ;;  %v5210_v21 = vunpack.c.l.bf16 %v5187_v10 }
  0x9a   : > { %v1962_v1 = vld [vmem:[#allocation2 + $0xfa] sm:$0xff]  ;;  %v1592_v42 = vadd.f32 %v1551_v41, %v1508_v34  ;;  %v1880_v36 = vmul.f32 %v1757_v61, %v4635_v35  ;;  %v1881_v54 = vmul.f32 %v1758_v26, %v4635_v35  ;;  %v1963_v17 = vld [vmem:[#allocation2 + $0x102] sm:$0xff]  ;;  %v2165_v53 = vadd.f32 %v2124_v62, %v2042_v8 }
  0x9b   : > { %7351 = vst [vmem:[#allocation34_spill] sm:$0xff] %v5194_v55  ;;  %v2085_v23 = vld [vmem:[#allocation2 + $0xfb] sm:$0xff]  ;;  %v2086_v38 = vld [vmem:[#allocation2 + $0x103] sm:$0xff]  ;;  %v2166_v49 = vadd.f32 %v2125_v45, %v2043_v29  ;;  %v2003_v50 = vmul.f32 %v1962_v1, %v4651_v40  ;;  %v2004_v14 = vmul.f32 %v1963_v17, %v4651_v40  ;;  %1146 = vst [vmem:[#allocation2 + $0x110] sm:$0xff] %v5194_v55 }
  0x9c   : > { %v1304_v44 = vld [vmem:[#allocation2 + $0xe6] sm:$0xff]  ;;  %v1714_v16 = vadd.f32 %v1673_v28, %v1591_v33  ;;  %v1715_v41 = vadd.f32 %v1674_v39, %v1592_v42  ;;  %v2126_v57 = vmul.f32 %v2085_v23, %v4668_v46  ;;  %v2127_v34 = vmul.f32 %v2086_v38, %v4668_v46  ;;  %7352 = vst [vmem:[#allocation35_spill] sm:$0xff] %v5210_v21 }
  0x9d   : > { %v5207_v62 = vld [vmem:[#allocation2 + $0xff] sm:$0xff]  ;;  %v2194_v45 = vpack.c.bf16 %v2166_v49, %v2165_v53  ;;  %v1263_v8 = vmul.f32 %v1222_v32, %v4542_v6  ;;  %v1264_v29 = vmul.f32 %v1223_v4, %v4542_v6  ;;  %v1345_v28 = vmul.f32 %v1304_v44, %v4565_v13  ;;  %4345 = vmatpush3.bf16.msra.mxu1 %v4457_v30  ;;  %v4458_v33 = vld [vmem:[%s7270_s2 + $0x8] sm:$0xff]   ;;  %v1224_v53 = vld [vmem:[#allocation2 + $0xf5] sm:$0xff] }
  0x9e   : > { %v1837_v1 = vadd.f32 %v1796_v43, %v1714_v16  ;;  %v1838_v17 = vadd.f32 %v1797_v12, %v1715_v41  ;;  %v1346_v39 = vmul.f32 %v1305_v19, %v4565_v13  ;;  %1147 = vst [vmem:[#allocation2 + $0x118] sm:$0xff] %v5210_v21  ;;  %v1468_v32 = vmul.f32 %v5151_v58, %v4586_v22  ;;  %v5231_v38 = vld [vmem:[%s4555_s29 + $0x88] sm:$0xff]   ;;  %v1225_v16 = vld [vmem:[#allocation2 + $0xfd] sm:$0xff] }
  0x9f   : > { %4299 = vmatmul.mubr.bf16.gmra.mxu0 %v2194_v45  ;;  %v1469_v43 = vmul.f32 %v5167_v37, %v4586_v22  ;;  %v1552_v4 = vmul.f32 %v5205_v20, %v4599_v25  ;;  %v1553_v19 = vmul.f32 %v5207_v62, %v4599_v25  ;;  %v1386_v42 = vadd.f32 %v1345_v28, %v1263_v8  ;;  %v1306_v41 = vld [vmem:[#allocation2 + $0xf6] sm:$0xff] }
  0xa0   : > { %4302 = vmatprep.mubr.msk.bf16.mxu0 %vm4478_vm0, %v4967_v47  ;;  %v1921_v30 = vadd.f32 %v1880_v36, %v1837_v1  ;;  %v1922_v12 = vadd.f32 %v1881_v54, %v1838_v17  ;;  %v1387_v23 = vadd.f32 %v1346_v39, %v1264_v29  ;;  %v1675_v58 = vmul.f32 %v5108_v48, %v4613_v27  ;;  %v4459_v36 = vld [vmem:[%s7270_s2] sm:$0xff]  }
  0xa1   : > { %v1676_v37 = vmul.f32 %v5144_v2, %v4613_v27  ;;  %v1798_v49 = vmul.f32 %v1757_v61, %v4625_v31  ;;  %v1799_v44 = vmul.f32 %v1758_v26, %v4625_v31  ;;  %4346 = vmatprep.subr.bf16.mxu1 %v4967_v47  ;;  %v1509_v8 = vadd.f32 %v1468_v32, %v1386_v42  ;;  %v1307_v48 = vld [vmem:[#allocation2 + $0xfe] sm:$0xff] }
  0xa2   : > { %v2044_v54 = vadd.f32 %v2003_v50, %v1921_v30  ;;  %v2045_v45 = vadd.f32 %v2004_v14, %v1922_v12  ;;  %v1510_v29 = vadd.f32 %v1469_v43, %v1387_v23  ;;  %v1759_v1 = vld [vmem:[#allocation2 + $0x109] sm:$0xff]  ;;  %4347 = vmatpush3.bf16.msra.mxu1 %v4458_v33  ;;  %v5249_v2 = vunpack.c.h.bf16 %v5187_v10 }
  0xa3   : > { %v1964_v17 = vld [vmem:[#allocation2 + $0x10a] sm:$0xff]  ;;  %v1882_v61 = vmul.f32 %v1759_v1, %v4635_v35  ;;  %4348 = vmatprep.subr.bf16.mxu1 %v4967_v47  ;;  %v1593_v32 = vadd.f32 %v1552_v4, %v1509_v8  ;;  %v5253_v30 = vunpack.c.l.bf16 %v5231_v38  ;;  %v1265_v33 = vmul.f32 %v1224_v53, %v4542_v6 }
  0xa4   : > { %v2087_v28 = vld [vmem:[#allocation2 + $0x10b] sm:$0xff]  ;;  %v2005_v26 = vmul.f32 %v1964_v17, %v4651_v40  ;;  %7353 = vst [vmem:[#allocation36_spill] sm:$0xff] %v5249_v2  ;;  %v2167_v50 = vadd.f32 %v2126_v57, %v2044_v54  ;;  %v2168_v14 = vadd.f32 %v2127_v34, %v2045_v45  ;;  %v1594_v43 = vadd.f32 %v1553_v19, %v1510_v29 }
  0xa5   : > { %v5246_v39 = vmul.f32 %v2087_v28, %v4668_v46  ;;  %7354 = vst [vmem:[#allocation37_spill] sm:$0xff] %v5253_v30  ;;  %1148 = vst [vmem:[#allocation2 + $0x120] sm:$0xff] %v5249_v2  ;;  %v1266_v12 = vmul.f32 %v1225_v16, %v4542_v6  ;;  %v1347_v42 = vmul.f32 %v1306_v41, %v4565_v13  ;;  %v5259_v10 = vld [vmem:[#allocation2 + $0x107] sm:$0xff]  ;;  %v5261_v23 = vld [vmem:[#allocation2 + $0x10f] sm:$0xff] }
  0xa6   : > { %v2195_v17 = vpack.c.bf16 %v2168_v14, %v2167_v50  ;;  %v1716_v57 = vadd.f32 %v1675_v58, %v1593_v32  ;;  %v1717_v34 = vadd.f32 %v1676_v37, %v1594_v43  ;;  %v1760_v4 = vld [vmem:[#allocation2 + $0x111] sm:$0xff]  ;;  %v1348_v45 = vmul.f32 %v1307_v48, %v4565_v13  ;;  %4349 = vmatpush3.bf16.msra.mxu1 %v4459_v36 }
  0xa7   : > { %v1965_v19 = vld [vmem:[#allocation2 + $0x112] sm:$0xff]  ;;  %v1883_v53 = vmul.f32 %v1760_v4, %v4635_v35  ;;  %1149 = vst [vmem:[#allocation2 + $0x128] sm:$0xff] %v5253_v30  ;;  %v1388_v8 = vadd.f32 %v1347_v42, %v1265_v33  ;;  %v1470_v28 = vmul.f32 %v5205_v20, %v4586_v22  ;;  %v1471_v48 = vmul.f32 %v5207_v62, %v4586_v22 }
  0xa8   : > { %v2088_v54 = vld [vmem:[#allocation2 + $0x113] sm:$0xff]  ;;  %v2006_v16 = vmul.f32 %v1965_v19, %v4651_v40  ;;  %4303 = vmatmul.mubr.bf16.gmra.mxu0 %v2195_v17  ;;  %v1839_v29 = vadd.f32 %v1798_v49, %v1716_v57  ;;  %v1840_v58 = vadd.f32 %v1799_v44, %v1717_v34  ;;  %v1389_v37 = vadd.f32 %v1348_v45, %v1266_v12  ;;  %v1226_v17 = vld [vmem:[#allocation2 + $0x105] sm:$0xff] }
  0xa9   : > { %v2129_v41 = vmul.f32 %v2088_v54, %v4668_v46  ;;  %4306 = vmatprep.mubr.msk.bf16.mxu0 %vm4478_vm0, %v4967_v47  ;;  %v1554_v36 = vmul.f32 %v5259_v10, %v4599_v25  ;;  %v1555_v50 = vmul.f32 %v5261_v23, %v4599_v25  ;;  %v1677_v49 = vmul.f32 %v5147_v5, %v4613_v27  ;;  %v5281_v44 = vld [vmem:[%s4555_s29 + $0x90] sm:$0xff]  }
  0xaa   : > { %v1923_v14 = vadd.f32 %v1882_v61, %v1839_v29  ;;  %v1924_v32 = vadd.f32 %v1883_v53, %v1840_v58  ;;  %v1511_v20 = vadd.f32 %v1470_v28, %v1388_v8  ;;  %v1678_v43 = vmul.f32 %v5194_v55, %v4613_v27  ;;  %v1308_v58 = vld [vmem:[#allocation2 + $0x106] sm:$0xff] }
  0xab   : > { %v1512_v33 = vadd.f32 %v1471_v48, %v1389_v37  ;;  %v1800_v62 = vmul.f32 %v1759_v1, %v4625_v31  ;;  %v1801_v12 = vmul.f32 %v1760_v4, %v4625_v31  ;;  %v5288_v42 = vunpack.c.h.bf16 %v5231_v38  ;;  %v1227_v38 = vld [vmem:[#allocation2 + $0x10d] sm:$0xff] }
  0xac   : > { %v2046_v57 = vadd.f32 %v2005_v26, %v1923_v14  ;;  %v2047_v34 = vadd.f32 %v2006_v16, %v1924_v32  ;;  %v1595_v19 = vadd.f32 %v1554_v36, %v1511_v20  ;;  %v1761_v54 = vld [vmem:[#allocation2 + $0x119] sm:$0xff]  ;;  %v5291_v53 = vunpack.c.l.bf16 %v5281_v44  ;;  %v1309_v26 = vld [vmem:[#allocation2 + $0x10e] sm:$0xff] }
  0xad   : > { %7355 = vst [vmem:[#allocation38_spill] sm:$0xff] %v5288_v42  ;;  %v1966_v45 = vld [vmem:[#allocation2 + $0x11a] sm:$0xff]  ;;  %v1596_v8 = vadd.f32 %v1555_v50, %v1512_v33  ;;  %v1884_v29 = vmul.f32 %v1761_v54, %v4635_v35  ;;  %1150 = vst [vmem:[#allocation2 + $0x130] sm:$0xff] %v5288_v42  ;;  %v1267_v50 = vmul.f32 %v1226_v17, %v4542_v6  ;;  %v5330_v63 = vunpack.c.h.bf16 %v5281_v44 }
  0xae   : > { %v2089_v61 = vld [vmem:[#allocation2 + $0x11b] sm:$0xff]  ;;  %7356 = vst [vmem:[#allocation39_spill] sm:$0xff] %v5291_v53  ;;  %v2007_v1 = vmul.f32 %v1966_v45, %v4651_v40  ;;  %v2169_v16 = vadd.f32 %v5246_v39, %v2046_v57  ;;  %v2170_v37 = vadd.f32 %v2129_v41, %v2047_v34  ;;  %v1718_v28 = vadd.f32 %v1677_v49, %v1595_v19  ;;  %v2090_v14 = vld [vmem:[#allocation2 + $0x123] sm:$0xff] }
  0xaf   : > { %v2130_v4 = vmul.f32 %v2089_v61, %v4668_v46  ;;  %v1762_v48 = vld [vmem:[#allocation2 + $0x121] sm:$0xff]  ;;  %1151 = vst [vmem:[#allocation2 + $0x138] sm:$0xff] %v5291_v53  ;;  %v1719_v32 = vadd.f32 %v1678_v43, %v1596_v8  ;;  %v2131_v45 = vmul.f32 %v2090_v14, %v4668_v46  ;;  %v1433_v61 = vld [vmem:[#allocation2 + $0x117] sm:$0xff]  ;;  %v1268_v41 = vmul.f32 %v1227_v38, %v4542_v6 }
  0xb0   : > { %v1967_v36 = vld [vmem:[#allocation2 + $0x122] sm:$0xff]  ;;  %v1885_v20 = vmul.f32 %v1762_v48, %v4635_v35  ;;  %v2196_v5 = vpack.c.bf16 %v2170_v37, %v2169_v16  ;;  %v1841_v39 = vadd.f32 %v1800_v62, %v1718_v28  ;;  %v1349_v49 = vmul.f32 %v1308_v58, %v4565_v13  ;;  %7357 = vst [vmem:[#allocation40_spill] sm:$0xff] %v5330_v63 }
  0xb1   : > { %v2008_v33 = vmul.f32 %v1967_v36, %v4651_v40  ;;  %v1434_v55 = vld [vmem:[#allocation2 + $0x11f] sm:$0xff]  ;;  %v1842_v57 = vadd.f32 %v1801_v12, %v1719_v32  ;;  %v1350_v34 = vmul.f32 %v1309_v26, %v4565_v13  ;;  %v1472_v43 = vmul.f32 %v5259_v10, %v4586_v22  ;;  %1152 = vst [vmem:[#allocation2 + $0x140] sm:$0xff] %v5330_v63 }
  0xb2   : > { %v1473_v17 = vmul.f32 %v5261_v23, %v4586_v22  ;;  %4307 = vmatmul.mubr.bf16.gmra.mxu0 %v2196_v5  ;;  %v1925_v19 = vadd.f32 %v1884_v29, %v1841_v39  ;;  %v1390_v8 = vadd.f32 %v1349_v49, %v1267_v50  ;;  %v1556_v16 = vmul.f32 %v1433_v61, %v4599_v25  ;;  %v5319_v26 = vld [vmem:[%s4555_s29 + $0x98] sm:$0xff]  }
  0xb3   : > { %v1557_v62 = vmul.f32 %v1434_v55, %v4599_v25  ;;  %4310 = vmatprep.mubr.msk.bf16.mxu0 %vm4478_vm0, %v4967_v47  ;;  %v1926_v38 = vadd.f32 %v1885_v20, %v1842_v57  ;;  %v1391_v12 = vadd.f32 %v1350_v34, %v1268_v41  ;;  %v1679_v58 = vmul.f32 %v5210_v21, %v4613_v27  ;;  %v1228_v5 = vld [vmem:[#allocation2 + $0x115] sm:$0xff] }
  0xb4   : > { %v1680_v10 = vmul.f32 %v5249_v2, %v4613_v27  ;;  %v2048_v23 = vadd.f32 %v2007_v1, %v1925_v19  ;;  %v1513_v29 = vadd.f32 %v1472_v43, %v1390_v8  ;;  %v1763_v37 = vld [vmem:[#allocation2 + $0x129] sm:$0xff]  ;;  %v1802_v28 = vmul.f32 %v1761_v54, %v4625_v31  ;;  %v1229_v54 = vld [vmem:[#allocation2 + $0x11d] sm:$0xff] }
  0xb5   : > { %v1803_v36 = vmul.f32 %v1762_v48, %v4625_v31  ;;  %v1968_v14 = vld [vmem:[#allocation2 + $0x12a] sm:$0xff]  ;;  %v2049_v32 = vadd.f32 %v2008_v33, %v1926_v38  ;;  %v1514_v20 = vadd.f32 %v1473_v17, %v1391_v12  ;;  %v1886_v41 = vmul.f32 %v1763_v37, %v4635_v35  ;;  %v1310_v19 = vld [vmem:[#allocation2 + $0x116] sm:$0xff]  ;;  %v1311_v38 = vld [vmem:[#allocation2 + $0x11e] sm:$0xff] }
  0xb6   : > { %v2091_v50 = vld [vmem:[#allocation2 + $0x12b] sm:$0xff]  ;;  %v2009_v57 = vmul.f32 %v1968_v14, %v4651_v40  ;;  %v2092_v34 = vld [vmem:[#allocation2 + $0x133] sm:$0xff]  ;;  %v2171_v2 = vadd.f32 %v2130_v4, %v2048_v23  ;;  %v1597_v21 = vadd.f32 %v1556_v16, %v1513_v29  ;;  %v5333_v4 = vunpack.c.l.bf16 %v5319_v26 }
  0xb7   : > { %v1764_v39 = vld [vmem:[#allocation2 + $0x131] sm:$0xff]  ;;  %v2172_v48 = vadd.f32 %v2131_v45, %v2049_v32  ;;  %v1598_v8 = vadd.f32 %v1557_v62, %v1514_v20  ;;  %v2132_v33 = vmul.f32 %v2091_v50, %v4668_v46  ;;  %v2133_v17 = vmul.f32 %v2092_v34, %v4668_v46  ;;  %v1435_v23 = vld [vmem:[#allocation2 + $0x127] sm:$0xff] }
  0xb8   : > { %v1969_v49 = vld [vmem:[#allocation2 + $0x132] sm:$0xff]  ;;  %v1887_v1 = vmul.f32 %v1764_v39, %v4635_v35  ;;  %v1720_v12 = vadd.f32 %v1679_v58, %v1597_v21  ;;  %7358 = vst [vmem:[#allocation41_spill] sm:$0xff] %v5333_v4  ;;  %v1269_v16 = vmul.f32 %v1228_v5, %v4542_v6  ;;  %v1270_v62 = vmul.f32 %v1229_v54, %v4542_v6 }
  0xb9   : > { %v2010_v43 = vmul.f32 %v1969_v49, %v4651_v40  ;;  %v1436_v29 = vld [vmem:[#allocation2 + $0x12f] sm:$0xff]  ;;  %v2197_v14 = vpack.c.bf16 %v2172_v48, %v2171_v2  ;;  %v1721_v45 = vadd.f32 %v1680_v10, %v1598_v8  ;;  %v1351_v50 = vmul.f32 %v1310_v19, %v4565_v13  ;;  %1153 = vst [vmem:[#allocation2 + $0x148] sm:$0xff] %v5333_v4  ;;  %v1073_v49 = vld [vmem:[%s4555_s29 + $0xa0] sm:$0xf] }
  0xba   : > { %v1843_v32 = vadd.f32 %v1802_v28, %v1720_v12  ;;  %v1352_v21 = vmul.f32 %v1311_v38, %v4565_v13  ;;  %v1474_v44 = vmul.f32 %v1433_v61, %v4586_v22  ;;  %v1475_v58 = vmul.f32 %v1434_v55, %v4586_v22  ;;  %v1230_v55 = vld [vmem:[#allocation2 + $0x125] sm:$0xff]  ;;  %v1231_v19 = vld [vmem:[#allocation2 + $0x12d] sm:$0xff] }
  0xbb   : > { %4311 = vmatmul.mubr.bf16.gmra.mxu0 %v2197_v14  ;;  %v1844_v5 = vadd.f32 %v1803_v36, %v1721_v45  ;;  %v1392_v20 = vadd.f32 %v1351_v50, %v1269_v16  ;;  %v1558_v2 = vmul.f32 %v1435_v23, %v4599_v25  ;;  %v1559_v10 = vmul.f32 %v1436_v29, %v4599_v25  ;;  %v1312_v12 = vld [vmem:[#allocation2 + $0x126] sm:$0xff]  ;;  %v1313_v16 = vld [vmem:[#allocation2 + $0x12e] sm:$0xff] }
  0xbc   : > { %4314 = vmatprep.mubr.msk.bf16.mxu0 %vm4478_vm0, %v4967_v47  ;;  %v1927_v28 = vadd.f32 %v1886_v41, %v1843_v32  ;;  %v1393_v34 = vadd.f32 %v1352_v21, %v1270_v62  ;;  %v1681_v54 = vmul.f32 %v5253_v30, %v4613_v27  ;;  %v1682_v61 = vmul.f32 %v5288_v42, %v4613_v27 }
  0xbd   : > { %v1928_v36 = vadd.f32 %v1887_v1, %v1844_v5  ;;  %v1515_v48 = vadd.f32 %v1474_v44, %v1392_v20  ;;  %v1804_v8 = vmul.f32 %v1763_v37, %v4625_v31  ;;  %v1805_v38 = vmul.f32 %v1764_v39, %v4625_v31  ;;  %v1970_v20 = vld [vmem:[#allocation2 + $0x13a] sm:$0xff] }
  0xbe   : > { %v2050_v14 = vadd.f32 %v2009_v57, %v1927_v28  ;;  %v1516_v47 = vadd.f32 %v1475_v58, %v1393_v34  ;;  %v5355_v41 = vunpack.c.h.bf16 %v5319_v26  ;;  %v5357_v45 = vunpack.c.l.bf16 %v1073_v49  ;;  %v5365_v26 = vld [vmem:[#allocation2 + $0x137] sm:$0xff] }
  0xbf   : > { %v2051_v62 = vadd.f32 %v2010_v43, %v1928_v36  ;;  %v1599_v50 = vadd.f32 %v1558_v2, %v1515_v48  ;;  %v1271_v32 = vmul.f32 %v1230_v55, %v4542_v6  ;;  %v1272_v1 = vmul.f32 %v1231_v19, %v4542_v6  ;;  %v1765_v43 = vld [vmem:[#allocation2 + $0x139] sm:$0xff] }
  0xc0   : > { %7359 = vst [vmem:[#allocation42_spill] sm:$0xff] %v5355_v41  ;;  %7360 = vst [vmem:[#allocation43_spill] sm:$0xff] %v5357_v45  ;;  %v2173_v21 = vadd.f32 %v2132_v33, %v2050_v14  ;;  %v1600_v44 = vadd.f32 %v1559_v10, %v1516_v47  ;;  %v1353_v37 = vmul.f32 %v1312_v12, %v4565_v13  ;;  %v1766_v5 = vld [vmem:[#allocation2 + $0x141] sm:$0xff]  ;;  %v1232_v47 = vld [vmem:[#allocation2 + $0x135] sm:$0xff] }
  0xc1   : > { %1154 = vst [vmem:[#allocation2 + $0x150] sm:$0xff] %v5355_v41  ;;  %1155 = vst [vmem:[#allocation2 + $0x158] sm:$0xff] %v5357_v45  ;;  %v1354_v39 = vmul.f32 %v1313_v16, %v4565_v13  ;;  %v2174_v57 = vadd.f32 %v2133_v17, %v2051_v62  ;;  %v1722_v58 = vadd.f32 %v1681_v54, %v1599_v50  ;;  %v1971_v34 = vld [vmem:[#allocation2 + $0x142] sm:$0xff] }
  0xc2   : > { %v1476_v2 = vmul.f32 %v1435_v23, %v4586_v22  ;;  %v1477_v33 = vmul.f32 %v1436_v29, %v4586_v22  ;;  %v1723_v10 = vadd.f32 %v1682_v61, %v1600_v44  ;;  %v1888_v49 = vmul.f32 %v1765_v43, %v4635_v35  ;;  %v2093_v19 = vld [vmem:[#allocation2 + $0x13b] sm:$0xff]  ;;  %v2094_v36 = vld [vmem:[#allocation2 + $0x143] sm:$0xff] }
  0xc3   : > { %v1889_v28 = vmul.f32 %v1766_v5, %v4635_v35  ;;  %v2011_v55 = vmul.f32 %v1970_v20, %v4651_v40  ;;  %v2198_v48 = vpack.c.bf16 %v2174_v57, %v2173_v21  ;;  %v1845_v17 = vadd.f32 %v1804_v8, %v1722_v58  ;;  %v1438_v16 = vld [vmem:[#allocation2 + $0x13f] sm:$0xff] }
  0xc4   : > { %v2012_v54 = vmul.f32 %v1971_v34, %v4651_v40  ;;  %v2134_v12 = vmul.f32 %v2093_v19, %v4668_v46  ;;  %v1846_v23 = vadd.f32 %v1805_v38, %v1723_v10  ;;  %v2135_v29 = vmul.f32 %v2094_v36, %v4668_v46  ;;  %v5380_v21 = vld [vmem:[#allocation2] sm:$0xff] }
  0xc5   : > { %v1394_v61 = vadd.f32 %v1353_v37, %v1271_v32  ;;  %v1395_v14 = vadd.f32 %v1354_v39, %v1272_v1  ;;  %4315 = vmatmul.mubr.bf16.gmra.mxu0 %v2198_v48  ;;  %v1929_v62 = vadd.f32 %v1888_v49, %v1845_v17  ;;  %v1560_v50 = vmul.f32 %v5365_v26, %v4599_v25  ;;  %v1233_v37 = vld [vmem:[#allocation2 + $0x13d] sm:$0xff] }
  0xc6   : > { %v1561_v44 = vmul.f32 %v1438_v16, %v4599_v25  ;;  %v1683_v8 = vmul.f32 %v5291_v53, %v4613_v27  ;;  %4318 = vmatprep.mubr.msk.bf16.mxu0 %vm4478_vm0, %v5380_v21  ;;  %v1930_v38 = vadd.f32 %v1889_v28, %v1846_v23  ;;  %v1684_v1 = vmul.f32 %v5330_v63, %v4613_v27  ;;  %v1314_v39 = vld [vmem:[#allocation2 + $0x136] sm:$0xff]  ;;  %v1315_v58 = vld [vmem:[#allocation2 + $0x13e] sm:$0xff] }
  0xc7   : > { %v1517_v57 = vadd.f32 %v1476_v2, %v1394_v61  ;;  %v1518_v32 = vadd.f32 %v1477_v33, %v1395_v14  ;;  %v2052_v20 = vadd.f32 %v2011_v55, %v1929_v62  ;;  %v1806_v34 = vmul.f32 %v1765_v43, %v4625_v31 }
  0xc8   : > { %v1767_v10 = vld [vmem:[#allocation2 + $0x149] sm:$0xff]  ;;  %v1768_v49 = vld [vmem:[#allocation2 + $0x151] sm:$0xff]  ;;  %v1807_v19 = vmul.f32 %v1766_v5, %v4625_v31  ;;  %v1273_v48 = vmul.f32 %v1232_v47, %v4542_v6  ;;  %v2053_v17 = vadd.f32 %v2012_v54, %v1930_v38  ;;  %v1355_v38 = vmul.f32 %v1314_v39, %v4565_v13 }
  0xc9   : > { %v1972_v36 = vld [vmem:[#allocation2 + $0x14a] sm:$0xff]  ;;  %v1601_v28 = vadd.f32 %v1560_v50, %v1517_v57  ;;  %v1602_v2 = vadd.f32 %v1561_v44, %v1518_v32  ;;  %v1890_v33 = vmul.f32 %v1767_v10, %v4635_v35  ;;  %v1973_v23 = vld [vmem:[#allocation2 + $0x152] sm:$0xff]  ;;  %v2175_v63 = vadd.f32 %v2134_v12, %v2052_v20 }
  0xca   : > { %v2095_v61 = vld [vmem:[#allocation2 + $0x14b] sm:$0xff]  ;;  %v2096_v14 = vld [vmem:[#allocation2 + $0x153] sm:$0xff]  ;;  %v1891_v55 = vmul.f32 %v1768_v49, %v4635_v35  ;;  %v2013_v62 = vmul.f32 %v1972_v36, %v4651_v40  ;;  %v2014_v43 = vmul.f32 %v1973_v23, %v4651_v40  ;;  %v2176_v53 = vadd.f32 %v2135_v29, %v2053_v17 }
  0xcb   : > { %v1724_v5 = vadd.f32 %v1683_v8, %v1601_v28  ;;  %v1725_v42 = vadd.f32 %v1684_v1, %v1602_v2  ;;  %v2136_v47 = vmul.f32 %v2095_v61, %v4668_v46  ;;  %v1439_v54 = vld [vmem:[#allocation2 + $0x147] sm:$0xff]  ;;  %v2137_v50 = vmul.f32 %v2096_v14, %v4668_v46  ;;  %v1522_v57 = vld [vmem:[#allocation2 + $0x14f] sm:$0xff]  ;;  %v1769_v2 = vld [vmem:[#allocation2 + $0x159] sm:$0xff] }
  0xcc   : > { %v1274_v44 = vmul.f32 %v1233_v37, %v4542_v6  ;;  %v1356_v12 = vmul.f32 %v1315_v58, %v4565_v13  ;;  %v2199_v32 = vpack.c.bf16 %v2176_v53, %v2175_v63  ;;  %v1478_v29 = vmul.f32 %v5365_v26, %v4586_v22  ;;  %v1852_v53 = vld [vmem:[#allocation2 + $0x161] sm:$0xff] }
  0xcd   : > { %v1847_v20 = vadd.f32 %v1806_v34, %v1724_v5  ;;  %v1848_v36 = vadd.f32 %v1807_v19, %v1725_v42  ;;  %v1396_v8 = vadd.f32 %v1355_v38, %v1273_v48  ;;  %v1479_v17 = vmul.f32 %v1438_v16, %v4586_v22  ;;  %v1974_v42 = vld [vmem:[#allocation2 + $0x15a] sm:$0xff]  ;;  %v1975_v19 = vld [vmem:[#allocation2 + $0x162] sm:$0xff] }
  0xce   : > { %v1397_v1 = vadd.f32 %v1356_v12, %v1274_v44  ;;  %v1562_v28 = vmul.f32 %v1439_v54, %v4599_v25  ;;  %4319 = vmatmul.mubr.bf16.gmra.mxu0 %v2199_v32  ;;  %v1563_v39 = vmul.f32 %v1522_v57, %v4599_v25  ;;  %v1685_v63 = vmul.f32 %v5333_v4, %v4613_v27  ;;  %v2097_v48 = vld [vmem:[#allocation2 + $0x15b] sm:$0xff]  ;;  %v2098_v5 = vld [vmem:[#allocation2 + $0x163] sm:$0xff] }
  0xcf   : > { %v1931_v37 = vadd.f32 %v1890_v33, %v1847_v20  ;;  %v1932_v23 = vadd.f32 %v1891_v55, %v1848_v36  ;;  %4322 = vmatprep.mubr.msk.bf16.mxu0 %vm4478_vm0, %v5380_v21  ;;  %v1519_v26 = vadd.f32 %v1478_v29, %v1396_v8  ;;  %v1686_v16 = vmul.f32 %v5355_v41, %v4613_v27  ;;  %v1234_v44 = vld [vmem:[#allocation2 + $0x145] sm:$0xff]  ;;  %v1523_v36 = vld [vmem:[#allocation2 + $0x157] sm:$0xff] }
  0xd0   : > { %v1520_v58 = vadd.f32 %v1479_v17, %v1397_v1  ;;  %v1808_v34 = vmul.f32 %v1767_v10, %v4625_v31  ;;  %v1809_v14 = vmul.f32 %v1768_v49, %v4625_v31  ;;  %v1892_v55 = vmul.f32 %v1769_v2, %v4635_v35  ;;  %v1316_v20 = vld [vmem:[#allocation2 + $0x146] sm:$0xff] }
  0xd1   : > { %v2054_v33 = vadd.f32 %v2013_v62, %v1931_v37  ;;  %v2055_v61 = vadd.f32 %v2014_v43, %v1932_v23  ;;  %v1603_v38 = vadd.f32 %v1562_v28, %v1519_v26  ;;  %v1893_v57 = vmul.f32 %v1852_v53, %v4635_v35  ;;  %v1853_v28 = vld [vmem:[#allocation2 + $0x169] sm:$0xff] }
  0xd2   : > { %v1604_v12 = vadd.f32 %v1563_v39, %v1520_v58  ;;  %v2015_v32 = vmul.f32 %v1974_v42, %v4651_v40  ;;  %v2016_v8 = vmul.f32 %v1975_v19, %v4651_v40  ;;  %v2138_v62 = vmul.f32 %v2097_v48, %v4668_v46  ;;  %v1976_v37 = vld [vmem:[#allocation2 + $0x16a] sm:$0xff] }
  0xd3   : > { %v2177_v29 = vadd.f32 %v2136_v47, %v2054_v33  ;;  %v2178_v10 = vadd.f32 %v2137_v50, %v2055_v61  ;;  %v1726_v43 = vadd.f32 %v1685_v63, %v1603_v38  ;;  %v2139_v1 = vmul.f32 %v2098_v5, %v4668_v46  ;;  %v2099_v23 = vld [vmem:[#allocation2 + $0x16b] sm:$0xff] }
  0xd4   : > { %v1727_v49 = vadd.f32 %v1686_v16, %v1604_v12  ;;  %v1275_v17 = vmul.f32 %v1234_v44, %v4542_v6  ;;  %v1357_v53 = vmul.f32 %v1316_v20, %v4565_v13  ;;  %v1480_v42 = vmul.f32 %v1439_v54, %v4586_v22  ;;  %v2594_v50 = vld [vmem:[#allocation2 + $0x5] sm:$0xff]  ;;  %v2595_v19 = vld [vmem:[#allocation2 + $0xd] sm:$0xff] }
  0xd5   : > { %v2200_v39 = vpack.c.bf16 %v2178_v10, %v2177_v29  ;;  %v1564_v47 = vmul.f32 %v1523_v36, %v4599_v25  ;;  %v1849_v26 = vadd.f32 %v1808_v34, %v1726_v43  ;;  %v1687_v63 = vmul.f32 %v4613_v27, %v5357_v45  ;;  %v2676_v48 = vld [vmem:[#allocation2 + $0x6] sm:$0xff]  ;;  %v2677_v33 = vld [vmem:[#allocation2 + $0xe] sm:$0xff] }
  0xd6   : > { %v1850_v58 = vadd.f32 %v1809_v14, %v1727_v49  ;;  %v1810_v16 = vmul.f32 %v1769_v2, %v4625_v31  ;;  %v1398_v61 = vadd.f32 %v1357_v53, %v1275_v17  ;;  %v1894_v5 = vmul.f32 %v1853_v28, %v4635_v35 }
  0xd7   : > { %4323 = vmatmul.mubr.bf16.gmra.mxu0 %v2200_v39  ;;  %v2017_v44 = vmul.f32 %v1976_v37, %v4651_v40  ;;  %v2140_v54 = vmul.f32 %v2099_v23, %v4668_v46  ;;  %v1933_v34 = vadd.f32 %v1892_v55, %v1849_v26  ;;  %v7361_v38 = vlaneseq }
  0xd8   : > { %4326 = vmatprep.mubr.msk.bf16.mxu0 %vm4478_vm0, %v5380_v21  ;;  %v1934_v14 = vadd.f32 %v1893_v57, %v1850_v58  ;;  %v5433_v2 = vmul.f32 %v2594_v50, %v4542_v6  ;;  %v1521_v20 = vadd.f32 %v1480_v42, %v1398_v61  ;;  %v5436_v36 = vmul.f32 %v2595_v19, %v4542_v6 }
  0xd9   : > { %v5430_v12 = vshrl.u32 %v7361_v38, 7  ;;  %v5439_v29 = vmul.f32 %v2676_v48, %v4565_v13  ;;  %v5442_v10 = vmul.f32 %v2677_v33, %v4565_v13  ;;  %v2056_v43 = vadd.f32 %v2015_v32, %v1933_v34 }
  0xda   : > { %v2057_v49 = vadd.f32 %v2016_v8, %v1934_v14  ;;  %v1605_v17 = vadd.f32 %v1564_v47, %v1521_v20 }
  0xdb   : > { %v244_v55 = vcvt.s32.f32 %v5430_v12  ;;  %v204_v57 = vadd.s32 8, %v5430_v12  ;;  %v205_v28 = vadd.s32 16, %v5430_v12  ;;  %v206_v37 = vadd.s32 24, %v5430_v12 }
  0xdc   : > { %v207_v23 = vadd.s32 32, %v5430_v12  ;;  %v2179_v39 = vadd.f32 %v2138_v62, %v2056_v43  ;;  %v2180_v53 = vadd.f32 %v2139_v1, %v2057_v49  ;;  %v1728_v26 = vadd.f32 %v1687_v63, %v1605_v17 }
  0xdd   : > { %v285_v42 = vadd.f32 0.5, %v244_v55  ;;  %v245_v50 = vcvt.s32.f32 %v204_v57  ;;  %v246_v58 = vcvt.s32.f32 %v205_v28  ;;  %v247_v19 = vcvt.s32.f32 %v206_v37 }
  0xde   : > { %v248_v32 = vcvt.s32.f32 %v207_v23  ;;  %v2201_v8 = vpack.c.bf16 %v2180_v53, %v2179_v39  ;;  %v208_v61 = vadd.s32 40, %v5430_v12  ;;  %v1851_v47 = vadd.f32 %v1810_v16, %v1728_v26 }
  0xdf   : > { %v327_v48 = vmul.f32 0.0030487804, %v285_v42  ;;  %v286_v33 = vadd.f32 0.5, %v245_v50  ;;  %v287_v34 = vadd.f32 0.5, %v246_v58  ;;  %v288_v14 = vadd.f32 0.5, %v247_v19 }
  0xe0   : > { %v289_v38 = vadd.f32 0.5, %v248_v32  ;;  %4327 = vmatmul.mubr.bf16.gmra.mxu0 %v2201_v8  ;;  %v249_v62 = vcvt.s32.f32 %v208_v61  ;;  %v5451_v1 = vadd.s32 48, %v5430_v12  ;;  %v1935_v63 = vadd.f32 %v1894_v5, %v1851_v47 }
  0xe1   : > { %v368_v20 = vfloor.f32 %v327_v48  ;;  %v328_v45 = vmul.f32 0.0030487804, %v286_v33  ;;  %4330 = vmatprep.mubr.msk.bf16.mxu0 %vm4478_vm0, %v5380_v21  ;;  %v329_v43 = vmul.f32 0.0030487804, %v287_v34  ;;  %v330_v49 = vmul.f32 0.0030487804, %v288_v14 }
  0xe2   : > { %v331_v57 = vmul.f32 0.0030487804, %v289_v38  ;;  %v290_v16 = vadd.f32 0.5, %v249_v62  ;;  %v250_v37 = vcvt.s32.f32 %v5451_v1  ;;  %v2058_v23 = vadd.f32 %v2017_v44, %v1935_v63 }
  0xe3   : > { %v409_v17 = vmul.f32 328.0, %v368_v20  ;;  %v369_v28 = vfloor.f32 %v328_v45  ;;  %v370_v39 = vfloor.f32 %v329_v43  ;;  %v371_v53 = vfloor.f32 %v330_v49 }
  0xe4   : > { %v372_v42 = vfloor.f32 %v331_v57  ;;  %v332_v48 = vmul.f32 0.0030487804, %v290_v16  ;;  %v291_v33 = vadd.f32 0.5, %v250_v37  ;;  %v2181_v61 = vadd.f32 %v2140_v54, %v2058_v23 }
  0xe5   : > { %v450_v26 = vsub.f32 %v244_v55, %v409_v17  ;;  %v410_v8 = vmul.f32 328.0, %v369_v28  ;;  %v411_v5 = vmul.f32 328.0, %v370_v39  ;;  %v412_v47 = vmul.f32 328.0, %v371_v53 }
  0xe6   : > { %v413_v34 = vmul.f32 328.0, %v372_v42  ;;  %v373_v45 = vfloor.f32 %v332_v48  ;;  %v333_v20 = vmul.f32 0.0030487804, %v291_v33  ;;  %v2202_v41 = vpack.c.bf16 %v2181_v61, %v2181_v61 }
  0xe7   : > { %v491_v14 = vadd.f32 0.5, %v450_v26  ;;  %v451_v38 = vsub.f32 %v245_v50, %v410_v8  ;;  %v452_v4 = vsub.f32 %v246_v58, %v411_v5  ;;  %v453_v44 = vsub.f32 %v247_v19, %v412_v47 }
  0xe8   : > { %v454_v63 = vsub.f32 %v248_v32, %v413_v34  ;;  %v414_v55 = vmul.f32 328.0, %v373_v45  ;;  %v374_v57 = vfloor.f32 %v333_v20  ;;  %4331 = vmatmul.mubr.bf16.gmra.mxu0 %v2202_v41  ;;  %v5459_v54 = vadd.s32 56, %v5430_v12 }
  0xe9   : > { %v533_v43 = vmul.f32 0.055555556, %v491_v14  ;;  %v492_v49 = vadd.f32 0.5, %v451_v38  ;;  %v493_v17 = vadd.f32 0.5, %v452_v4  ;;  %v494_v28 = vadd.f32 0.5, %v453_v44 }
  0xea   : > { %v495_v16 = vadd.f32 0.5, %v454_v63  ;;  %v5461_v50 = vsub.f32 %v249_v62, %v414_v55  ;;  %v415_v53 = vmul.f32 328.0, %v374_v57  ;;  %v251_v32 = vcvt.s32.f32 %v5459_v54 }
  0xeb   : > { %v574_v23 = vfloor.f32 %v533_v43  ;;  %v534_v39 = vmul.f32 0.055555556, %v492_v49  ;;  %v535_v42 = vmul.f32 0.055555556, %v493_v17  ;;  %v536_v58 = vmul.f32 0.055555556, %v494_v28 }
  0xec   : > { %v537_v19 = vmul.f32 0.055555556, %v495_v16  ;;  %v496_v5 = vadd.f32 0.5, %v5461_v50  ;;  %v456_v16 = vsub.f32 %v250_v37, %v415_v53  ;;  %v5857_v18 = vadd.s32 120, %v5430_v12 }
  0xed   : > { %v615_v8 = vmul.f32 18.0, %v574_v23  ;;  %vm697_vm11 = vcmp.ge.f32.partialorder %v574_v23, 1.0  ;;  %vm738_vm12 = vcmp.le.f32.partialorder %v574_v23, 16.0  ;;  %v575_v41 = vfloor.f32 %v534_v39 }
  0xee   : > { %v576_v48 = vfloor.f32 %v535_v42  ;;  %v577_v33 = vfloor.f32 %v536_v58  ;;  %v5464_v61 = vfloor.f32 %v537_v19  ;;  %vm779_vm13 = vmand %vm697_vm11, %vm738_vm12  ;;  %v538_v28 = vmul.f32 0.055555556, %v496_v5 }
  0xef   : > { %v656_v47 = vsub.f32 %v450_v26, %v615_v8  ;;  %v616_v62 = vmul.f32 18.0, %v575_v41  ;;  %vm698_vm14 = vcmp.ge.f32.partialorder %v575_v41, 1.0  ;;  %vm739_vm15 = vcmp.le.f32.partialorder %v575_v41, 16.0 }
  0xf0   : > { %vm5467_vm1 = vmand %vm698_vm14, %vm739_vm15  ;;  %v617_v14 = vmul.f32 18.0, %v576_v48  ;;  %vm699_vm2 = vcmp.ge.f32.partialorder %v576_v48, 1.0  ;;  %vm740_vm3 = vcmp.le.f32.partialorder %v576_v48, 16.0  ;;  %v618_v45 = vmul.f32 18.0, %v577_v33  ;;  %v2305_v23 = vpop.f32.mrf.mxu0 }
  0xf1   : > { %vm820_vm4 = vcmp.ge.f32.partialorder %v656_v47, 1.0  ;;  %vm902_vm5 = vcmp.le.f32.partialorder %v656_v47, 16.0  ;;  %v657_v20 = vsub.f32 %v451_v38, %v616_v62  ;;  %vm5471_vm6 = vmand %vm699_vm2, %vm740_vm3  ;;  %vm700_vm7 = vcmp.ge.f32.partialorder %v577_v33, 1.0 }
  0xf2   : > { %vm861_vm8 = vmand %vm779_vm13, %vm820_vm4  ;;  %v658_v26 = vsub.f32 %v452_v4, %v617_v14  ;;  %v659_v49 = vsub.f32 %v453_v44, %v618_v45  ;;  %vm741_vm9 = vcmp.le.f32.partialorder %v577_v33, 16.0  ;;  %v619_v55 = vmul.f32 18.0, %v5464_v61  ;;  %v5488_v4 = vld [vmem:[%s7271_s3] ss:$0 sm:$0xff]  ;;  %v4252_v19 = vpop.f32.mrf.mxu0 }
  0xf3   : > { %vm5476_vm10 = vmand %vm861_vm8, %vm902_vm5  ;;  %vm821_vm11 = vcmp.ge.f32.partialorder %v657_v20, 1.0  ;;  %vm903_vm12 = vcmp.le.f32.partialorder %v657_v20, 16.0  ;;  %vm701_vm14 = vcmp.ge.f32.partialorder %v5464_v61, 1.0  ;;  %vm742_vm15 = vcmp.le.f32.partialorder %v5464_v61, 16.0 }
  0xf4   : > { %v984_v38 = vsel %vm5476_vm10, 1.0, %v5380_v21  ;;  %vm862_vm13 = vmand %vm5467_vm1, %vm821_vm11  ;;  %vm822_vm2 = vcmp.ge.f32.partialorder %v658_v26, 1.0  ;;  %vm904_vm3 = vcmp.le.f32.partialorder %v658_v26, 16.0  ;;  %vm823_vm4 = vcmp.ge.f32.partialorder %v659_v49, 1.0  ;;  %v2308_v34 = vpop.f32.mrf.mxu0 }
  0xf5   : > { %vm5492_vm5 = vmand %vm862_vm13, %vm903_vm12  ;;  %vm905_vm8 = vcmp.le.f32.partialorder %v659_v49, 16.0  ;;  %v660_v17 = vsub.f32 %v454_v63, %v619_v55  ;;  %v292_v42 = vadd.f32 0.5, %v251_v32  ;;  %v5506_v58 = vadd.s32 64, %v5430_v12 }
  0xf6   : > { %v985_v39 = vsel %vm5492_vm5, 1.0, %v5380_v21  ;;  %vm863_vm1 = vmand %vm5471_vm6, %vm822_vm2  ;;  %v5509_v63 = vadd.s32 72, %v5430_v12  ;;  %v2306_v1 = vadd.f32 %v5488_v4, %v2305_v23  ;;  %v579_v53 = vfloor.f32 %v538_v28  ;;  %v4253_v44 = vpop.f32.mrf.mxu0 }
  0xf7   : > { %vm5512_vm10 = vmand %vm863_vm1, %vm904_vm3  ;;  %vm824_vm11 = vcmp.ge.f32.partialorder %v660_v17, 1.0  ;;  %vm906_vm12 = vcmp.le.f32.partialorder %v660_v17, 16.0  ;;  %v497_v41 = vadd.f32 0.5, %v456_v16  ;;  %v334_v48 = vmul.f32 0.0030487804, %v292_v42 }
  0xf8   : > { %v986_v8 = vsel %vm5512_vm10, 1.0, %v5380_v21  ;;  %vm782_vm6 = vmand %vm700_vm7, %vm741_vm9  ;;  %v252_v5 = vcvt.s32.f32 %v5506_v58  ;;  %v2471_v47 = vmax.f32 %v2306_v1, 0.0  ;;  %v620_v62 = vmul.f32 18.0, %v579_v53 }
  0xf9   : > { %vm864_vm13 = vmand %vm782_vm6, %vm823_vm4  ;;  %vm702_vm2 = vcmp.ge.f32.partialorder %v579_v53, 1.0  ;;  %vm743_vm3 = vcmp.le.f32.partialorder %v579_v53, 16.0  ;;  %v539_v45 = vmul.f32 0.055555556, %v497_v41  ;;  %v375_v20 = vfloor.f32 %v334_v48  ;;  %v2313_v61 = vpop.f32.mrf.mxu0 }
  0xfa   : > { %vm5524_vm5 = vmand %vm864_vm13, %vm905_vm8  ;;  %v293_v33 = vadd.f32 0.5, %v252_v5  ;;  %v253_v43 = vcvt.s32.f32 %v5509_v63  ;;  %v5529_v26 = vmul.f32 %v2471_v47, %v984_v38  ;;  %v2309_v55 = vadd.f32 %v5488_v4, %v2308_v34 }
  0xfb   : > { %v987_v57 = vsel %vm5524_vm5, 1.0, %v5380_v21  ;;  %vm783_vm7 = vmand %vm701_vm14, %vm742_vm15  ;;  %v661_v49 = vsub.f32 %v5461_v50, %v620_v62  ;;  %v580_v28 = vfloor.f32 %v539_v45  ;;  %v416_v23 = vmul.f32 328.0, %v375_v20  ;;  %v4256_v62 = vpop.f32.mrf.mxu0 }
  0xfc   : > { %vm865_vm9 = vmand %vm783_vm7, %vm824_vm11  ;;  %v335_v38 = vmul.f32 0.0030487804, %v293_v33  ;;  %v294_v42 = vadd.f32 0.5, %v253_v43  ;;  %2553 = vst [vmem:[#allocation2 + $0x18] sm:$0xff] %v5529_v26  ;;  %v2472_v58 = vmax.f32 %v2309_v55, 0.0  ;;  %v5550_v50 = vadd.s32 80, %v5430_v12 }
  0xfd   : > { %vm5545_vm4 = vmand %vm865_vm9, %vm906_vm12  ;;  %vm825_vm14 = vcmp.ge.f32.partialorder %v661_v49, 1.0  ;;  %vm907_vm15 = vcmp.le.f32.partialorder %v661_v49, 16.0  ;;  %v621_v19 = vmul.f32 18.0, %v580_v28  ;;  %vm703_vm1 = vcmp.ge.f32.partialorder %v580_v28, 1.0  ;;  %v2799_v49 = vld [vmem:[#allocation2 + $0x7] sm:$0xff] }
  0xfe   : > { %v988_v37 = vsel %vm5545_vm4, 1.0, %v5380_v21  ;;  %vm784_vm8 = vmand %vm702_vm2, %vm743_vm3  ;;  %vm744_vm10 = vcmp.le.f32.partialorder %v580_v28, 16.0  ;;  %v5557_v17 = vmul.f32 %v2472_v58, %v985_v39  ;;  %v2314_v41 = vadd.f32 %v5488_v4, %v2313_v61  ;;  %v2800_v58 = vld [vmem:[#allocation2 + $0xf] sm:$0xff] }
  0xff   : > { %vm866_vm11 = vmand %vm784_vm8, %vm825_vm14  ;;  %v457_v48 = vsub.f32 %v251_v32, %v416_v23  ;;  %v376_v47 = vfloor.f32 %v335_v38  ;;  %v662_v45 = vsub.f32 %v456_v16, %v621_v19  ;;  %v336_v53 = vmul.f32 0.0030487804, %v294_v42  ;;  %v2316_v16 = vpop.f32.mrf.mxu0 }
 0x100   : > { %vm5562_vm12 = vmand %vm866_vm11, %vm907_vm15  ;;  %v254_v20 = vcvt.s32.f32 %v5550_v50  ;;  %v2758_v39 = vadd.f32 %v5439_v29, %v5433_v2  ;;  %2554 = vst [vmem:[#allocation2 + $0x20] sm:$0xff] %v5557_v17  ;;  %v2473_v33 = vmax.f32 %v2314_v41, 0.0  ;;  %v2317_v2 = vadd.f32 %v5488_v4, %v2316_v16 }
 0x101   : > { %v989_v54 = vsel %vm5562_vm12, 1.0, %v5380_v21  ;;  %vm785_vm6 = vmand %vm703_vm1, %vm744_vm10  ;;  %v498_v32 = vadd.f32 0.5, %v457_v48  ;;  %v417_v55 = vmul.f32 328.0, %v376_v47  ;;  %vm826_vm13 = vcmp.ge.f32.partialorder %v662_v45, 1.0  ;;  %v4257_v50 = vpop.f32.mrf.mxu0 }
 0x102   : > { %vm908_vm2 = vcmp.le.f32.partialorder %v662_v45, 16.0  ;;  %v377_v44 = vfloor.f32 %v336_v53  ;;  %v295_v23 = vadd.f32 0.5, %v254_v20  ;;  %v5575_v38 = vmul.f32 %v2473_v33, %v986_v8  ;;  %vm867_vm3 = vmand %vm785_vm6, %vm826_vm13 }
 0x103   : > { %v540_v29 = vmul.f32 0.055555556, %v498_v32  ;;  %v458_v42 = vsub.f32 %v252_v5, %v417_v55  ;;  %vm5578_vm7 = vmand %vm867_vm3, %vm908_vm2  ;;  %v2759_v41 = vadd.f32 %v5442_v10, %v5436_v36  ;;  %v2840_v47 = vmul.f32 %v2799_v49, %v4586_v22  ;;  %v2321_v53 = vpop.f32.mrf.mxu0  ;;  %v5591_v55 = vld [vmem:[#allocation2 + $0x17] sm:$0xff] }
 0x104   : > { %v418_v61 = vmul.f32 328.0, %v377_v44  ;;  %v337_v19 = vmul.f32 0.0030487804, %v295_v23  ;;  %2555 = vst [vmem:[#allocation2 + $0x28] sm:$0xff] %v5575_v38  ;;  %v2474_v8 = vmax.f32 %v2317_v2, 0.0  ;;  %v990_v5 = vsel %vm5578_vm7, 1.0, %v5380_v21 }
 0x105   : > { %v581_v62 = vfloor.f32 %v540_v29  ;;  %v499_v45 = vadd.f32 0.5, %v458_v42  ;;  %v2841_v36 = vmul.f32 %v2800_v58, %v4586_v22  ;;  %v2881_v10 = vadd.f32 %v2840_v47, %v2758_v39  ;;  %v4260_v23 = vpop.f32.mrf.mxu0 }
 0x106   : > { %v459_v33 = vsub.f32 %v253_v43, %v418_v61  ;;  %v378_v32 = vfloor.f32 %v337_v19  ;;  %v5598_v49 = vmul.f32 %v2474_v8, %v987_v57  ;;  %v2322_v16 = vadd.f32 %v5488_v4, %v2321_v53 }
 0x107   : > { %v622_v44 = vmul.f32 18.0, %v581_v62  ;;  %vm704_vm9 = vcmp.ge.f32.partialorder %v581_v62, 1.0  ;;  %vm745_vm14 = vcmp.le.f32.partialorder %v581_v62, 16.0  ;;  %v541_v63 = vmul.f32 0.055555556, %v499_v45  ;;  %v5601_v29 = vld [vmem:[#allocation2 + $0x1f] sm:$0xff]  ;;  %v2324_v50 = vpop.f32.mrf.mxu0 }
 0x108   : > { %v500_v43 = vadd.f32 0.5, %v459_v33  ;;  %v419_v2 = vmul.f32 328.0, %v378_v32  ;;  %2556 = vst [vmem:[#allocation2 + $0x30] sm:$0xff] %v5598_v49  ;;  %v2475_v39 = vmax.f32 %v2322_v16, 0.0  ;;  %vm786_vm15 = vmand %vm704_vm9, %vm745_vm14  ;;  %v2882_v14 = vadd.f32 %v2841_v36, %v2759_v41 }
 0x109   : > { %v663_v58 = vsub.f32 %v457_v48, %v622_v44  ;;  %v2924_v57 = vmul.f32 %v5591_v55, %v4599_v25  ;;  %v582_v61 = vfloor.f32 %v541_v63  ;;  %v2925_v8 = vmul.f32 %v5601_v29, %v4599_v25  ;;  %v4261_v41 = vpop.f32.mrf.mxu0 }
 0x10a   : > { %v542_v19 = vmul.f32 0.055555556, %v500_v43  ;;  %v5606_v47 = vsub.f32 %v254_v20, %v419_v2  ;;  %v5614_v62 = vmul.f32 %v2475_v39, %v988_v37  ;;  %v2325_v48 = vadd.f32 %v5488_v4, %v2324_v50  ;;  %v3129_v2 = vld [vmem:[#allocation2 + $0x19] sm:$0xff] }
 0x10b   : > { %vm827_vm5 = vcmp.ge.f32.partialorder %v663_v58, 1.0  ;;  %vm909_vm8 = vcmp.le.f32.partialorder %v663_v58, 16.0  ;;  %v623_v45 = vmul.f32 18.0, %v582_v61  ;;  %vm705_vm10 = vcmp.ge.f32.partialorder %v582_v61, 1.0  ;;  %v2329_v16 = vpop.f32.mrf.mxu0 }
 0x10c   : > { %vm868_vm1 = vmand %vm786_vm15, %vm827_vm5  ;;  %vm746_vm11 = vcmp.le.f32.partialorder %v582_v61, 16.0  ;;  %v583_v20 = vfloor.f32 %v542_v19  ;;  %2557 = vst [vmem:[#allocation2 + $0x38] sm:$0xff] %v5614_v62  ;;  %v2476_v53 = vmax.f32 %v2325_v48, 0.0  ;;  %v501_v1 = vadd.f32 0.5, %v5606_v47 }
 0x10d   : > { %vm5618_vm6 = vmand %vm868_vm1, %vm909_vm8  ;;  %v2965_v37 = vadd.f32 %v2924_v57, %v2881_v10  ;;  %v2966_v36 = vadd.f32 %v2925_v8, %v2882_v14  ;;  %v664_v23 = vsub.f32 %v458_v42, %v623_v45  ;;  %v2330_v10 = vadd.f32 %v5488_v4, %v2329_v16  ;;  %v3130_v14 = vld [vmem:[#allocation2 + $0x21] sm:$0xff]  ;;  %v4264_v57 = vpop.f32.mrf.mxu0 }
 0x10e   : > { %v991_v44 = vsel %vm5618_vm6, 1.0, %v5380_v21  ;;  %vm5626_vm4 = vmand %vm705_vm10, %vm746_vm11  ;;  %v624_v43 = vmul.f32 18.0, %v583_v20  ;;  %vm706_vm13 = vcmp.ge.f32.partialorder %v583_v20, 1.0  ;;  %v5634_v39 = vmul.f32 %v2476_v53, %v989_v54 }
 0x10f   : > { %vm747_vm2 = vcmp.le.f32.partialorder %v583_v20, 16.0  ;;  %v543_v58 = vmul.f32 0.055555556, %v501_v1  ;;  %vm828_vm3 = vcmp.ge.f32.partialorder %v664_v23, 1.0  ;;  %vm910_vm9 = vcmp.le.f32.partialorder %v664_v23, 16.0  ;;  %v5653_v41 = vld [vmem:[#allocation2 + $0x29] sm:$0xff] }
 0x110   : > { %v665_v42 = vsub.f32 %v459_v33, %v624_v43  ;;  %vm5637_vm14 = vmand %vm706_vm13, %vm747_vm2  ;;  %v3047_v34 = vmul.f32 %v5529_v26, %v4613_v27  ;;  %2558 = vst [vmem:[#allocation2 + $0x40] sm:$0xff] %v5634_v39  ;;  %v2477_v54 = vmax.f32 %v2330_v10, 0.0  ;;  %v3048_v19 = vmul.f32 %v5557_v17, %v4613_v27  ;;  %v2332_v33 = vpop.f32.mrf.mxu0  ;;  %v3336_v1 = vld [vmem:[#allocation2 + $0x2a] sm:$0xff] }
 0x111   : > { %vm869_vm12 = vmand %vm5626_vm4, %vm828_vm3  ;;  %v584_v61 = vfloor.f32 %v543_v58  ;;  %v3170_v8 = vmul.f32 %v3129_v2, %v4625_v31  ;;  %v3171_v45 = vmul.f32 %v3130_v14, %v4625_v31  ;;  %v2333_v17 = vadd.f32 %v5488_v4, %v2332_v33  ;;  %v3459_v14 = vld [vmem:[#allocation2 + $0x2b] sm:$0xff] }
 0x112   : > { %vm5649_vm15 = vmand %vm869_vm12, %vm910_vm9  ;;  %vm829_vm5 = vcmp.ge.f32.partialorder %v665_v42, 1.0  ;;  %vm911_vm8 = vcmp.le.f32.partialorder %v665_v42, 16.0  ;;  %v3088_v26 = vadd.f32 %v3047_v34, %v2965_v37  ;;  %v5660_v20 = vmul.f32 %v2477_v54, %v990_v5  ;;  %v4265_v37 = vpop.f32.mrf.mxu0  ;;  %v5716_v2 = vld [vmem:[#allocation2 + $0x27] sm:$0xff] }
 0x113   : > { %v992_v53 = vsel %vm5649_vm15, 1.0, %v5380_v21  ;;  %vm870_vm1 = vmand %vm5637_vm14, %vm829_vm5  ;;  %v625_v32 = vmul.f32 18.0, %v584_v61  ;;  %vm707_vm11 = vcmp.ge.f32.partialorder %v584_v61, 1.0  ;;  %vm748_vm7 = vcmp.le.f32.partialorder %v584_v61, 16.0  ;;  %v5672_v5 = vld [vmem:[#allocation2 + $0x31] sm:$0xff] }
 0x114   : > { %vm5668_vm10 = vmand %vm870_vm1, %vm911_vm8  ;;  %v3089_v28 = vadd.f32 %v3048_v19, %v2966_v36  ;;  %v3211_v23 = vadd.f32 %v3170_v8, %v3088_v26  ;;  %v3337_v63 = vld [vmem:[#allocation2 + $0x32] sm:$0xff]  ;;  %2559 = vst [vmem:[#allocation2 + $0x48] sm:$0xff] %v5660_v20  ;;  %v2478_v43 = vmax.f32 %v2333_v17, 0.0  ;;  %v3254_v36 = vmul.f32 %v5653_v41, %v4635_v35  ;;  %v2597_v8 = vld [vmem:[#allocation2 + $0x1d] sm:$0xff]  ;;  %v2337_v33 = vpop.f32.mrf.mxu0 }
 0x115   : > { %v666_v10 = vsub.f32 %v5606_v47, %v625_v32  ;;  %vm5679_vm6 = vmand %vm707_vm11, %vm748_vm7  ;;  %v3460_v57 = vld [vmem:[#allocation2 + $0x33] sm:$0xff]  ;;  %v3255_v50 = vmul.f32 %v5672_v5, %v4635_v35  ;;  %v3377_v34 = vmul.f32 %v3336_v1, %v4651_v40  ;;  %v3378_v54 = vmul.f32 %v3337_v63, %v4651_v40  ;;  %v2679_v63 = vld [vmem:[#allocation2 + $0x1e] sm:$0xff] }
 0x116   : > { %v3212_v42 = vadd.f32 %v3171_v45, %v3089_v28  ;;  %v2596_v61 = vld [vmem:[#allocation2 + $0x15] sm:$0xff]  ;;  %v5689_v19 = vmul.f32 %v2478_v43, %v991_v44  ;;  %v3295_v47 = vadd.f32 %v3254_v36, %v3211_v23  ;;  %v3500_v26 = vmul.f32 %v3459_v14, %v4668_v46  ;;  %v4268_v43 = vpop.f32.mrf.mxu0 }
 0x117   : > { %vm830_vm4 = vcmp.ge.f32.partialorder %v666_v10, 1.0  ;;  %vm912_vm13 = vcmp.le.f32.partialorder %v666_v10, 16.0  ;;  %v3501_v45 = vmul.f32 %v3460_v57, %v4668_v46  ;;  %v5696_v17 = vadd.s32 88, %v5430_v12  ;;  %v2678_v32 = vld [vmem:[#allocation2 + $0x16] sm:$0xff] }
 0x118   : > { %vm871_vm2 = vmand %vm5679_vm6, %vm830_vm4  ;;  %v3296_v48 = vadd.f32 %v3255_v50, %v3212_v42  ;;  %2560 = vst [vmem:[#allocation2 + $0x50] sm:$0xff] %v5689_v19  ;;  %v2338_v44 = vadd.f32 %v5488_v4, %v2337_v33  ;;  %v3418_v37 = vadd.f32 %v3377_v34, %v3295_v47  ;;  %v5705_v28 = vadd.s32 96, %v5430_v12  ;;  %v2340_v47 = vpop.f32.mrf.mxu0 }
 0x119   : > { %vm5700_vm3 = vmand %vm871_vm2, %vm912_vm13  ;;  %v2637_v23 = vmul.f32 %v2596_v61, %v4542_v6  ;;  %v255_v36 = vcvt.s32.f32 %v5696_v17  ;;  %v2638_v14 = vmul.f32 %v2597_v8, %v4542_v6  ;;  %v2719_v34 = vmul.f32 %v2678_v32, %v4565_v13 }
 0x11a   : > { %v994_v10 = vsel %vm5700_vm3, 1.0, %v5380_v21  ;;  %v3419_v58 = vadd.f32 %v3378_v54, %v3296_v48  ;;  %v2479_v57 = vmax.f32 %v2338_v44, 0.0  ;;  %v3541_v42 = vadd.f32 %v3500_v26, %v3418_v37  ;;  %v5723_v44 = vld [vmem:[#allocation2 + $0x2f] sm:$0xff]  ;;  %v4269_v1 = vpop.f32.mrf.mxu0 }
 0x11b   : > { %v256_v50 = vcvt.s32.f32 %v5705_v28  ;;  %v296_v61 = vadd.f32 0.5, %v255_v36  ;;  %v2720_v43 = vmul.f32 %v2679_v63, %v4565_v13  ;;  %v2842_v54 = vmul.f32 %v5591_v55, %v4586_v22 }
 0x11c   : > { %v3542_v33 = vadd.f32 %v3501_v45, %v3419_v58  ;;  %v5720_v48 = vmul.f32 %v2479_v57, %v992_v53  ;;  %v2341_v8 = vadd.f32 %v5488_v4, %v2340_v47  ;;  %v2760_v26 = vadd.f32 %v2719_v34, %v2637_v23  ;;  %v2345_v57 = vpop.f32.mrf.mxu0 }
 0x11d   : > { %v297_v17 = vadd.f32 0.5, %v256_v50  ;;  %v338_v37 = vmul.f32 0.0030487804, %v296_v61  ;;  %v2761_v45 = vadd.f32 %v2720_v43, %v2638_v14  ;;  %v2843_v28 = vmul.f32 %v5601_v29, %v4586_v22 }
 0x11e   : > { %v3582_v32 = vpack.c.bf16 %v3542_v33, %v3541_v42  ;;  %2561 = vst [vmem:[#allocation2 + $0x58] sm:$0xff] %v5720_v48  ;;  %v2480_v63 = vmax.f32 %v2341_v8, 0.0  ;;  %v2883_v55 = vadd.f32 %v2842_v54, %v2760_v26  ;;  %v2926_v53 = vmul.f32 %v5716_v2, %v4599_v25  ;;  %v5743_v54 = vld [vmem:[#allocation2 + $0x39] sm:$0xff]  ;;  %v5745_v8 = vld [vmem:[#allocation2 + $0x41] sm:$0xff] }
 0x11f   : > { %v339_v58 = vmul.f32 0.0030487804, %v297_v17  ;;  %v379_v23 = vfloor.f32 %v338_v37  ;;  %v2884_v34 = vadd.f32 %v2843_v28, %v2761_v45  ;;  %v2927_v42 = vmul.f32 %v5723_v44, %v4599_v25  ;;  %v4272_v17 = vpop.f32.mrf.mxu0  ;;  %v3338_v28 = vld [vmem:[#allocation2 + $0x3a] sm:$0xff] }
 0x120   : > { %4351 = vmatmul.mubr.bf16.vlgmr.msra.gmra.mxu1 %v3582_v32  ;;  %v3049_v14 = vmul.f32 %v5575_v38, %v4613_v27  ;;  %v7394_v29 = vsel %vm5668_vm10, 1.0, %v5380_v21  ;;  %v2346_v33 = vadd.f32 %v5488_v4, %v2345_v57  ;;  %v2967_v43 = vadd.f32 %v2926_v53, %v2883_v55  ;;  %v2598_v17 = vld [vmem:[#allocation2 + $0x25] sm:$0xff] }
 0x121   : > { %v5738_v47 = vmul.f32 %v2480_v63, %v7394_v29  ;;  %v380_v61 = vfloor.f32 %v339_v58  ;;  %4354 = vmatprep.mubr.msk.bf16.mxu1 %vm4478_vm0, %v5380_v21  ;;  %v420_v26 = vmul.f32 328.0, %v379_v23  ;;  %v2968_v38 = vadd.f32 %v2927_v42, %v2884_v34  ;;  %v3339_v63 = vld [vmem:[#allocation2 + $0x42] sm:$0xff]  ;;  %v2348_v55 = vpop.f32.mrf.mxu0 }
 0x122   : > { %v3050_v16 = vmul.f32 %v5598_v49, %v4613_v27  ;;  %v3172_v1 = vmul.f32 %v5653_v41, %v4625_v31  ;;  %v2481_v32 = vmax.f32 %v2346_v33, 0.0  ;;  %v3090_v45 = vadd.f32 %v3049_v14, %v2967_v43  ;;  %v3461_v41 = vld [vmem:[#allocation2 + $0x3b] sm:$0xff]  ;;  %v3462_v29 = vld [vmem:[#allocation2 + $0x43] sm:$0xff] }
 0x123   : > { %2562 = vst [vmem:[#allocation2 + $0x60] sm:$0xff] %v5738_v47  ;;  %v421_v37 = vmul.f32 328.0, %v380_v61  ;;  %v3173_v21 = vmul.f32 %v5672_v5, %v4625_v31  ;;  %v461_v58 = vsub.f32 %v255_v36, %v420_v26  ;;  %v3256_v57 = vmul.f32 %v5743_v54, %v4635_v35  ;;  %v4273_v33 = vpop.f32.mrf.mxu0 }
 0x124   : > { %v3091_v53 = vadd.f32 %v3050_v16, %v2968_v38  ;;  %v3257_v49 = vmul.f32 %v5745_v8, %v4635_v35  ;;  %v2522_v23 = vmul.f32 %v2481_v32, %v994_v10  ;;  %v5759_v34 = vadd.f32 %v5488_v4, %v2348_v55  ;;  %v2599_v32 = vld [vmem:[#allocation2 + $0x2d] sm:$0xff] }
 0x125   : > { %v462_v42 = vsub.f32 %v256_v50, %v421_v37  ;;  %v3213_v14 = vadd.f32 %v3172_v1, %v3090_v45  ;;  %v502_v5 = vadd.f32 0.5, %v461_v58  ;;  %v3379_v36 = vmul.f32 %v3338_v28, %v4651_v40 }
 0x126   : > { %v3214_v61 = vadd.f32 %v3173_v21, %v3091_v53  ;;  %v3380_v43 = vmul.f32 %v3339_v63, %v4651_v40  ;;  %2563 = vst [vmem:[#allocation2 + $0x68] sm:$0xff] %v2522_v23  ;;  %v2482_v26 = vmax.f32 %v5759_v34, 0.0  ;;  %v3502_v10 = vmul.f32 %v3461_v41, %v4668_v46  ;;  %v2353_v23 = vpop.f32.mrf.mxu0 }
 0x127   : > { %v503_v38 = vadd.f32 0.5, %v462_v42  ;;  %v3297_v16 = vadd.f32 %v3256_v57, %v3213_v14  ;;  %v544_v55 = vmul.f32 0.055555556, %v502_v5  ;;  %v3503_v1 = vmul.f32 %v3462_v29, %v4668_v46 }
 0x128   : > { %v3298_v50 = vadd.f32 %v3257_v49, %v3214_v61  ;;  %v5767_v37 = vadd.s32 104, %v5430_v12  ;;  %v5770_v28 = vadd.s32 112, %v5430_v12  ;;  %v2639_v63 = vmul.f32 %v2598_v17, %v4542_v6  ;;  %v2680_v17 = vld [vmem:[#allocation2 + $0x26] sm:$0xff] }
 0x129   : > { %v545_v45 = vmul.f32 0.055555556, %v503_v38  ;;  %v3420_v21 = vadd.f32 %v3379_v36, %v3297_v16  ;;  %v585_v53 = vfloor.f32 %v544_v55  ;;  %v2640_v14 = vmul.f32 %v2599_v32, %v4542_v6  ;;  %v4276_v38 = vpop.f32.mrf.mxu0  ;;  %v2681_v16 = vld [vmem:[#allocation2 + $0x2e] sm:$0xff] }
 0x12a   : > { %v3421_v57 = vadd.f32 %v3380_v43, %v3298_v50  ;;  %v257_v41 = vcvt.s32.f32 %v5767_v37  ;;  %v5776_v29 = vadd.f32 %v5488_v4, %v2353_v23  ;;  %v7303_v33 = vcvt.s32.f32 %v5770_v28 }
 0x12b   : > { %v586_v49 = vfloor.f32 %v545_v45  ;;  %v3543_v5 = vadd.f32 %v3502_v10, %v3420_v21  ;;  %v626_v61 = vmul.f32 18.0, %v585_v53  ;;  %vm708_vm9 = vcmp.ge.f32.partialorder %v585_v53, 1.0  ;;  %v2356_v21 = vpop.f32.mrf.mxu0 }
 0x12c   : > { %vm749_vm14 = vcmp.le.f32.partialorder %v585_v53, 16.0  ;;  %v3544_v36 = vadd.f32 %v3503_v1, %v3421_v57  ;;  %v2483_v43 = vmax.f32 %v5776_v29, 0.0  ;;  %v298_v45 = vadd.f32 0.5, %v257_v41  ;;  %v5793_v29 = vld [vmem:[#allocation2 + $0x37] sm:$0xff] }
 0x12d   : > { %v627_v55 = vmul.f32 18.0, %v586_v49  ;;  %vm709_vm12 = vcmp.ge.f32.partialorder %v586_v49, 1.0  ;;  %vm750_vm15 = vcmp.le.f32.partialorder %v586_v49, 16.0  ;;  %v667_v32 = vsub.f32 %v461_v58, %v626_v61  ;;  %vm5780_vm5 = vmand %vm708_vm9, %vm749_vm14  ;;  %v5795_v61 = vld [vmem:[#allocation2 + $0x3f] sm:$0xff] }
 0x12e   : > { %v3583_v10 = vpack.c.bf16 %v3544_v36, %v3543_v5  ;;  %v299_v1 = vadd.f32 0.5, %v7303_v33  ;;  %v5789_v23 = vadd.f32 %v5488_v4, %v2356_v21  ;;  %v2721_v57 = vmul.f32 %v2680_v17, %v4565_v13  ;;  %vm5799_vm10 = vmand %vm709_vm12, %vm750_vm15  ;;  %v4277_v36 = vpop.f32.mrf.mxu0  ;;  %v5832_v17 = vld [vmem:[#allocation2 + $0x49] sm:$0xff] }
 0x12f   : > { %v668_v53 = vsub.f32 %v462_v42, %v627_v55  ;;  %v2722_v58 = vmul.f32 %v2681_v16, %v4565_v13  ;;  %vm831_vm8 = vcmp.ge.f32.partialorder %v667_v32, 1.0  ;;  %vm913_vm1 = vcmp.le.f32.partialorder %v667_v32, 16.0  ;;  %v5806_v16 = vld [vmem:[#allocation2] sm:$0xff] }
 0x130   : > { %4355 = vmatmul.mubr.bf16.gmra.mxu1 %v3583_v10  ;;  %v340_v42 = vmul.f32 0.0030487804, %v298_v45  ;;  %v341_v38 = vmul.f32 0.0030487804, %v299_v1  ;;  %vm872_vm11 = vmand %vm5780_vm5, %vm831_vm8  ;;  %v2762_v49 = vadd.f32 %v2721_v57, %v2639_v63  ;;  %v2844_v45 = vmul.f32 %v5716_v2, %v4586_v22  ;;  %v2361_v21 = vpop.f32.mrf.mxu0 }
 0x131   : > { %vm832_vm7 = vcmp.ge.f32.partialorder %v668_v53, 1.0  ;;  %vm914_vm6 = vcmp.le.f32.partialorder %v668_v53, 16.0  ;;  %4358 = vmatprep.mubr.msk.bf16.mxu1 %vm4478_vm0, %v5806_v16  ;;  %vm954_vm4 = vmand %vm872_vm11, %vm913_vm1  ;;  %v2763_v10 = vadd.f32 %v2722_v58, %v2640_v14  ;;  %v2845_v1 = vmul.f32 %v5723_v44, %v4586_v22 }
 0x132   : > { %v381_v55 = vfloor.f32 %v340_v42  ;;  %v382_v32 = vfloor.f32 %v341_v38  ;;  %v995_v50 = vsel %vm954_vm4, 1.0, %v5806_v16  ;;  %vm873_vm13 = vmand %vm5799_vm10, %vm832_vm7  ;;  %v2928_v36 = vmul.f32 %v5793_v29, %v4599_v25  ;;  %v4280_v33 = vpop.f32.mrf.mxu0 }
 0x133   : > { %v2929_v63 = vmul.f32 %v5795_v61, %v4599_v25  ;;  %v5823_v14 = vmul.f32 %v2482_v26, %v995_v50  ;;  %vm955_vm2 = vmand %vm873_vm13, %vm914_vm6  ;;  %v5827_v58 = vadd.f32 %v5488_v4, %v2361_v21  ;;  %v2885_v44 = vadd.f32 %v2844_v45, %v2762_v49  ;;  %v5840_v50 = vld [vmem:[#allocation2 + $0x51] sm:$0xff] }
 0x134   : > { %v422_v2 = vmul.f32 328.0, %v381_v55  ;;  %v423_v57 = vmul.f32 328.0, %v382_v32  ;;  %v996_v5 = vsel %vm955_vm2, 1.0, %v5806_v16  ;;  %v2886_v42 = vadd.f32 %v2845_v1, %v2763_v10  ;;  %v3340_v49 = vld [vmem:[#allocation2 + $0x4a] sm:$0xff]  ;;  %v2364_v37 = vpop.f32.mrf.mxu0 }
 0x135   : > { %v3051_v38 = vmul.f32 %v5614_v62, %v4613_v27  ;;  %2564 = vst [vmem:[#allocation2 + $0x70] sm:$0xff] %v5823_v14  ;;  %v2524_v34 = vmul.f32 %v2483_v43, %v996_v5  ;;  %v7399_v53 = vcvt.s32.f32 %v5770_v28  ;;  %v2969_v10 = vadd.f32 %v2928_v36, %v2885_v44  ;;  %v3341_v43 = vld [vmem:[#allocation2 + $0x52] sm:$0xff] }
 0x136   : > { %v463_v26 = vsub.f32 %v257_v41, %v422_v2  ;;  %v2970_v45 = vadd.f32 %v2929_v63, %v2886_v42  ;;  %v3052_v62 = vmul.f32 %v5634_v39, %v4613_v27  ;;  %v3174_v33 = vmul.f32 %v5743_v54, %v4625_v31  ;;  %v3463_v21 = vld [vmem:[#allocation2 + $0x4b] sm:$0xff]  ;;  %v3464_v36 = vld [vmem:[#allocation2 + $0x53] sm:$0xff]  ;;  %v4281_v5 = vpop.f32.mrf.mxu0 }
 0x137   : > { %v464_v55 = vsub.f32 %v7399_v53, %v423_v57  ;;  %2565 = vst [vmem:[#allocation2 + $0x78] sm:$0xff] %v2524_v34  ;;  %v3175_v1 = vmul.f32 %v5745_v8, %v4625_v31  ;;  %v3258_v2 = vmul.f32 %v5832_v17, %v4635_v35  ;;  %v3092_v63 = vadd.f32 %v3051_v38, %v2969_v10 }
 0x138   : > { %v504_v41 = vadd.f32 0.5, %v463_v26  ;;  %v3093_v57 = vadd.f32 %v3052_v62, %v2970_v45  ;;  %v3259_v39 = vmul.f32 %v5840_v50, %v4635_v35  ;;  %v3381_v54 = vmul.f32 %v3340_v49, %v4651_v40  ;;  %v2369_v62 = vpop.f32.mrf.mxu0 }
 0x139   : > { %v505_v28 = vadd.f32 0.5, %v464_v55  ;;  %v3382_v34 = vmul.f32 %v3341_v43, %v4651_v40  ;;  %v3504_v53 = vmul.f32 %v3463_v21, %v4668_v46  ;;  %v3215_v32 = vadd.f32 %v3174_v33, %v3092_v63 }
 0x13a   : > { %v546_v44 = vmul.f32 0.055555556, %v504_v41  ;;  %v3216_v8 = vadd.f32 %v3175_v1, %v3093_v57  ;;  %v3505_v30 = vmul.f32 %v3464_v36, %v4668_v46  ;;  %v5860_v45 = vadd.f32 %v5488_v4, %v2364_v37  ;;  %v4284_v36 = vpop.f32.mrf.mxu0 }
 0x13b   : > { %v547_v42 = vmul.f32 0.055555556, %v505_v28  ;;  %v5863_v49 = vadd.s32 128, %v5430_v12  ;;  %v3299_v41 = vadd.f32 %v3258_v2, %v3215_v32  ;;  %v259_v21 = vcvt.s32.f32 %v5857_v18  ;;  %v5891_v36 = vld [vmem:[#allocation2 + $0x47] sm:$0xff] }
 0x13c   : > { %v587_v38 = vfloor.f32 %v546_v44  ;;  %v3300_v43 = vadd.f32 %v3259_v39, %v3216_v8  ;;  %v5867_v33 = vadd.f32 %v5488_v4, %v2369_v62  ;;  %v2600_v44 = vld [vmem:[#allocation2 + $0x35] sm:$0xff]  ;;  %v2846_v5 = vmul.f32 %v5793_v29, %v4586_v22  ;;  %v3466_v18 = vld [vmem:[#allocation2 + $0x63] sm:$0xff] }
 0x13d   : > { %v588_v10 = vfloor.f32 %v547_v42  ;;  %v3422_v37 = vadd.f32 %v3381_v54, %v3299_v41  ;;  %v300_v2 = vadd.f32 0.5, %v259_v21  ;;  %v5876_v42 = vpop.f32.mrf.mxu0  ;;  %v260_v62 = vcvt.s32.f32 %v5863_v49  ;;  %v2683_v41 = vld [vmem:[#allocation2 + $0x3e] sm:$0xff] }
 0x13e   : > { %v628_v28 = vmul.f32 18.0, %v587_v38  ;;  %vm710_vm3 = vcmp.ge.f32.partialorder %v587_v38, 1.0  ;;  %vm751_vm9 = vcmp.le.f32.partialorder %v587_v38, 16.0  ;;  %v3423_v63 = vadd.f32 %v3382_v34, %v3300_v43  ;;  %v2682_v34 = vld [vmem:[#allocation2 + $0x36] sm:$0xff] }
 0x13f   : > { %v629_v1 = vmul.f32 18.0, %v588_v10  ;;  %vm711_vm14 = vcmp.ge.f32.partialorder %v588_v10, 1.0  ;;  %vm752_vm12 = vcmp.le.f32.partialorder %v588_v10, 16.0  ;;  %vm5869_vm15 = vmand %vm710_vm3, %vm751_vm9  ;;  %v3545_v8 = vadd.f32 %v3504_v53, %v3422_v37  ;;  %v4285_v43 = vpop.f32.mrf.mxu0 }
 0x140   : > { %v669_v57 = vsub.f32 %v463_v26, %v628_v28  ;;  %v3546_v38 = vadd.f32 %v3505_v30, %v3423_v63  ;;  %v2601_v26 = vld [vmem:[#allocation2 + $0x3d] sm:$0xff]  ;;  %vm5882_vm1 = vmand %vm711_vm14, %vm752_vm12  ;;  %v342_v53 = vmul.f32 0.0030487804, %v300_v2  ;;  %v301_v28 = vadd.f32 0.5, %v260_v62 }
 0x141   : > { %v670_v32 = vsub.f32 %v464_v55, %v629_v1  ;;  %v2641_v1 = vmul.f32 %v2600_v44, %v4542_v6  ;;  %v2642_v10 = vmul.f32 %v2601_v26, %v4542_v6  ;;  %v2723_v37 = vmul.f32 %v2682_v34, %v4565_v13 }
 0x142   : > { %vm833_vm5 = vcmp.ge.f32.partialorder %v669_v57, 1.0  ;;  %vm915_vm8 = vcmp.le.f32.partialorder %v669_v57, 16.0  ;;  %v3584_v30 = vpack.c.bf16 %v3546_v38, %v3545_v8  ;;  %v2724_v63 = vmul.f32 %v2683_v41, %v4565_v13  ;;  %v5896_v57 = vld [vmem:[#allocation2 + $0x4f] sm:$0xff]  ;;  %v2377_v43 = vpop.f32.mrf.mxu0 }
 0x143   : > { %vm834_vm10 = vcmp.ge.f32.partialorder %v670_v32, 1.0  ;;  %vm916_vm11 = vcmp.le.f32.partialorder %v670_v32, 16.0  ;;  %vm874_vm7 = vmand %vm5869_vm15, %vm833_vm5  ;;  %v383_v44 = vfloor.f32 %v342_v53  ;;  %v343_v8 = vmul.f32 0.0030487804, %v301_v28 }
 0x144   : > { %vm956_vm6 = vmand %vm874_vm7, %vm915_vm8  ;;  %4359 = vmatmul.mubr.bf16.gmra.mxu1 %v3584_v30  ;;  %v2847_v38 = vmul.f32 %v5795_v61, %v4586_v22  ;;  %v7404_v26 = vmax.f32 %v5789_v23, 0.0  ;;  %v2764_v29 = vadd.f32 %v2723_v37, %v2641_v1  ;;  %v2765_v41 = vadd.f32 %v2724_v63, %v2642_v10  ;;  %v5918_v61 = vld [vmem:[#allocation2 + $0x59] sm:$0xff]  ;;  %v5925_v63 = vld [vmem:[#allocation2 + $0x61] sm:$0xff] }
 0x145   : > { %v997_v2 = vsel %vm956_vm6, 1.0, %v5806_v16  ;;  %vm875_vm4 = vmand %vm5882_vm1, %vm834_vm10  ;;  %4362 = vmatprep.mubr.msk.bf16.mxu1 %vm4478_vm0, %v5806_v16  ;;  %v2930_v55 = vmul.f32 %v5891_v36, %v4599_v25  ;;  %v424_v53 = vmul.f32 328.0, %v383_v44  ;;  %v384_v28 = vfloor.f32 %v343_v8  ;;  %v4288_v44 = vpop.f32.mrf.mxu0 }
 0x146   : > { %v5908_v34 = vmul.f32 %v7404_v26, %v997_v2  ;;  %vm957_vm13 = vmand %vm875_vm4, %vm916_vm11  ;;  %v2931_v23 = vmul.f32 %v5896_v57, %v4599_v25  ;;  %v7405_v32 = vmax.f32 %v5827_v58, 0.0  ;;  %v2887_v1 = vadd.f32 %v2846_v5, %v2764_v29  ;;  %v3342_v26 = vld [vmem:[#allocation2 + $0x5a] sm:$0xff] }
 0x147   : > { %v998_v30 = vsel %vm957_vm13, 1.0, %v5806_v16  ;;  %v2888_v10 = vadd.f32 %v2847_v38, %v2765_v41  ;;  %v3053_v37 = vmul.f32 %v5660_v20, %v4613_v27  ;;  %v465_v8 = vsub.f32 %v259_v21, %v424_v53  ;;  %v3465_v5 = vld [vmem:[#allocation2 + $0x5b] sm:$0xff]  ;;  %v5937_v21 = vpop.f32.mrf.mxu0 }
 0x148   : > { %2566 = vst [vmem:[#allocation2 + $0x80] sm:$0xff] %v5908_v34  ;;  %v2526_v2 = vmul.f32 %v7405_v32, %v998_v30  ;;  %v425_v54 = vmul.f32 328.0, %v384_v28  ;;  %v3054_v39 = vmul.f32 %v5689_v19, %v4613_v27  ;;  %v3176_v58 = vmul.f32 %v5832_v17, %v4625_v31  ;;  %v3343_v30 = vld [vmem:[#allocation2 + $0x62] sm:$0xff] }
 0x149   : > { %v2971_v38 = vadd.f32 %v2930_v55, %v2887_v1  ;;  %v2972_v29 = vadd.f32 %v2931_v23, %v2888_v10  ;;  %v3177_v20 = vmul.f32 %v5840_v50, %v4625_v31  ;;  %v3260_v41 = vmul.f32 %v5918_v61, %v4635_v35 }
 0x14a   : > { %2567 = vst [vmem:[#allocation2 + $0x88] sm:$0xff] %v2526_v2  ;;  %v506_v53 = vadd.f32 0.5, %v465_v8  ;;  %v466_v19 = vsub.f32 %v260_v62, %v425_v54  ;;  %v3261_v17 = vmul.f32 %v5925_v63, %v4635_v35  ;;  %v3383_v28 = vmul.f32 %v3342_v26, %v4651_v40  ;;  %v4289_v2 = vpop.f32.mrf.mxu0 }
 0x14b   : > { %v3094_v55 = vadd.f32 %v3053_v37, %v2971_v38  ;;  %v3095_v23 = vadd.f32 %v3054_v39, %v2972_v29  ;;  %v3384_v32 = vmul.f32 %v3343_v30, %v4651_v40  ;;  %v3506_v50 = vmul.f32 %v3465_v5, %v4668_v46  ;;  %v5963_v38 = vld [vmem:[%s7271_s3] ss:$0 sm:$0xff] }
 0x14c   : > { %v548_v1 = vmul.f32 0.055555556, %v506_v53  ;;  %v507_v10 = vadd.f32 0.5, %v466_v19  ;;  %v3507_v44 = vmul.f32 %v3466_v18, %v4668_v46  ;;  %v5948_v9 = vadd.s32 136, %v5430_v12  ;;  %v5957_v37 = vpop.f32.mrf.mxu0 }
 0x14d   : > { %v3217_v49 = vadd.f32 %v3176_v58, %v3094_v55  ;;  %v3218_v62 = vadd.f32 %v3177_v20, %v3095_v23  ;;  %v5952_v54 = vadd.f32 %v5488_v4, %v5876_v42  ;;  %v5955_v39 = vadd.s32 144, %v5430_v12 }
 0x14e   : > { %v589_v26 = vfloor.f32 %v548_v1  ;;  %v549_v30 = vmul.f32 0.055555556, %v507_v10  ;;  %v261_v5 = vcvt.s32.f32 %v5948_v9  ;;  %v5966_v58 = vadd.f32 %v5963_v38, %v2377_v43  ;;  %v4292_v18 = vpop.f32.mrf.mxu0  ;;  %v5986_v43 = vld [vmem:[#allocation2 + $0x5f] sm:$0xff] }
 0x14f   : > { %v3301_v29 = vadd.f32 %v3260_v41, %v3217_v49  ;;  %v3302_v4 = vadd.f32 %v3261_v17, %v3218_v62  ;;  %v2488_v42 = vmax.f32 %v5952_v54, 0.0  ;;  %v262_v20 = vcvt.s32.f32 %v5955_v39  ;;  %v2602_v17 = vld [vmem:[#allocation2 + $0x45] sm:$0xff] }
 0x150   : > { %v630_v53 = vmul.f32 18.0, %v589_v26  ;;  %vm712_vm2 = vcmp.ge.f32.partialorder %v589_v26, 1.0  ;;  %vm753_vm3 = vcmp.le.f32.partialorder %v589_v26, 16.0  ;;  %v590_v55 = vfloor.f32 %v549_v30  ;;  %v5970_v10 = vpop.f32.mrf.mxu0  ;;  %v2603_v30 = vld [vmem:[#allocation2 + $0x4d] sm:$0xff] }
 0x151   : > { %v3424_v9 = vadd.f32 %v3383_v28, %v3301_v29  ;;  %v3425_v23 = vadd.f32 %v3384_v32, %v3302_v4  ;;  %v302_v2 = vadd.f32 0.5, %v261_v5  ;;  %v303_v1 = vadd.f32 0.5, %v262_v20  ;;  %vm5972_vm9 = vmand %vm712_vm2, %vm753_vm3  ;;  %v2684_v28 = vld [vmem:[#allocation2 + $0x46] sm:$0xff]  ;;  %v2685_v4 = vld [vmem:[#allocation2 + $0x4e] sm:$0xff] }
 0x152   : > { %v671_v11 = vsub.f32 %v465_v8, %v630_v53  ;;  %v631_v41 = vmul.f32 18.0, %v590_v55  ;;  %vm713_vm14 = vcmp.ge.f32.partialorder %v590_v55, 1.0  ;;  %vm754_vm12 = vcmp.le.f32.partialorder %v590_v55, 16.0  ;;  %v4293_v32 = vpop.f32.mrf.mxu0 }
 0x153   : > { %v3547_v49 = vadd.f32 %v3506_v50, %v3424_v9  ;;  %v3548_v62 = vadd.f32 %v3507_v44, %v3425_v23  ;;  %v344_v39 = vmul.f32 0.0030487804, %v302_v2  ;;  %v345_v26 = vmul.f32 0.0030487804, %v303_v1  ;;  %vm795_vm8 = vmand %vm713_vm14, %vm754_vm12  ;;  %v5984_v1 = vld [vmem:[#allocation2 + $0x57] sm:$0xff] }
 0x154   : > { %vm835_vm15 = vcmp.ge.f32.partialorder %v671_v11, 1.0  ;;  %vm917_vm5 = vcmp.le.f32.partialorder %v671_v11, 16.0  ;;  %v672_v29 = vsub.f32 %v466_v19, %v631_v41  ;;  %v2643_v50 = vmul.f32 %v2602_v17, %v4542_v6 }
 0x155   : > { %vm876_vm1 = vmand %vm5972_vm9, %vm835_vm15  ;;  %v3585_v18 = vpack.c.bf16 %v3548_v62, %v3547_v49  ;;  %v385_v53 = vfloor.f32 %v344_v39  ;;  %v386_v55 = vfloor.f32 %v345_v26  ;;  %v2644_v44 = vmul.f32 %v2603_v30, %v4542_v6 }
 0x156   : > { %vm958_vm10 = vmand %vm876_vm1, %vm917_vm5  ;;  %vm836_vm11 = vcmp.ge.f32.partialorder %v672_v29, 1.0  ;;  %vm918_vm7 = vcmp.le.f32.partialorder %v672_v29, 16.0  ;;  %v2725_v11 = vmul.f32 %v2684_v28, %v4565_v13  ;;  %v2726_v2 = vmul.f32 %v2685_v4, %v4565_v13  ;;  %v5998_v26 = vpop.f32.mrf.mxu0 }
 0x157   : > { %v999_v19 = vsel %vm958_vm10, 1.0, %v5806_v16  ;;  %vm877_vm6 = vmand %vm795_vm8, %vm836_vm11  ;;  %4363 = vmatmul.mubr.bf16.gmra.mxu1 %v3585_v18  ;;  %v426_v9 = vmul.f32 328.0, %v385_v53  ;;  %v427_v23 = vmul.f32 328.0, %v386_v55  ;;  %v7408_v41 = vmax.f32 %v5860_v45, 0.0 }
 0x158   : > { %vm959_vm4 = vmand %vm877_vm6, %vm918_vm7  ;;  %4366 = vmatprep.mubr.msk.bf16.mxu1 %vm4478_vm0, %v5806_v16  ;;  %v2766_v49 = vadd.f32 %v2725_v11, %v2643_v50  ;;  %v2848_v62 = vmul.f32 %v5891_v36, %v4586_v22  ;;  %v2849_v39 = vmul.f32 %v5896_v57, %v4586_v22  ;;  %v2767_v45 = vadd.f32 %v2726_v2, %v2644_v44  ;;  %v6008_v57 = vld [vmem:[#allocation2 + $0x69] sm:$0xff]  ;;  %v4296_v55 = vpop.f32.mrf.mxu0  ;;  %v6012_v44 = vld [vmem:[#allocation2 + $0x71] sm:$0xff] }
 0x159   : > { %v5990_v17 = vmul.f32 %v7408_v41, %v999_v19  ;;  %v1000_v30 = vsel %vm959_vm4, 1.0, %v5806_v16  ;;  %v467_v28 = vsub.f32 %v261_v5, %v426_v9  ;;  %v468_v32 = vsub.f32 %v262_v20, %v427_v23  ;;  %v3345_v19 = vld [vmem:[#allocation2 + $0x72] sm:$0xff] }
 0x15a   : > { %v7409_v29 = vmax.f32 %v5867_v33, 0.0  ;;  %v2889_v18 = vadd.f32 %v2848_v62, %v2766_v49  ;;  %v2932_v53 = vmul.f32 %v5984_v1, %v4599_v25  ;;  %v2933_v36 = vmul.f32 %v5986_v43, %v4599_v25  ;;  %v3344_v33 = vld [vmem:[#allocation2 + $0x6a] sm:$0xff]  ;;  %v6020_v62 = vpop.f32.mrf.mxu0 }
 0x15b   : > { %2568 = vst [vmem:[#allocation2 + $0x90] sm:$0xff] %v5990_v17  ;;  %v508_v50 = vadd.f32 0.5, %v467_v28  ;;  %v509_v11 = vadd.f32 0.5, %v468_v32  ;;  %v2890_v5 = vadd.f32 %v2849_v39, %v2767_v45  ;;  %v3055_v20 = vmul.f32 %v5720_v48, %v4613_v27  ;;  %v3467_v49 = vld [vmem:[#allocation2 + $0x6b] sm:$0xff] }
 0x15c   : > { %v2528_v4 = vmul.f32 %v7409_v29, %v1000_v30  ;;  %v2973_v9 = vadd.f32 %v2932_v53, %v2889_v18  ;;  %v3056_v23 = vmul.f32 %v5738_v47, %v4613_v27  ;;  %v3178_v2 = vmul.f32 %v5918_v61, %v4625_v31  ;;  %v3468_v29 = vld [vmem:[#allocation2 + $0x73] sm:$0xff]  ;;  %v4297_v53 = vpop.f32.mrf.mxu0 }
 0x15d   : > { %v3179_v41 = vmul.f32 %v5925_v63, %v4625_v31  ;;  %v550_v39 = vmul.f32 0.055555556, %v508_v50  ;;  %v551_v48 = vmul.f32 0.055555556, %v509_v11  ;;  %v2974_v30 = vadd.f32 %v2933_v36, %v2890_v5 }
 0x15e   : > { %2569 = vst [vmem:[#allocation2 + $0x98] sm:$0xff] %v2528_v4  ;;  %v3262_v45 = vmul.f32 %v6008_v57, %v4635_v35  ;;  %v3096_v4 = vadd.f32 %v3055_v20, %v2973_v9  ;;  %v3263_v47 = vmul.f32 %v6012_v44, %v4635_v35  ;;  %v3385_v18 = vmul.f32 %v3344_v33, %v4651_v40 }
 0x15f   : > { %v3386_v61 = vmul.f32 %v3345_v19, %v4651_v40  ;;  %v591_v63 = vfloor.f32 %v550_v39  ;;  %v592_v55 = vfloor.f32 %v551_v48  ;;  %v3097_v8 = vadd.f32 %v3056_v23, %v2974_v30  ;;  %v6037_v9 = vpop.f32.mrf.mxu0 }
 0x160   : > { %v3508_v50 = vmul.f32 %v3467_v49, %v4668_v46  ;;  %v3219_v11 = vadd.f32 %v3178_v2, %v3096_v4  ;;  %v3509_v36 = vmul.f32 %v3468_v29, %v4668_v46  ;;  %v6031_v5 = vadd.s32 152, %v5430_v12 }
 0x161   : > { %v6035_v20 = vadd.f32 %v5963_v38, %v5937_v21  ;;  %v632_v33 = vmul.f32 18.0, %v591_v63  ;;  %vm714_vm13 = vcmp.ge.f32.partialorder %v591_v63, 1.0  ;;  %vm755_vm2 = vcmp.le.f32.partialorder %v591_v63, 16.0  ;;  %v4300_v2 = vpop.f32.mrf.mxu0 }
 0x162   : > { %v633_v19 = vmul.f32 18.0, %v592_v55  ;;  %vm715_vm3 = vcmp.ge.f32.partialorder %v592_v55, 1.0  ;;  %vm756_vm9 = vcmp.le.f32.partialorder %v592_v55, 16.0  ;;  %v3220_v23 = vadd.f32 %v3179_v41, %v3097_v8  ;;  %vm6039_vm14 = vmand %vm714_vm13, %vm755_vm2  ;;  %v2604_v41 = vld [vmem:[#allocation2 + $0x55] sm:$0xff] }
 0x163   : > { %v3303_v49 = vadd.f32 %v3262_v45, %v3219_v11  ;;  %v673_v39 = vsub.f32 %v467_v28, %v632_v33  ;;  %v263_v21 = vcvt.s32.f32 %v6031_v5  ;;  %v6046_v63 = vadd.s32 160, %v5430_v12  ;;  %v2605_v28 = vld [vmem:[#allocation2 + $0x5d] sm:$0xff]  ;;  %v6052_v11 = vpop.f32.mrf.mxu0  ;;  %vm6056_vm5 = vmand %vm715_vm3, %vm756_vm9 }
 0x164   : > { %v674_v30 = vsub.f32 %v468_v32, %v633_v19  ;;  %v3304_v4 = vadd.f32 %v3263_v47, %v3220_v23  ;;  %v6050_v8 = vadd.f32 %v5963_v38, %v5957_v37  ;;  %v2686_v45 = vld [vmem:[#allocation2 + $0x56] sm:$0xff]  ;;  %v2687_v19 = vld [vmem:[#allocation2 + $0x5e] sm:$0xff]  ;;  %v2646_v2 = vmul.f32 %v2605_v28, %v4542_v6  ;;  %v6079_v28 = vld [vmem:[#allocation2 + $0x67] sm:$0xff] }
 0x165   : > { %v3426_v53 = vadd.f32 %v3385_v18, %v3303_v49  ;;  %vm837_vm12 = vcmp.ge.f32.partialorder %v673_v39, 1.0  ;;  %vm919_vm15 = vcmp.le.f32.partialorder %v673_v39, 16.0  ;;  %v304_v18 = vadd.f32 0.5, %v263_v21  ;;  %v4301_v23 = vpop.f32.mrf.mxu0 }
 0x166   : > { %vm838_vm8 = vcmp.ge.f32.partialorder %v674_v30, 1.0  ;;  %vm920_vm1 = vcmp.le.f32.partialorder %v674_v30, 16.0  ;;  %vm878_vm10 = vmand %vm6039_vm14, %vm837_vm12  ;;  %v3427_v37 = vadd.f32 %v3386_v61, %v3304_v4  ;;  %v264_v33 = vcvt.s32.f32 %v6046_v63 }
 0x167   : > { %v3549_v47 = vadd.f32 %v3508_v50, %v3426_v53  ;;  %vm960_vm11 = vmand %vm878_vm10, %vm919_vm15  ;;  %v2645_v49 = vmul.f32 %v2604_v41, %v4542_v6  ;;  %v2727_v39 = vmul.f32 %v2686_v45, %v4565_v13  ;;  %v346_v50 = vmul.f32 0.0030487804, %v304_v18  ;;  %v6081_v45 = vld [vmem:[#allocation2 + $0x6f] sm:$0xff] }
 0x168   : > { %v1001_v48 = vsel %vm960_vm11, 1.0, %v5806_v16  ;;  %vm879_vm7 = vmand %vm6056_vm5, %vm838_vm8  ;;  %v3550_v61 = vadd.f32 %v3509_v36, %v3427_v37  ;;  %v305_v4 = vadd.f32 0.5, %v264_v33  ;;  %v2728_v63 = vmul.f32 %v2687_v19, %v4565_v13  ;;  %v6085_v23 = vpop.f32.mrf.mxu0  ;;  %v3016_v18 = vld [vmem:[#allocation2 + $0x68] sm:$0xff] }
 0x169   : > { %v6075_v53 = vmul.f32 %v2488_v42, %v1001_v48  ;;  %vm961_vm6 = vmand %vm879_vm7, %vm920_vm1  ;;  %v2768_v41 = vadd.f32 %v2727_v39, %v2645_v49  ;;  %v2850_v32 = vmul.f32 %v5984_v1, %v4586_v22  ;;  %v387_v54 = vfloor.f32 %v346_v50  ;;  %v6097_v50 = vld [vmem:[#allocation2 + $0x79] sm:$0xff] }
 0x16a   : > { %v1002_v36 = vsel %vm961_vm6, 1.0, %v5806_v16  ;;  %v3586_v37 = vpack.c.bf16 %v3550_v61, %v3549_v47  ;;  %v347_v42 = vmul.f32 0.0030487804, %v305_v4  ;;  %v7414_v30 = vmax.f32 %v5966_v58, 0.0  ;;  %v4304_v55 = vpop.f32.mrf.mxu0  ;;  %v6099_v4 = vld [vmem:[#allocation2 + $0x81] sm:$0xff] }
 0x16b   : > { %2570 = vst [vmem:[#allocation2 + $0xa0] sm:$0xff] %v6075_v53  ;;  %v2769_v49 = vadd.f32 %v2728_v63, %v2646_v2  ;;  %v2851_v39 = vmul.f32 %v5986_v43, %v4586_v22  ;;  %v2891_v48 = vadd.f32 %v2850_v32, %v2768_v41  ;;  %v428_v1 = vmul.f32 328.0, %v387_v54  ;;  %v3346_v58 = vld [vmem:[#allocation2 + $0x7a] sm:$0xff]  ;;  %v3347_v41 = vld [vmem:[#allocation2 + $0x82] sm:$0xff] }
 0x16c   : > { %v2530_v19 = vmul.f32 %v7414_v30, %v1002_v36  ;;  %4367 = vmatmul.mubr.bf16.gmra.mxu1 %v3586_v37  ;;  %v388_v29 = vfloor.f32 %v347_v42  ;;  %v2934_v47 = vmul.f32 %v6079_v28, %v4599_v25  ;;  %v2935_v61 = vmul.f32 %v6081_v45, %v4599_v25  ;;  %v6108_v32 = vpop.f32.mrf.mxu0  ;;  %v3469_v30 = vld [vmem:[#allocation2 + $0x7b] sm:$0xff] }
 0x16d   : > { %4370 = vmatprep.mubr.msk.bf16.mxu1 %vm4478_vm0, %v5806_v16  ;;  %v2892_v43 = vadd.f32 %v2851_v39, %v2769_v49  ;;  %v3057_v55 = vmul.f32 %v3016_v18, %v4613_v27  ;;  %v3058_v2 = vmul.f32 %v5823_v14, %v4613_v27  ;;  %v3180_v63 = vmul.f32 %v6008_v57, %v4625_v31 }
 0x16e   : > { %2571 = vst [vmem:[#allocation2 + $0xa8] sm:$0xff] %v2530_v19  ;;  %v469_v36 = vsub.f32 %v263_v21, %v428_v1  ;;  %v429_v37 = vmul.f32 328.0, %v388_v29  ;;  %v2975_v54 = vadd.f32 %v2934_v47, %v2891_v48  ;;  %v3181_v42 = vmul.f32 %v6012_v44, %v4625_v31  ;;  %v3470_v19 = vld [vmem:[#allocation2 + $0x83] sm:$0xff]  ;;  %v4305_v39 = vpop.f32.mrf.mxu0 }
 0x16f   : > { %v2976_v18 = vadd.f32 %v2935_v61, %v2892_v43  ;;  %v3264_v14 = vmul.f32 %v6097_v50, %v4635_v35  ;;  %v3265_v57 = vmul.f32 %v6099_v4, %v4635_v35  ;;  %v3387_v49 = vmul.f32 %v3346_v58, %v4651_v40 }
 0x170   : > { %v510_v0 = vadd.f32 0.5, %v469_v36  ;;  %v470_v5 = vsub.f32 %v264_v33, %v429_v37  ;;  %v3098_v21 = vadd.f32 %v3057_v55, %v2975_v54  ;;  %v3388_v29 = vmul.f32 %v3347_v41, %v4651_v40 }
 0x171   : > { %v3099_v48 = vadd.f32 %v3058_v2, %v2976_v18  ;;  %v3510_v44 = vmul.f32 %v3469_v30, %v4668_v46  ;;  %v3511_v1 = vmul.f32 %v3470_v19, %v4668_v46  ;;  %v6123_v47 = vadd.s32 168, %v5430_v12 }
 0x172   : > { %v552_v61 = vmul.f32 0.055555556, %v510_v0  ;;  %v511_v43 = vadd.f32 0.5, %v470_v5  ;;  %v3221_v7 = vadd.f32 %v3180_v63, %v3098_v21  ;;  %v6127_v58 = vadd.f32 %v5963_v38, %v5970_v10  ;;  %v6137_v41 = vpop.f32.mrf.mxu0 }
 0x173   : > { %v3222_v39 = vadd.f32 %v3181_v42, %v3099_v48  ;;  %v265_v33 = vcvt.s32.f32 %v6123_v47  ;;  %v6131_v55 = vadd.s32 176, %v5430_v12  ;;  %v6135_v2 = vadd.f32 %v5963_v38, %v5998_v26 }
 0x174   : > { %v593_v37 = vfloor.f32 %v552_v61  ;;  %v553_v0 = vmul.f32 0.055555556, %v511_v43  ;;  %v3305_v54 = vadd.f32 %v3264_v14, %v3221_v7  ;;  %v2492_v63 = vmax.f32 %v6127_v58, 0.0  ;;  %v4308_v18 = vpop.f32.mrf.mxu0  ;;  %v2606_v61 = vld [vmem:[#allocation2 + $0x65] sm:$0xff] }
 0x175   : > { %v3306_v30 = vadd.f32 %v3265_v57, %v3222_v39  ;;  %v306_v10 = vadd.f32 0.5, %v265_v33  ;;  %v266_v42 = vcvt.s32.f32 %v6131_v55  ;;  %v2607_v39 = vld [vmem:[#allocation2 + $0x6d] sm:$0xff]  ;;  %v6165_v14 = vld [vmem:[#allocation2 + $0x7f] sm:$0xff]  ;;  %v7423_v58 = vmax.f32 %v6135_v2, 0.0 }
 0x176   : > { %v634_v21 = vmul.f32 18.0, %v593_v37  ;;  %vm716_vm4 = vcmp.ge.f32.partialorder %v593_v37, 1.0  ;;  %vm757_vm13 = vcmp.le.f32.partialorder %v593_v37, 16.0  ;;  %v594_v48 = vfloor.f32 %v553_v0  ;;  %v6142_v43 = vpop.f32.mrf.mxu0 }
 0x177   : > { %v3428_v26 = vadd.f32 %v3387_v49, %v3305_v54  ;;  %v3429_v47 = vadd.f32 %v3388_v29, %v3306_v30  ;;  %v348_v56 = vmul.f32 0.0030487804, %v306_v10  ;;  %v307_v24 = vadd.f32 0.5, %v266_v42  ;;  %vm6144_vm2 = vmand %vm716_vm4, %vm757_vm13  ;;  %v2688_v49 = vld [vmem:[#allocation2 + $0x66] sm:$0xff]  ;;  %v2689_v29 = vld [vmem:[#allocation2 + $0x6e] sm:$0xff] }
 0x178   : > { %v675_v7 = vsub.f32 %v469_v36, %v634_v21  ;;  %v635_v57 = vmul.f32 18.0, %v594_v48  ;;  %vm717_vm3 = vcmp.ge.f32.partialorder %v594_v48, 1.0  ;;  %vm758_vm9 = vcmp.le.f32.partialorder %v594_v48, 16.0  ;;  %v4309_v54 = vpop.f32.mrf.mxu0  ;;  %v6158_v48 = vld [vmem:[#allocation2 + $0x77] sm:$0xff] }
 0x179   : > { %v3551_v55 = vadd.f32 %v3510_v44, %v3428_v26  ;;  %v3552_v18 = vadd.f32 %v3511_v1, %v3429_v47  ;;  %v389_v37 = vfloor.f32 %v348_v56  ;;  %v349_v0 = vmul.f32 0.0030487804, %v307_v24  ;;  %vm6148_vm15 = vmand %vm717_vm3, %vm758_vm9 }
 0x17a   : > { %vm839_vm14 = vcmp.ge.f32.partialorder %v675_v7, 1.0  ;;  %vm921_vm12 = vcmp.le.f32.partialorder %v675_v7, 16.0  ;;  %v676_v30 = vsub.f32 %v470_v5, %v635_v57  ;;  %v2647_v10 = vmul.f32 %v2606_v61, %v4542_v6 }
 0x17b   : > { %vm880_vm5 = vmand %vm6144_vm2, %vm839_vm14  ;;  %v3587_v21 = vpack.c.bf16 %v3552_v18, %v3551_v55  ;;  %v430_v44 = vmul.f32 328.0, %v389_v37  ;;  %v390_v1 = vfloor.f32 %v349_v0  ;;  %v2648_v24 = vmul.f32 %v2607_v39, %v4542_v6  ;;  %v6160_v26 = vpop.f32.mrf.mxu0 }
 0x17c   : > { %vm962_vm8 = vmand %vm880_vm5, %vm921_vm12  ;;  %vm840_vm1 = vcmp.ge.f32.partialorder %v676_v30, 1.0  ;;  %vm922_vm10 = vcmp.le.f32.partialorder %v676_v30, 16.0  ;;  %v2729_v56 = vmul.f32 %v2688_v49, %v4565_v13  ;;  %v2730_v5 = vmul.f32 %v2689_v29, %v4565_v13 }
 0x17d   : > { %v1003_v47 = vsel %vm962_vm8, 1.0, %v5806_v16  ;;  %vm881_vm11 = vmand %vm6148_vm15, %vm840_vm1  ;;  %4371 = vmatmul.mubr.bf16.gmra.mxu1 %v3587_v21  ;;  %v471_v61 = vsub.f32 %v265_v33, %v430_v44  ;;  %v431_v7 = vmul.f32 328.0, %v390_v1  ;;  %v2852_v57 = vmul.f32 %v6079_v28, %v4586_v22  ;;  %v3018_v33 = vld [vmem:[#allocation2 + $0x78] sm:$0xff]  ;;  %v4312_v49 = vpop.f32.mrf.mxu0 }
 0x17e   : > { %v7419_v39 = vmax.f32 %v6035_v20, 0.0  ;;  %vm963_vm7 = vmand %vm881_vm11, %vm922_vm10  ;;  %4374 = vmatprep.mubr.msk.bf16.mxu1 %vm4478_vm0, %v5806_v16  ;;  %v2770_v18 = vadd.f32 %v2729_v56, %v2647_v10  ;;  %v2771_v37 = vadd.f32 %v2730_v5, %v2648_v24  ;;  %v2853_v0 = vmul.f32 %v6081_v45, %v4586_v22  ;;  %v6185_v45 = vld [vmem:[#allocation2 + $0x89] sm:$0xff]  ;;  %v6187_v1 = vld [vmem:[#allocation2 + $0x91] sm:$0xff] }
 0x17f   : > { %v1004_v29 = vsel %vm963_vm7, 1.0, %v5806_v16  ;;  %v512_v54 = vadd.f32 0.5, %v471_v61  ;;  %v472_v30 = vsub.f32 %v266_v42, %v431_v7  ;;  %v2936_v20 = vmul.f32 %v6158_v48, %v4599_v25  ;;  %v6189_v16 = vpop.f32.mrf.mxu0 }
 0x180   : > { %v6171_v55 = vmul.f32 %v7419_v39, %v1003_v47  ;;  %v7420_v28 = vmax.f32 %v6050_v8, 0.0  ;;  %v2893_v21 = vadd.f32 %v2852_v57, %v2770_v18  ;;  %v2894_v10 = vadd.f32 %v2853_v0, %v2771_v37  ;;  %v3348_v8 = vld [vmem:[#allocation2 + $0x8a] sm:$0xff]  ;;  %v3349_v47 = vld [vmem:[#allocation2 + $0x92] sm:$0xff] }
 0x181   : > { %v2937_v44 = vmul.f32 %v6165_v14, %v4599_v25  ;;  %v554_v42 = vmul.f32 0.055555556, %v512_v54  ;;  %v513_v24 = vadd.f32 0.5, %v472_v30  ;;  %v3059_v56 = vmul.f32 %v3018_v33, %v4613_v27  ;;  %v4313_v37 = vpop.f32.mrf.mxu0  ;;  %v3472_v54 = vld [vmem:[#allocation2 + $0x93] sm:$0xff] }
 0x182   : > { %2572 = vst [vmem:[#allocation2 + $0xb0] sm:$0xff] %v6171_v55  ;;  %v2532_v36 = vmul.f32 %v7420_v28, %v1004_v29  ;;  %v3060_v5 = vmul.f32 %v5908_v34, %v4613_v27  ;;  %v2977_v7 = vadd.f32 %v2936_v20, %v2893_v21  ;;  %v3182_v39 = vmul.f32 %v6097_v50, %v4625_v31  ;;  %v3471_v29 = vld [vmem:[#allocation2 + $0x8b] sm:$0xff] }
 0x183   : > { %v2978_v57 = vadd.f32 %v2937_v44, %v2894_v10  ;;  %v3183_v18 = vmul.f32 %v6099_v4, %v4625_v31  ;;  %v595_v0 = vfloor.f32 %v554_v42  ;;  %v555_v49 = vmul.f32 0.055555556, %v513_v24 }
 0x184   : > { %2573 = vst [vmem:[#allocation2 + $0xb8] sm:$0xff] %v2532_v36  ;;  %v3266_v33 = vmul.f32 %v6185_v45, %v4635_v35  ;;  %v3267_v34 = vmul.f32 %v6187_v1, %v4635_v35  ;;  %v3100_v28 = vadd.f32 %v3059_v56, %v2977_v7  ;;  %v3389_v36 = vmul.f32 %v3348_v8, %v4651_v40 }
 0x185   : > { %v3101_v20 = vadd.f32 %v3060_v5, %v2978_v57  ;;  %v3390_v50 = vmul.f32 %v3349_v47, %v4651_v40  ;;  %v636_v21 = vmul.f32 18.0, %v595_v0  ;;  %vm718_vm6 = vcmp.ge.f32.partialorder %v595_v0, 1.0  ;;  %v6206_v37 = vpop.f32.mrf.mxu0 }
 0x186   : > { %vm759_vm4 = vcmp.le.f32.partialorder %v595_v0, 16.0  ;;  %v596_v4 = vfloor.f32 %v555_v49  ;;  %v3223_v10 = vadd.f32 %v3182_v39, %v3100_v28  ;;  %v3512_v42 = vmul.f32 %v3471_v29, %v4668_v46  ;;  %v6231_v28 = vld [vmem:[#allocation2] sm:$0xff] }
 0x187   : > { %v3224_v44 = vadd.f32 %v3183_v18, %v3101_v20  ;;  %v3513_v24 = vmul.f32 %v3472_v54, %v4668_v46  ;;  %v677_v19 = vsub.f32 %v471_v61, %v636_v21  ;;  %vm800_vm13 = vmand %vm718_vm6, %vm759_vm4  ;;  %v6209_v47 = vadd.s32 184, %v5430_v12  ;;  %v4316_v57 = vpop.f32.mrf.mxu0  ;;  %v2609_v54 = vld [vmem:[#allocation2 + $0x7d] sm:$0xff] }
 0x188   : > { %v637_v56 = vmul.f32 18.0, %v596_v4  ;;  %vm719_vm2 = vcmp.ge.f32.partialorder %v596_v4, 1.0  ;;  %vm760_vm3 = vcmp.le.f32.partialorder %v596_v4, 16.0  ;;  %v3307_v5 = vadd.f32 %v3266_v33, %v3223_v10  ;;  %v2690_v4 = vld [vmem:[#allocation2 + $0x76] sm:$0xff]  ;;  %v2691_v10 = vld [vmem:[#allocation2 + $0x7e] sm:$0xff]  ;;  %v6244_v57 = vld [vmem:[#allocation2 + $0x87] sm:$0xff] }
 0x189   : > { %v3308_v8 = vadd.f32 %v3267_v34, %v3224_v44  ;;  %v6213_v7 = vadd.f32 %v5963_v38, %v6020_v62  ;;  %vm841_vm9 = vcmp.ge.f32.partialorder %v677_v19, 1.0  ;;  %vm923_vm14 = vcmp.le.f32.partialorder %v677_v19, 16.0  ;;  %vm6215_vm12 = vmand %vm719_vm2, %vm760_vm3  ;;  %v2608_v62 = vld [vmem:[#allocation2 + $0x75] sm:$0xff]  ;;  %v6224_v29 = vpop.f32.mrf.mxu0 }
 0x18a   : > { %v678_v39 = vsub.f32 %v472_v30, %v637_v56  ;;  %v6220_v61 = vadd.s32 192, %v5430_v12  ;;  %vm882_vm15 = vmand %vm800_vm13, %vm841_vm9  ;;  %v3430_v0 = vadd.f32 %v3389_v36, %v3307_v5  ;;  %v7312_v33 = vcvt.s32.f32 %v6209_v47  ;;  %v3473_v34 = vld [vmem:[#allocation2 + $0x9b] sm:$0xff] }
 0x18b   : > { %v3431_v49 = vadd.f32 %v3390_v50, %v3308_v8  ;;  %vm964_vm5 = vmand %vm882_vm15, %vm923_vm14  ;;  %v6229_v30 = vadd.f32 %v5963_v38, %v6037_v9  ;;  %v4317_v44 = vpop.f32.mrf.mxu0  ;;  %v2649_v8 = vmul.f32 %v2608_v62, %v4542_v6  ;;  %v2650_v18 = vmul.f32 %v2609_v54, %v4542_v6 }
 0x18c   : > { %vm842_vm8 = vcmp.ge.f32.partialorder %v678_v39, 1.0  ;;  %vm924_vm1 = vcmp.le.f32.partialorder %v678_v39, 16.0  ;;  %v268_v19 = vcvt.s32.f32 %v6220_v61  ;;  %v1005_v20 = vsel %vm964_vm5, 1.0, %v6231_v28  ;;  %v6248_v61 = vld [vmem:[#allocation2 + $0x8f] sm:$0xff] }
 0x18d   : > { %vm883_vm10 = vmand %vm6215_vm12, %vm842_vm8  ;;  %v3553_v36 = vadd.f32 %v3512_v42, %v3430_v0  ;;  %v3554_v50 = vadd.f32 %v3513_v24, %v3431_v49  ;;  %v308_v21 = vadd.f32 0.5, %v7312_v33  ;;  %v6240_v9 = vmul.f32 %v2492_v63, %v1005_v20  ;;  %v3020_v20 = vld [vmem:[#allocation2 + $0x88] sm:$0xff] }
 0x18e   : > { %vm965_vm11 = vmand %vm883_vm10, %vm924_vm1  ;;  %v309_v56 = vadd.f32 0.5, %v268_v19  ;;  %v2731_v49 = vmul.f32 %v2690_v4, %v4565_v13  ;;  %v2732_v62 = vmul.f32 %v2691_v10, %v4565_v13  ;;  %v6255_v44 = vpop.f32.mrf.mxu0  ;;  %v2854_v54 = vmul.f32 %v6158_v48, %v4586_v22  ;;  %v3350_v48 = vld [vmem:[#allocation2 + $0x9a] sm:$0xff]  ;;  %v3474_v33 = vld [vmem:[#allocation2 + $0xa3] sm:$0xff] }
 0x18f   : > { %v1006_v42 = vsel %vm965_vm11, 1.0, %v6231_v28  ;;  %v3588_v24 = vpack.c.bf16 %v3554_v50, %v3553_v36  ;;  %v350_v39 = vmul.f32 0.0030487804, %v308_v21  ;;  %2574 = vst [vmem:[#allocation2 + $0xc0] sm:$0xff] %v6240_v9  ;;  %v2855_v50 = vmul.f32 %v6165_v14, %v4586_v22 }
 0x190   : > { %v2534_v63 = vmul.f32 %v7423_v58, %v1006_v42  ;;  %v351_v0 = vmul.f32 0.0030487804, %v309_v56  ;;  %v2938_v2 = vmul.f32 %v6244_v57, %v4599_v25  ;;  %v2772_v4 = vadd.f32 %v2731_v49, %v2649_v8  ;;  %v6267_v42 = vld [vmem:[#allocation2 + $0x99] sm:$0xff]  ;;  %v3351_v8 = vld [vmem:[#allocation2 + $0xa2] sm:$0xff] }
 0x191   : > { %4375 = vmatmul.mubr.bf16.gmra.mxu1 %v3588_v24  ;;  %v391_v36 = vfloor.f32 %v350_v39  ;;  %v2773_v10 = vadd.f32 %v2732_v62, %v2650_v18  ;;  %v2939_v56 = vmul.f32 %v6248_v61, %v4599_v25  ;;  %v6269_v24 = vld [vmem:[#allocation2 + $0xa1] sm:$0xff]  ;;  %v4320_v39 = vpop.f32.mrf.mxu0  ;;  %v3061_v58 = vmul.f32 %v3020_v20, %v4613_v27 }
 0x192   : > { %2575 = vst [vmem:[#allocation2 + $0xc8] sm:$0xff] %v2534_v63  ;;  %v392_v21 = vfloor.f32 %v351_v0  ;;  %4378 = vmatprep.mubr.msk.bf16.mxu1 %vm4478_vm0, %v6231_v28  ;;  %v3062_v63 = vmul.f32 %v5990_v17, %v4613_v27  ;;  %v3184_v0 = vmul.f32 %v6185_v45, %v4625_v31  ;;  %v2895_v49 = vadd.f32 %v2854_v54, %v2772_v4 }
 0x193   : > { %v432_v14 = vmul.f32 328.0, %v391_v36  ;;  %v2896_v62 = vadd.f32 %v2855_v50, %v2773_v10  ;;  %v3185_v5 = vmul.f32 %v6187_v1, %v4625_v31  ;;  %v6278_v3 = vpop.f32.mrf.mxu0  ;;  %v7424_v36 = vcvt.s32.f32 %v6209_v47 }
 0x194   : > { %v433_v18 = vmul.f32 328.0, %v392_v21  ;;  %v3268_v17 = vmul.f32 %v6267_v42, %v4635_v35  ;;  %v3269_v45 = vmul.f32 %v6269_v24, %v4635_v35  ;;  %v3391_v21 = vmul.f32 %v3350_v48, %v4651_v40 }
 0x195   : > { %v473_v20 = vsub.f32 %v7424_v36, %v432_v14  ;;  %v2979_v50 = vadd.f32 %v2938_v2, %v2895_v49  ;;  %v2980_v4 = vadd.f32 %v2939_v56, %v2896_v62  ;;  %v3392_v1 = vmul.f32 %v3351_v8, %v4651_v40  ;;  %v4321_v10 = vpop.f32.mrf.mxu0 }
 0x196   : > { %v474_v54 = vsub.f32 %v268_v19, %v433_v18  ;;  %v3514_v60 = vmul.f32 %v3473_v34, %v4668_v46  ;;  %v3515_v47 = vmul.f32 %v3474_v33, %v4668_v46  ;;  %v228_v14 = vadd.s32 200, %v5430_v12  ;;  %v2610_v33 = vld [vmem:[#allocation2 + $0x85] sm:$0xff] }
 0x197   : > { %v514_v39 = vadd.f32 0.5, %v473_v20  ;;  %v3102_v59 = vadd.f32 %v3061_v58, %v2979_v50  ;;  %v3103_v52 = vadd.f32 %v3062_v63, %v2980_v4  ;;  %v6293_v51 = vadd.f32 %v5963_v38, %v6052_v11  ;;  %v6295_v19 = vpop.f32.mrf.mxu0 }
 0x198   : > { %v515_v36 = vadd.f32 0.5, %v474_v54  ;;  %v269_v56 = vcvt.s32.f32 %v228_v14  ;;  %v6298_v48 = vadd.s32 208, %v5430_v12  ;;  %v6302_v34 = vadd.f32 %v5963_v38, %v6085_v23  ;;  %v2692_v38 = vld [vmem:[#allocation2 + $0x86] sm:$0xff] }
 0x199   : > { %v556_v2 = vmul.f32 0.055555556, %v514_v39  ;;  %v3225_v18 = vadd.f32 %v3184_v0, %v3102_v59  ;;  %v3226_v58 = vadd.f32 %v3185_v5, %v3103_v52  ;;  %v2496_v63 = vmax.f32 %v6293_v51, 0.0  ;;  %v4324_v49 = vpop.f32.mrf.mxu0  ;;  %v2611_v52 = vld [vmem:[#allocation2 + $0x8d] sm:$0xff] }
 0x19a   : > { %v557_v8 = vmul.f32 0.055555556, %v515_v36  ;;  %v310_v62 = vadd.f32 0.5, %v269_v56  ;;  %v270_v50 = vcvt.s32.f32 %v6298_v48  ;;  %v2497_v4 = vmax.f32 %v6302_v34, 0.0  ;;  %v3475_v48 = vld [vmem:[#allocation2 + $0xab] sm:$0xff] }
 0x19b   : > { %v597_v11 = vfloor.f32 %v556_v2  ;;  %v3309_v39 = vadd.f32 %v3268_v17, %v3225_v18  ;;  %v3310_v14 = vadd.f32 %v3269_v45, %v3226_v58  ;;  %v2651_v15 = vmul.f32 %v2610_v33, %v4542_v6  ;;  %v2693_v45 = vld [vmem:[#allocation2 + $0x8e] sm:$0xff] }
 0x19c   : > { %v598_v10 = vfloor.f32 %v557_v8  ;;  %v352_v59 = vmul.f32 0.0030487804, %v310_v62  ;;  %v311_v17 = vadd.f32 0.5, %v270_v50  ;;  %v2652_v18 = vmul.f32 %v2611_v52, %v4542_v6 }
 0x19d   : > { %v638_v23 = vmul.f32 18.0, %v597_v11  ;;  %vm720_vm7 = vcmp.ge.f32.partialorder %v597_v11, 1.0  ;;  %vm761_vm6 = vcmp.le.f32.partialorder %v597_v11, 16.0  ;;  %v3432_v0 = vadd.f32 %v3391_v21, %v3309_v39 }
 0x19e   : > { %v639_v5 = vmul.f32 18.0, %v598_v10  ;;  %vm721_vm4 = vcmp.ge.f32.partialorder %v598_v10, 1.0  ;;  %vm762_vm13 = vcmp.le.f32.partialorder %v598_v10, 16.0  ;;  %vm802_vm2 = vmand %vm720_vm7, %vm761_vm6  ;;  %v3433_v2 = vadd.f32 %v3392_v1, %v3310_v14 }
 0x19f   : > { %v679_v36 = vsub.f32 %v473_v20, %v638_v23  ;;  %v393_v49 = vfloor.f32 %v352_v59  ;;  %v3555_v33 = vadd.f32 %v3514_v60, %v3432_v0  ;;  %v2733_v58 = vmul.f32 %v2692_v38, %v4565_v13  ;;  %vm6313_vm14 = vmand %vm721_vm4, %vm762_vm13  ;;  %v6318_v60 = vld [vmem:[#allocation2 + $0x97] sm:$0xff]  ;;  %v6320_v38 = vld [vmem:[#allocation2 + $0x9f] sm:$0xff] }
 0x1a0   : > { %v680_v8 = vsub.f32 %v474_v54, %v639_v5  ;;  %v3556_v20 = vadd.f32 %v3515_v47, %v3433_v2  ;;  %v353_v1 = vmul.f32 0.0030487804, %v311_v17  ;;  %v2734_v54 = vmul.f32 %v2693_v45, %v4565_v13  ;;  %v3022_v5 = vld [vmem:[#allocation2 + $0x98] sm:$0xff]  ;;  %v6341_v17 = vld [vmem:[#allocation2 + $0xa9] sm:$0xff]  ;;  %v6343_v45 = vpop.f32.mrf.mxu0 }
 0x1a1   : > { %vm843_vm3 = vcmp.ge.f32.partialorder %v679_v36, 1.0  ;;  %vm925_vm9 = vcmp.le.f32.partialorder %v679_v36, 16.0  ;;  %v434_v21 = vmul.f32 328.0, %v393_v49  ;;  %v2774_v14 = vadd.f32 %v2733_v58, %v2651_v15 }
 0x1a2   : > { %vm884_vm12 = vmand %vm802_vm2, %vm843_vm3  ;;  %vm844_vm15 = vcmp.ge.f32.partialorder %v680_v8, 1.0  ;;  %vm926_vm5 = vcmp.le.f32.partialorder %v680_v8, 16.0  ;;  %v3589_v62 = vpack.c.bf16 %v3556_v20, %v3555_v33  ;;  %v2856_v10 = vmul.f32 %v6244_v57, %v4586_v22  ;;  %v6349_v20 = vld [vmem:[#allocation2 + $0xb1] sm:$0xff] }
 0x1a3   : > { %vm966_vm8 = vmand %vm884_vm12, %vm925_vm9  ;;  %v475_v39 = vsub.f32 %v269_v56, %v434_v21  ;;  %v394_v23 = vfloor.f32 %v353_v1  ;;  %v2775_v59 = vadd.f32 %v2734_v54, %v2652_v18  ;;  %v2857_v52 = vmul.f32 %v6248_v61, %v4586_v22  ;;  %v3352_v21 = vld [vmem:[#allocation2 + $0xaa] sm:$0xff] }
 0x1a4   : > { %v1007_v47 = vsel %vm966_vm8, 1.0, %v6231_v28  ;;  %vm885_vm1 = vmand %vm6313_vm14, %vm844_vm15  ;;  %v7427_v0 = vmax.f32 %v6213_v7, 0.0  ;;  %4379 = vmatmul.mubr.bf16.gmra.mxu1 %v3589_v62  ;;  %v2897_v57 = vadd.f32 %v2856_v10, %v2774_v14  ;;  %v2940_v36 = vmul.f32 %v6318_v60, %v4599_v25  ;;  %v4325_v10 = vpop.f32.mrf.mxu0 }
 0x1a5   : > { %vm967_vm10 = vmand %vm885_vm1, %vm926_vm5  ;;  %v516_v15 = vadd.f32 0.5, %v475_v39  ;;  %v435_v49 = vmul.f32 328.0, %v394_v23  ;;  %4382 = vmatprep.mubr.msk.bf16.mxu1 %vm4478_vm0, %v6231_v28  ;;  %v2898_v61 = vadd.f32 %v2857_v52, %v2775_v59  ;;  %v2941_v7 = vmul.f32 %v6320_v38, %v4599_v25  ;;  %v3353_v52 = vld [vmem:[#allocation2 + $0xb2] sm:$0xff] }
 0x1a6   : > { %v6331_v56 = vmul.f32 %v7427_v0, %v1007_v47  ;;  %v1008_v2 = vsel %vm967_vm10, 1.0, %v6231_v28  ;;  %v7428_v8 = vmax.f32 %v6229_v30, 0.0  ;;  %v2981_v58 = vadd.f32 %v2940_v36, %v2897_v57 }
 0x1a7   : > { %v558_v18 = vmul.f32 0.055555556, %v516_v15  ;;  %v3063_v11 = vmul.f32 %v3022_v5, %v4613_v27  ;;  %v476_v1 = vsub.f32 %v270_v50, %v435_v49  ;;  %v2982_v54 = vadd.f32 %v2941_v7, %v2898_v61  ;;  %v6364_v15 = vpop.f32.mrf.mxu0 }
 0x1a8   : > { %2576 = vst [vmem:[#allocation2 + $0xd0] sm:$0xff] %v6331_v56  ;;  %v2536_v33 = vmul.f32 %v7428_v8, %v1008_v2  ;;  %v3064_v62 = vmul.f32 %v6075_v53, %v4613_v27  ;;  %v3186_v14 = vmul.f32 %v6267_v42, %v4625_v31  ;;  %v3187_v23 = vmul.f32 %v6269_v24, %v4625_v31  ;;  %v3476_v42 = vld [vmem:[#allocation2 + $0xb3] sm:$0xff] }
 0x1a9   : > { %v599_v30 = vfloor.f32 %v558_v18  ;;  %v3104_v47 = vadd.f32 %v3063_v11, %v2981_v58  ;;  %v3270_v59 = vmul.f32 %v6341_v17, %v4635_v35  ;;  %v517_v50 = vadd.f32 0.5, %v476_v1  ;;  %v4328_v7 = vpop.f32.mrf.mxu0 }
 0x1aa   : > { %2577 = vst [vmem:[#allocation2 + $0xd8] sm:$0xff] %v2536_v33  ;;  %v3105_v5 = vadd.f32 %v3064_v62, %v2982_v54  ;;  %v3271_v53 = vmul.f32 %v6349_v20, %v4635_v35  ;;  %v3393_v0 = vmul.f32 %v3352_v21, %v4651_v40  ;;  %v3394_v49 = vmul.f32 %v3353_v52, %v4651_v40  ;;  %v6375_v54 = vld [vmem:[%s7271_s3] ss:$0 sm:$0xff]  ;;  %v6401_v7 = vld [vmem:[#allocation2 + $0xa7] sm:$0xff] }
 0x1ab   : > { %v640_v57 = vmul.f32 18.0, %v599_v30  ;;  %vm722_vm11 = vcmp.ge.f32.partialorder %v599_v30, 1.0  ;;  %vm763_vm7 = vcmp.le.f32.partialorder %v599_v30, 16.0  ;;  %v3227_v36 = vadd.f32 %v3186_v14, %v3104_v47 }
 0x1ac   : > { %v559_v24 = vmul.f32 0.055555556, %v517_v50  ;;  %v3228_v2 = vadd.f32 %v3187_v23, %v3105_v5  ;;  %v3516_v61 = vmul.f32 %v3475_v48, %v4668_v46  ;;  %vm804_vm6 = vmand %vm722_vm11, %vm763_vm7  ;;  %v3517_v18 = vmul.f32 %v3476_v42, %v4668_v46  ;;  %v2612_v23 = vld [vmem:[#allocation2 + $0x95] sm:$0xff] }
 0x1ad   : > { %v681_v8 = vsub.f32 %v475_v39, %v640_v57  ;;  %v3311_v33 = vadd.f32 %v3270_v59, %v3227_v36  ;;  %v6370_v58 = vadd.s32 216, %v5430_v12  ;;  %v6379_v62 = vadd.f32 %v6375_v54, %v6108_v32  ;;  %v2613_v57 = vld [vmem:[#allocation2 + $0x9d] sm:$0xff] }
 0x1ae   : > { %v600_v11 = vfloor.f32 %v559_v24  ;;  %v3312_v21 = vadd.f32 %v3271_v53, %v3228_v2  ;;  %v6382_v39 = vadd.s32 224, %v5430_v12  ;;  %v6394_v42 = vadd.f32 %v6375_v54, %v6137_v41  ;;  %v2694_v36 = vld [vmem:[#allocation2 + $0x96] sm:$0xff] }
 0x1af   : > { %vm845_vm4 = vcmp.ge.f32.partialorder %v681_v8, 1.0  ;;  %vm927_vm13 = vcmp.le.f32.partialorder %v681_v8, 16.0  ;;  %v3434_v14 = vadd.f32 %v3393_v0, %v3311_v33  ;;  %v271_v10 = vcvt.s32.f32 %v6370_v58  ;;  %v6409_v58 = vld [vmem:[#allocation2 + $0xaf] sm:$0xff] }
 0x1b0   : > { %vm886_vm2 = vmand %vm804_vm6, %vm845_vm4  ;;  %v641_v30 = vmul.f32 18.0, %v600_v11  ;;  %vm723_vm3 = vcmp.ge.f32.partialorder %v600_v11, 1.0  ;;  %vm764_vm9 = vcmp.le.f32.partialorder %v600_v11, 16.0  ;;  %v3435_v47 = vadd.f32 %v3394_v49, %v3312_v21  ;;  %v3024_v11 = vld [vmem:[#allocation2 + $0xa8] sm:$0xff] }
 0x1b1   : > { %vm968_vm14 = vmand %vm886_vm2, %vm927_vm13  ;;  %v3557_v59 = vadd.f32 %v3516_v61, %v3434_v14  ;;  %v312_v52 = vadd.f32 0.5, %v271_v10  ;;  %v2498_v32 = vmax.f32 %v6379_v62, 0.0  ;;  %v272_v48 = vcvt.s32.f32 %v6382_v39 }
 0x1b2   : > { %v1009_v50 = vsel %vm968_vm14, 1.0, %v6231_v28  ;;  %v682_v5 = vsub.f32 %v476_v1, %v641_v30  ;;  %vm6388_vm12 = vmand %vm723_vm3, %vm764_vm9  ;;  %v3558_v0 = vadd.f32 %v3517_v18, %v3435_v47  ;;  %v2653_v61 = vmul.f32 %v2612_v23, %v4542_v6  ;;  %v2695_v1 = vld [vmem:[#allocation2 + $0x9e] sm:$0xff] }
 0x1b3   : > { %v6398_v24 = vmul.f32 %v2496_v63, %v1009_v50  ;;  %v354_v2 = vmul.f32 0.0030487804, %v312_v52  ;;  %v313_v49 = vadd.f32 0.5, %v272_v48  ;;  %v2499_v33 = vmax.f32 %v6394_v42, 0.0  ;;  %v6421_v50 = vld [vmem:[#allocation2 + $0xb9] sm:$0xff]  ;;  %v3356_v42 = vld [vmem:[#allocation2 + $0xca] sm:$0xff] }
 0x1b4   : > { %vm846_vm15 = vcmp.ge.f32.partialorder %v682_v5, 1.0  ;;  %vm928_vm5 = vcmp.le.f32.partialorder %v682_v5, 16.0  ;;  %v3590_v8 = vpack.c.bf16 %v3558_v0, %v3557_v59  ;;  %v2654_v63 = vmul.f32 %v2613_v57, %v4542_v6  ;;  %v6423_v5 = vpop.f32.mrf.mxu0  ;;  %v6430_v57 = vld [vmem:[#allocation2 + $0xc1] sm:$0xff] }
 0x1b5   : > { %2578 = vst [vmem:[#allocation2 + $0xe0] sm:$0xff] %v6398_v24  ;;  %vm887_vm8 = vmand %vm6388_vm12, %vm846_vm15  ;;  %v395_v51 = vfloor.f32 %v354_v2  ;;  %v355_v41 = vmul.f32 0.0030487804, %v313_v49  ;;  %v2735_v18 = vmul.f32 %v2694_v36, %v4565_v13  ;;  %v2736_v21 = vmul.f32 %v2695_v1, %v4565_v13  ;;  %v3354_v1 = vld [vmem:[#allocation2 + $0xba] sm:$0xff] }
 0x1b6   : > { %vm969_vm1 = vmand %vm887_vm8, %vm928_vm5  ;;  %4383 = vmatmul.mubr.bf16.gmra.mxu1 %v3590_v8  ;;  %v2858_v39 = vmul.f32 %v6318_v60, %v4586_v22  ;;  %v2859_v14 = vmul.f32 %v6320_v38, %v4586_v22  ;;  %v2942_v30 = vmul.f32 %v6401_v7, %v4599_v25  ;;  %v2943_v38 = vmul.f32 %v6409_v58, %v4599_v25  ;;  %v3355_v8 = vld [vmem:[#allocation2 + $0xc2] sm:$0xff] }
 0x1b7   : > { %v1010_v47 = vsel %vm969_vm1, 1.0, %v6231_v28  ;;  %v436_v23 = vmul.f32 328.0, %v395_v51  ;;  %v396_v59 = vfloor.f32 %v355_v41  ;;  %4386 = vmatprep.mubr.msk.bf16.mxu1 %vm4478_vm0, %v6231_v28  ;;  %v2776_v52 = vadd.f32 %v2735_v18, %v2653_v61  ;;  %v3477_v51 = vld [vmem:[#allocation2 + $0xbb] sm:$0xff]  ;;  %v4329_v41 = vpop.f32.mrf.mxu0  ;;  %v3478_v18 = vld [vmem:[#allocation2 + $0xc3] sm:$0xff] }
 0x1b8   : > { %v2538_v60 = vmul.f32 %v2497_v4, %v1010_v47  ;;  %v2777_v53 = vadd.f32 %v2736_v21, %v2654_v63  ;;  %v3065_v0 = vmul.f32 %v3024_v11, %v4613_v27  ;;  %v3066_v61 = vmul.f32 %v6171_v55, %v4613_v27 }
 0x1b9   : > { %v477_v36 = vsub.f32 %v271_v10, %v436_v23  ;;  %v437_v2 = vmul.f32 328.0, %v396_v59  ;;  %v2899_v49 = vadd.f32 %v2858_v39, %v2776_v52  ;;  %v3188_v4 = vmul.f32 %v6341_v17, %v4625_v31  ;;  %v6442_v47 = vpop.f32.mrf.mxu0 }
 0x1ba   : > { %2579 = vst [vmem:[#allocation2 + $0xe8] sm:$0xff] %v2538_v60  ;;  %v2900_v34 = vadd.f32 %v2859_v14, %v2777_v53  ;;  %v3189_v63 = vmul.f32 %v6349_v20, %v4625_v31  ;;  %v3272_v10 = vmul.f32 %v6421_v50, %v4635_v35  ;;  %v3273_v55 = vmul.f32 %v6430_v57, %v4635_v35 }
 0x1bb   : > { %v518_v11 = vadd.f32 0.5, %v477_v36  ;;  %v478_v21 = vsub.f32 %v272_v48, %v437_v2  ;;  %v2983_v39 = vadd.f32 %v2942_v30, %v2899_v49  ;;  %v3395_v14 = vmul.f32 %v3354_v1, %v4651_v40  ;;  %v4332_v41 = vpop.f32.mrf.mxu0 }
 0x1bc   : > { %v2984_v23 = vadd.f32 %v2943_v38, %v2900_v34  ;;  %v3396_v17 = vmul.f32 %v3355_v8, %v4651_v40  ;;  %v3518_v59 = vmul.f32 %v3477_v51, %v4668_v46  ;;  %v3519_v53 = vmul.f32 %v3478_v18, %v4668_v46  ;;  %v2614_v18 = vld [vmem:[#allocation2 + $0xa5] sm:$0xff] }
 0x1bd   : > { %v560_v20 = vmul.f32 0.055555556, %v518_v11  ;;  %v519_v52 = vadd.f32 0.5, %v478_v21  ;;  %v3106_v60 = vadd.f32 %v3065_v0, %v2983_v39  ;;  %v6449_v30 = vadd.s32 232, %v5430_v12  ;;  %v2468_v51 = vpop.f32.mrf.mxu0 }
 0x1be   : > { %v3107_v48 = vadd.f32 %v3066_v61, %v2984_v23  ;;  %v6453_v2 = vadd.f32 %v6375_v54, %v6142_v43  ;;  %v6456_v38 = vadd.s32 240, %v5430_v12  ;;  %v6460_v0 = vadd.f32 %v6375_v54, %v6160_v26 }
 0x1bf   : > { %v601_v49 = vfloor.f32 %v560_v20  ;;  %v561_v1 = vmul.f32 0.055555556, %v519_v52  ;;  %v3229_v8 = vadd.f32 %v3188_v4, %v3106_v60  ;;  %v273_v61 = vcvt.s32.f32 %v6449_v30  ;;  %v4333_v23 = vpop.f32.mrf.mxu0 }
 0x1c0   : > { %v3230_v34 = vadd.f32 %v3189_v63, %v3107_v48  ;;  %v274_v11 = vcvt.s32.f32 %v6456_v38  ;;  %v2860_v26 = vmul.f32 %v6401_v7, %v4586_v22  ;;  %v2861_v62 = vmul.f32 %v6409_v58, %v4586_v22 }
 0x1c1   : > { %v642_v43 = vmul.f32 18.0, %v601_v49  ;;  %vm724_vm10 = vcmp.ge.f32.partialorder %v601_v49, 1.0  ;;  %vm765_vm11 = vcmp.le.f32.partialorder %v601_v49, 16.0  ;;  %v602_v39 = vfloor.f32 %v561_v1  ;;  %v2615_v49 = vld [vmem:[#allocation2 + $0xad] sm:$0xff] }
 0x1c2   : > { %v3313_v20 = vadd.f32 %v3272_v10, %v3229_v8  ;;  %v3314_v52 = vadd.f32 %v3273_v55, %v3230_v34  ;;  %v314_v4 = vadd.f32 0.5, %v273_v61  ;;  %v315_v60 = vadd.f32 0.5, %v274_v11  ;;  %vm6465_vm7 = vmand %vm724_vm10, %vm765_vm11  ;;  %v2696_v34 = vld [vmem:[#allocation2 + $0xa6] sm:$0xff] }
 0x1c3   : > { %v683_v41 = vsub.f32 %v477_v36, %v642_v43  ;;  %v643_v63 = vmul.f32 18.0, %v602_v39  ;;  %vm725_vm6 = vcmp.ge.f32.partialorder %v602_v39, 1.0  ;;  %vm766_vm4 = vcmp.le.f32.partialorder %v602_v39, 16.0  ;;  %v2697_v43 = vld [vmem:[#allocation2 + $0xae] sm:$0xff] }
 0x1c4   : > { %v3436_v48 = vadd.f32 %v3395_v14, %v3313_v20  ;;  %v3437_v30 = vadd.f32 %v3396_v17, %v3314_v52  ;;  %v356_v38 = vmul.f32 0.0030487804, %v314_v4  ;;  %v357_v51 = vmul.f32 0.0030487804, %v315_v60  ;;  %vm6469_vm3 = vmand %vm725_vm6, %vm766_vm4 }
 0x1c5   : > { %vm847_vm13 = vcmp.ge.f32.partialorder %v683_v41, 1.0  ;;  %vm929_vm2 = vcmp.le.f32.partialorder %v683_v41, 16.0  ;;  %v684_v10 = vsub.f32 %v478_v21, %v643_v63  ;;  %v2501_v36 = vmax.f32 %v6460_v0, 0.0  ;;  %v6489_v41 = vld [vmem:[#allocation2 + $0xbf] sm:$0xff] }
 0x1c6   : > { %vm888_vm9 = vmand %vm6465_vm7, %vm847_vm13  ;;  %v3559_v1 = vadd.f32 %v3518_v59, %v3436_v48  ;;  %v3560_v8 = vadd.f32 %v3519_v53, %v3437_v30  ;;  %v397_v14 = vfloor.f32 %v356_v38  ;;  %v398_v17 = vfloor.f32 %v357_v51  ;;  %v6481_v53 = vld [vmem:[#allocation2 + $0xb7] sm:$0xff] }
 0x1c7   : > { %vm970_vm14 = vmand %vm888_vm9, %vm929_vm2  ;;  %vm848_vm12 = vcmp.ge.f32.partialorder %v684_v10, 1.0  ;;  %vm930_vm15 = vcmp.le.f32.partialorder %v684_v10, 16.0  ;;  %v2655_v21 = vmul.f32 %v2614_v18, %v4542_v6  ;;  %v2656_v39 = vmul.f32 %v2615_v49, %v4542_v6  ;;  %v3026_v63 = vld [vmem:[#allocation2 + $0xb8] sm:$0xff]  ;;  %v6503_v10 = vld [vmem:[#allocation2 + $0xc9] sm:$0xff] }
 0x1c8   : > { %v1011_v23 = vsel %vm970_vm14, 1.0, %v6231_v28  ;;  %vm889_vm5 = vmand %vm6469_vm3, %vm848_vm12  ;;  %v3591_v20 = vpack.c.bf16 %v3560_v8, %v3559_v1  ;;  %v438_v52 = vmul.f32 328.0, %v397_v14  ;;  %v439_v59 = vmul.f32 328.0, %v398_v17  ;;  %v6508_v1 = vld [vmem:[#allocation2 + $0xd1] sm:$0xff] }
 0x1c9   : > { %v6485_v4 = vmul.f32 %v2498_v32, %v1011_v23  ;;  %vm971_vm8 = vmand %vm889_vm5, %vm930_vm15  ;;  %v2737_v60 = vmul.f32 %v2696_v34, %v4565_v13  ;;  %v2738_v18 = vmul.f32 %v2697_v43, %v4565_v13  ;;  %v2944_v7 = vmul.f32 %v6481_v53, %v4599_v25  ;;  %v3357_v34 = vld [vmem:[#allocation2 + $0xd2] sm:$0xff] }
 0x1ca   : > { %v1012_v48 = vsel %vm971_vm8, 1.0, %v6231_v28  ;;  %4387 = vmatmul.mubr.bf16.gmra.mxu1 %v3591_v20  ;;  %v479_v30 = vsub.f32 %v273_v61, %v438_v52  ;;  %v480_v38 = vsub.f32 %v274_v11, %v439_v59  ;;  %v2945_v58 = vmul.f32 %v6489_v41, %v4599_v25  ;;  %v3479_v43 = vld [vmem:[#allocation2 + $0xcb] sm:$0xff]  ;;  %v3480_v52 = vld [vmem:[#allocation2 + $0xd3] sm:$0xff] }
 0x1cb   : > { %2580 = vst [vmem:[#allocation2 + $0xf0] sm:$0xff] %v6485_v4  ;;  %v2540_v32 = vmul.f32 %v2499_v33, %v1012_v48  ;;  %4390 = vmatprep.mubr.msk.bf16.mxu1 %vm4478_vm0, %v6231_v28  ;;  %v2778_v51 = vadd.f32 %v2737_v60, %v2655_v21  ;;  %v2779_v49 = vadd.f32 %v2738_v18, %v2656_v39 }
 0x1cc   : > { %v520_v61 = vadd.f32 0.5, %v479_v30  ;;  %v521_v11 = vadd.f32 0.5, %v480_v38  ;;  %v3067_v55 = vmul.f32 %v3026_v63, %v4613_v27  ;;  %v3068_v14 = vmul.f32 %v6240_v9, %v4613_v27 }
 0x1cd   : > { %2581 = vst [vmem:[#allocation2 + $0xf8] sm:$0xff] %v2540_v32  ;;  %v2901_v33 = vadd.f32 %v2860_v26, %v2778_v51  ;;  %v2902_v8 = vadd.f32 %v2861_v62, %v2779_v49  ;;  %v3190_v17 = vmul.f32 %v6421_v50, %v4625_v31  ;;  %v3191_v23 = vmul.f32 %v6430_v57, %v4625_v31 }
 0x1ce   : > { %v562_v21 = vmul.f32 0.055555556, %v520_v61  ;;  %v563_v39 = vmul.f32 0.055555556, %v521_v11  ;;  %v3274_v20 = vmul.f32 %v6503_v10, %v4635_v35  ;;  %v3275_v18 = vmul.f32 %v6508_v1, %v4635_v35 }
 0x1cf   : > { %v2985_v59 = vadd.f32 %v2944_v7, %v2901_v33  ;;  %v2986_v60 = vadd.f32 %v2945_v58, %v2902_v8  ;;  %v3397_v9 = vmul.f32 %v3356_v42, %v4651_v40  ;;  %v3398_v63 = vmul.f32 %v3357_v34, %v4651_v40 }
 0x1d0   : > { %v603_v26 = vfloor.f32 %v562_v21  ;;  %v604_v50 = vfloor.f32 %v563_v39  ;;  %v3520_v48 = vmul.f32 %v3479_v43, %v4668_v46  ;;  %v3521_v57 = vmul.f32 %v3480_v52, %v4668_v46  ;;  %v2617_v21 = vld [vmem:[#allocation2 + $0xbd] sm:$0xff] }
 0x1d1   : > { %v3108_v62 = vadd.f32 %v3067_v55, %v2985_v59  ;;  %v3109_v32 = vadd.f32 %v3068_v14, %v2986_v60  ;;  %v6525_v51 = vadd.s32 248, %v5430_v12  ;;  %v6534_v8 = vadd.f32 %v6375_v54, %v6189_v16  ;;  %v2699_v52 = vld [vmem:[#allocation2 + $0xbe] sm:$0xff] }
 0x1d2   : > { %v644_v49 = vmul.f32 18.0, %v603_v26  ;;  %vm726_vm1 = vcmp.ge.f32.partialorder %v603_v26, 1.0  ;;  %vm767_vm10 = vcmp.le.f32.partialorder %v603_v26, 16.0  ;;  %v645_v7 = vmul.f32 18.0, %v604_v50 }
 0x1d3   : > { %vm727_vm11 = vcmp.ge.f32.partialorder %v604_v50, 1.0  ;;  %vm768_vm7 = vcmp.le.f32.partialorder %v604_v50, 16.0  ;;  %v3231_v61 = vadd.f32 %v3190_v17, %v3108_v62  ;;  %v3232_v11 = vadd.f32 %v3191_v23, %v3109_v32  ;;  %vm6527_vm6 = vmand %vm726_vm1, %vm767_vm10 }
 0x1d4   : > { %v685_v58 = vsub.f32 %v479_v30, %v644_v49  ;;  %v686_v55 = vsub.f32 %v480_v38, %v645_v7  ;;  %v275_v33 = vcvt.s32.f32 %v6525_v51  ;;  %v6537_v43 = vadd.s32 256, %v5430_v12  ;;  %v2616_v30 = vld [vmem:[#allocation2 + $0xb5] sm:$0xff]  ;;  %vm6545_vm2 = vmand %vm727_vm11, %vm768_vm7 }
 0x1d5   : > { %v3315_v14 = vadd.f32 %v3274_v20, %v3231_v61  ;;  %v3316_v34 = vadd.f32 %v3275_v18, %v3232_v11  ;;  %v6541_v17 = vadd.f32 %v6375_v54, %v6206_v37  ;;  %v2502_v37 = vmax.f32 %v6534_v8, 0.0  ;;  %v2698_v20 = vld [vmem:[#allocation2 + $0xb6] sm:$0xff]  ;;  %v6567_v11 = vld [vmem:[#allocation2 + $0xc7] sm:$0xff] }
 0x1d6   : > { %vm849_vm4 = vcmp.ge.f32.partialorder %v685_v58, 1.0  ;;  %vm931_vm13 = vcmp.le.f32.partialorder %v685_v58, 16.0  ;;  %vm850_vm3 = vcmp.ge.f32.partialorder %v686_v55, 1.0  ;;  %vm932_vm9 = vcmp.le.f32.partialorder %v686_v55, 16.0  ;;  %v6569_v58 = vld [vmem:[#allocation2 + $0xcf] sm:$0xff] }
 0x1d7   : > { %vm890_vm14 = vmand %vm6527_vm6, %vm849_vm4  ;;  %v3438_v16 = vadd.f32 %v3397_v9, %v3315_v14  ;;  %v3439_v39 = vadd.f32 %v3398_v63, %v3316_v34  ;;  %v316_v23 = vadd.f32 0.5, %v275_v33  ;;  %v276_v59 = vcvt.s32.f32 %v6537_v43  ;;  %v3028_v14 = vld [vmem:[#allocation2 + $0xc8] sm:$0xff] }
 0x1d8   : > { %vm972_vm12 = vmand %vm890_vm14, %vm931_vm13  ;;  %v2503_v60 = vmax.f32 %v6541_v17, 0.0  ;;  %v2657_v18 = vmul.f32 %v2616_v30, %v4542_v6  ;;  %v2658_v26 = vmul.f32 %v2617_v21, %v4542_v6  ;;  %v7439_v32 = vmax.f32 %v6453_v2, 0.0 }
 0x1d9   : > { %v1013_v50 = vsel %vm972_vm12, 1.0, %v6231_v28  ;;  %vm891_vm15 = vmand %vm6545_vm2, %vm850_vm3  ;;  %v3561_v9 = vadd.f32 %v3520_v48, %v3438_v16  ;;  %v3562_v63 = vadd.f32 %v3521_v57, %v3439_v39  ;;  %v358_v62 = vmul.f32 0.0030487804, %v316_v23  ;;  %v6583_v39 = vld [vmem:[#allocation2 + $0xd9] sm:$0xff]  ;;  %v6585_v23 = vld [vmem:[#allocation2 + $0xe1] sm:$0xff] }
 0x1da   : > { %v6562_v51 = vmul.f32 %v7439_v32, %v1013_v50  ;;  %vm973_vm5 = vmand %vm891_vm15, %vm932_vm9  ;;  %v317_v49 = vadd.f32 0.5, %v276_v59  ;;  %v2739_v7 = vmul.f32 %v2698_v20, %v4565_v13  ;;  %v2740_v61 = vmul.f32 %v2699_v52, %v4565_v13  ;;  %v3358_v52 = vld [vmem:[#allocation2 + $0xda] sm:$0xff]  ;;  %v3482_v32 = vld [vmem:[#allocation2 + $0xe3] sm:$0xff] }
 0x1db   : > { %v1014_v42 = vsel %vm973_vm5, 1.0, %v6231_v28  ;;  %v3592_v48 = vpack.c.bf16 %v3562_v63, %v3561_v9  ;;  %v399_v57 = vfloor.f32 %v358_v62  ;;  %v2862_v2 = vmul.f32 %v6481_v53, %v4586_v22  ;;  %v3481_v62 = vld [vmem:[#allocation2 + $0xdb] sm:$0xff] }
 0x1dc   : > { %2582 = vst [vmem:[#allocation2 + $0x100] sm:$0xff] %v6562_v51  ;;  %v2542_v55 = vmul.f32 %v2501_v36, %v1014_v42  ;;  %v359_v34 = vmul.f32 0.0030487804, %v317_v49  ;;  %v2780_v43 = vadd.f32 %v2739_v7, %v2657_v18  ;;  %v2781_v30 = vadd.f32 %v2740_v61, %v2658_v26  ;;  %v3359_v18 = vld [vmem:[#allocation2 + $0xe2] sm:$0xff] }
 0x1dd   : > { %4391 = vmatmul.mubr.bf16.gmra.mxu1 %v3592_v48  ;;  %v440_v21 = vmul.f32 328.0, %v399_v57  ;;  %v2863_v38 = vmul.f32 %v6489_v41, %v4586_v22  ;;  %v2946_v16 = vmul.f32 %v6567_v11, %v4599_v25  ;;  %v2947_v53 = vmul.f32 %v6569_v58, %v4599_v25 }
 0x1de   : > { %2583 = vst [vmem:[#allocation2 + $0x108] sm:$0xff] %v2542_v55  ;;  %v400_v0 = vfloor.f32 %v359_v34  ;;  %4394 = vmatprep.mubr.msk.bf16.mxu1 %vm4478_vm0, %v6231_v28  ;;  %v2903_v36 = vadd.f32 %v2862_v2, %v2780_v43  ;;  %v3069_v20 = vmul.f32 %v3028_v14, %v4613_v27  ;;  %v3070_v41 = vmul.f32 %v6331_v56, %v4613_v27 }
 0x1df   : > { %v481_v26 = vsub.f32 %v275_v33, %v440_v21  ;;  %v2904_v50 = vadd.f32 %v2863_v38, %v2781_v30  ;;  %v3192_v9 = vmul.f32 %v6503_v10, %v4625_v31  ;;  %v3193_v63 = vmul.f32 %v6508_v1, %v4625_v31 }
 0x1e0   : > { %v441_v49 = vmul.f32 328.0, %v400_v0  ;;  %v2987_v28 = vadd.f32 %v2946_v16, %v2903_v36  ;;  %v3276_v7 = vmul.f32 %v6583_v39, %v4635_v35  ;;  %v3277_v56 = vmul.f32 %v6585_v23, %v4635_v35 }
 0x1e1   : > { %v522_v61 = vadd.f32 0.5, %v481_v26  ;;  %v2988_v42 = vadd.f32 %v2947_v53, %v2904_v50  ;;  %v3399_v33 = vmul.f32 %v3358_v52, %v4651_v40  ;;  %v3400_v48 = vmul.f32 %v3359_v18, %v4651_v40  ;;  %v2618_v18 = vld [vmem:[#allocation2 + $0xc5] sm:$0xff]  ;;  %v2619_v50 = vld [vmem:[#allocation2 + $0xcd] sm:$0xff] }
 0x1e2   : > { %v482_v10 = vsub.f32 %v276_v59, %v441_v49  ;;  %v3110_v57 = vadd.f32 %v3069_v20, %v2987_v28  ;;  %v3522_v1 = vmul.f32 %v3481_v62, %v4668_v46  ;;  %v3523_v2 = vmul.f32 %v3482_v32, %v4668_v46 }
 0x1e3   : > { %v564_v14 = vmul.f32 0.055555556, %v522_v61  ;;  %v3111_v55 = vadd.f32 %v3070_v41, %v2988_v42  ;;  %v6605_v34 = vadd.s32 264, %v5430_v12  ;;  %v6609_v43 = vadd.f32 %v6375_v54, %v6224_v29 }
 0x1e4   : > { %v523_v30 = vadd.f32 0.5, %v482_v10  ;;  %v3233_v21 = vadd.f32 %v3192_v9, %v3110_v57  ;;  %v6612_v38 = vadd.s32 272, %v5430_v12  ;;  %v6616_v59 = vadd.f32 %v6375_v54, %v6255_v44 }
 0x1e5   : > { %v605_v16 = vfloor.f32 %v564_v14  ;;  %v3234_v53 = vadd.f32 %v3193_v63, %v3111_v55  ;;  %v277_v0 = vcvt.s32.f32 %v6605_v34  ;;  %v2504_v36 = vmax.f32 %v6609_v43, 0.0  ;;  %v2700_v14 = vld [vmem:[#allocation2 + $0xc6] sm:$0xff] }
 0x1e6   : > { %v565_v20 = vmul.f32 0.055555556, %v523_v30  ;;  %v3317_v41 = vadd.f32 %v3276_v7, %v3233_v21  ;;  %v278_v29 = vcvt.s32.f32 %v6612_v38  ;;  %v2505_v52 = vmax.f32 %v6616_v59, 0.0  ;;  %v6632_v30 = vpop.f32.mrf.mxu1  ;;  %v6766_v59 = vld [vmem:[#allocation2 + $0x101] sm:$0xff] }
 0x1e7   : > { %v646_v9 = vmul.f32 18.0, %v605_v16  ;;  %vm728_vm8 = vcmp.ge.f32.partialorder %v605_v16, 1.0  ;;  %vm769_vm1 = vcmp.le.f32.partialorder %v605_v16, 16.0  ;;  %v3318_v62 = vadd.f32 %v3277_v56, %v3234_v53  ;;  %v2701_v56 = vld [vmem:[#allocation2 + $0xce] sm:$0xff] }
 0x1e8   : > { %v606_v44 = vfloor.f32 %v565_v20  ;;  %v3440_v32 = vadd.f32 %v3399_v33, %v3317_v41  ;;  %v318_v63 = vadd.f32 0.5, %v277_v0  ;;  %v319_v49 = vadd.f32 0.5, %v278_v29  ;;  %vm6626_vm10 = vmand %vm728_vm8, %vm769_vm1 }
 0x1e9   : > { %v687_v28 = vsub.f32 %v481_v26, %v646_v9  ;;  %v3441_v61 = vadd.f32 %v3400_v48, %v3318_v62  ;;  %v2659_v42 = vmul.f32 %v2618_v18, %v4542_v6  ;;  %v2660_v57 = vmul.f32 %v2619_v50, %v4542_v6  ;;  %v4352_v18 = vpop.f32.mrf.mxu1  ;;  %v6644_v62 = vld [vmem:[#allocation2 + $0xdf] sm:$0xff] }
 0x1ea   : > { %v647_v55 = vmul.f32 18.0, %v606_v44  ;;  %vm729_vm11 = vcmp.ge.f32.partialorder %v606_v44, 1.0  ;;  %vm770_vm7 = vcmp.le.f32.partialorder %v606_v44, 16.0  ;;  %v3563_v33 = vadd.f32 %v3522_v1, %v3440_v32  ;;  %v6642_v1 = vld [vmem:[#allocation2 + $0xd7] sm:$0xff]  ;;  %v6650_v32 = vld [vmem:[#allocation2] sm:$0xff] }
 0x1eb   : > { %vm851_vm6 = vcmp.ge.f32.partialorder %v687_v28, 1.0  ;;  %vm933_vm4 = vcmp.le.f32.partialorder %v687_v28, 16.0  ;;  %vm6634_vm13 = vmand %vm729_vm11, %vm770_vm7  ;;  %v3564_v21 = vadd.f32 %v3523_v2, %v3441_v61  ;;  %v360_v48 = vmul.f32 0.0030487804, %v318_v63  ;;  %v6653_v28 = vpop.f32.mrf.mxu1 }
 0x1ec   : > { %vm892_vm2 = vmand %vm6626_vm10, %vm851_vm6  ;;  %v688_v16 = vsub.f32 %v482_v10, %v647_v55  ;;  %v361_v53 = vmul.f32 0.0030487804, %v319_v49  ;;  %v2741_v20 = vmul.f32 %v2700_v14, %v4565_v13  ;;  %v2742_v41 = vmul.f32 %v2701_v56, %v4565_v13  ;;  %v3030_v10 = vld [vmem:[#allocation2 + $0xd8] sm:$0xff] }
 0x1ed   : > { %vm974_vm3 = vmand %vm892_vm2, %vm933_vm4  ;;  %v3593_v50 = vpack.c.bf16 %v3564_v21, %v3563_v33  ;;  %v401_v9 = vfloor.f32 %v360_v48  ;;  %v2864_v2 = vmul.f32 %v6567_v11, %v4586_v22  ;;  %v2865_v44 = vmul.f32 %v6569_v58, %v4586_v22  ;;  %v4353_v55 = vpop.f32.mrf.mxu1  ;;  %v6672_v21 = vld [vmem:[#allocation2 + $0xe9] sm:$0xff]  ;;  %v6674_v48 = vld [vmem:[#allocation2 + $0xf1] sm:$0xff] }
 0x1ee   : > { %v1015_v63 = vsel %vm974_vm3, 1.0, %v6650_v32  ;;  %vm852_vm9 = vcmp.ge.f32.partialorder %v688_v16, 1.0  ;;  %vm934_vm14 = vcmp.le.f32.partialorder %v688_v16, 16.0  ;;  %v402_v49 = vfloor.f32 %v361_v53  ;;  %v3360_v16 = vld [vmem:[#allocation2 + $0xea] sm:$0xff] }
 0x1ef   : > { %v6657_v7 = vmul.f32 %v2502_v37, %v1015_v63  ;;  %vm893_vm12 = vmand %vm6634_vm13, %vm852_vm9  ;;  %4395 = vmatmul.mubr.bf16.gmra.mxu1 %v3593_v50  ;;  %v442_v11 = vmul.f32 328.0, %v401_v9  ;;  %v2782_v58 = vadd.f32 %v2741_v20, %v2659_v42  ;;  %v2783_v61 = vadd.f32 %v2742_v41, %v2660_v57 }
 0x1f0   : > { %vm975_vm15 = vmand %vm893_vm12, %vm934_vm14  ;;  %v443_v14 = vmul.f32 328.0, %v402_v49  ;;  %4398 = vmatprep.mubr.msk.bf16.mxu1 %vm4478_vm0, %v6650_v32  ;;  %v2948_v56 = vmul.f32 %v6642_v1, %v4599_v25  ;;  %v2949_v8 = vmul.f32 %v6644_v62, %v4599_v25  ;;  %v3071_v37 = vmul.f32 %v3030_v10, %v4613_v27  ;;  %v6686_v18 = vpop.f32.mrf.mxu1 }
 0x1f1   : > { %2584 = vst [vmem:[#allocation2 + $0x110] sm:$0xff] %v6657_v7  ;;  %v1016_v33 = vsel %vm975_vm15, 1.0, %v6650_v32  ;;  %v483_v42 = vsub.f32 %v277_v0, %v442_v11  ;;  %v2905_v57 = vadd.f32 %v2864_v2, %v2782_v58  ;;  %v2906_v26 = vadd.f32 %v2865_v44, %v2783_v61  ;;  %v3361_v0 = vld [vmem:[#allocation2 + $0xf2] sm:$0xff] }
 0x1f2   : > { %v6678_v53 = vmul.f32 %v2503_v60, %v1016_v33  ;;  %v484_v20 = vsub.f32 %v278_v29, %v443_v14  ;;  %v3072_v41 = vmul.f32 %v6398_v24, %v4613_v27  ;;  %v3194_v34 = vmul.f32 %v6583_v39, %v4625_v31  ;;  %v3483_v60 = vld [vmem:[#allocation2 + $0xeb] sm:$0xff]  ;;  %v3484_v44 = vld [vmem:[#allocation2 + $0xf3] sm:$0xff]  ;;  %v4356_v10 = vpop.f32.mrf.mxu1 }
 0x1f3   : > { %v524_v50 = vadd.f32 0.5, %v483_v42  ;;  %v2989_v9 = vadd.f32 %v2948_v56, %v2905_v57  ;;  %v2990_v2 = vadd.f32 %v2949_v8, %v2906_v26  ;;  %v3195_v17 = vmul.f32 %v6585_v23, %v4625_v31 }
 0x1f4   : > { %2585 = vst [vmem:[#allocation2 + $0x118] sm:$0xff] %v6678_v53  ;;  %v525_v38 = vadd.f32 0.5, %v484_v20  ;;  %v3278_v24 = vmul.f32 %v6672_v21, %v4635_v35  ;;  %v3279_v39 = vmul.f32 %v6674_v48, %v4635_v35  ;;  %v3401_v29 = vmul.f32 %v3360_v16, %v4651_v40  ;;  %v6702_v8 = vpop.f32.mrf.mxu1 }
 0x1f5   : > { %v566_v63 = vmul.f32 0.055555556, %v524_v50  ;;  %v3112_v49 = vadd.f32 %v3071_v37, %v2989_v9  ;;  %v3113_v11 = vadd.f32 %v3072_v41, %v2990_v2  ;;  %v3402_v58 = vmul.f32 %v3361_v0, %v4651_v40 }
 0x1f6   : > { %v567_v23 = vmul.f32 0.055555556, %v525_v38  ;;  %v3524_v61 = vmul.f32 %v3483_v60, %v4668_v46  ;;  %v3525_v14 = vmul.f32 %v3484_v44, %v4668_v46  ;;  %v6700_v56 = vadd.s32 280, %v5430_v12  ;;  %v4357_v50 = vpop.f32.mrf.mxu1  ;;  %v6745_v60 = vld [vmem:[#allocation2 + $0xef] sm:$0xff] }
 0x1f7   : > { %v607_v55 = vfloor.f32 %v566_v63  ;;  %v3235_v33 = vadd.f32 %v3194_v34, %v3112_v49  ;;  %v3236_v57 = vadd.f32 %v3195_v17, %v3113_v11  ;;  %v6706_v26 = vadd.f32 %v6375_v54, %v6278_v3 }
 0x1f8   : > { %v608_v37 = vfloor.f32 %v567_v23  ;;  %v279_v16 = vcvt.s32.f32 %v6700_v56  ;;  %v6710_v41 = vadd.s32 288, %v5430_v12  ;;  %v6714_v0 = vadd.f32 %v6375_v54, %v6295_v19  ;;  %v2621_v23 = vld [vmem:[#allocation2 + $0xdd] sm:$0xff] }
 0x1f9   : > { %v648_v9 = vmul.f32 18.0, %v607_v55  ;;  %vm730_vm5 = vcmp.ge.f32.partialorder %v607_v55, 1.0  ;;  %vm771_vm8 = vcmp.le.f32.partialorder %v607_v55, 16.0  ;;  %v3319_v34 = vadd.f32 %v3278_v24, %v3235_v33  ;;  %v2620_v24 = vld [vmem:[#allocation2 + $0xd5] sm:$0xff]  ;;  %v2703_v55 = vld [vmem:[#allocation2 + $0xde] sm:$0xff] }
 0x1fa   : > { %v649_v2 = vmul.f32 18.0, %v608_v37  ;;  %vm731_vm1 = vcmp.ge.f32.partialorder %v608_v37, 1.0  ;;  %vm772_vm10 = vcmp.le.f32.partialorder %v608_v37, 16.0  ;;  %v3320_v3 = vadd.f32 %v3279_v39, %v3236_v57  ;;  %vm6716_vm11 = vmand %vm730_vm5, %vm771_vm8  ;;  %v2702_v56 = vld [vmem:[#allocation2 + $0xd6] sm:$0xff] }
 0x1fb   : > { %v689_v17 = vsub.f32 %v483_v42, %v648_v9  ;;  %v3442_v44 = vadd.f32 %v3401_v29, %v3319_v34  ;;  %v320_v38 = vadd.f32 0.5, %v279_v16  ;;  %v2506_v10 = vmax.f32 %v6706_v26, 0.0  ;;  %vm6725_vm4 = vmand %vm731_vm1, %vm772_vm10  ;;  %v6761_v42 = vld [vmem:[#allocation2 + $0xf9] sm:$0xff] }
 0x1fc   : > { %v690_v19 = vsub.f32 %v484_v20, %v649_v2  ;;  %v3443_v63 = vadd.f32 %v3402_v58, %v3320_v3  ;;  %v280_v49 = vcvt.s32.f32 %v6710_v41  ;;  %v2507_v11 = vmax.f32 %v6714_v0, 0.0  ;;  %v6738_v2 = vld [vmem:[#allocation2 + $0xe7] sm:$0xff] }
 0x1fd   : > { %vm853_vm7 = vcmp.ge.f32.partialorder %v689_v17, 1.0  ;;  %vm935_vm6 = vcmp.le.f32.partialorder %v689_v17, 16.0  ;;  %v3565_v39 = vadd.f32 %v3524_v61, %v3442_v44  ;;  %v362_v29 = vmul.f32 0.0030487804, %v320_v38  ;;  %v3032_v38 = vld [vmem:[#allocation2 + $0xe8] sm:$0xff] }
 0x1fe   : > { %vm894_vm13 = vmand %vm6716_vm11, %vm853_vm7  ;;  %vm854_vm2 = vcmp.ge.f32.partialorder %v690_v19, 1.0  ;;  %vm936_vm3 = vcmp.le.f32.partialorder %v690_v19, 16.0  ;;  %v3566_v20 = vadd.f32 %v3525_v14, %v3443_v63  ;;  %v321_v58 = vadd.f32 0.5, %v280_v49 }
 0x1ff   : > { %vm976_vm9 = vmand %vm894_vm13, %vm935_vm6  ;;  %v403_v33 = vfloor.f32 %v362_v29  ;;  %v2661_v57 = vmul.f32 %v2620_v24, %v4542_v6  ;;  %v2662_v37 = vmul.f32 %v2621_v23, %v4542_v6  ;;  %v2743_v41 = vmul.f32 %v2702_v56, %v4565_v13 }
 0x200   : > { %v1017_v50 = vsel %vm976_vm9, 1.0, %v6650_v32  ;;  %vm895_vm14 = vmand %vm6725_vm4, %vm854_vm2  ;;  %v3594_v61 = vpack.c.bf16 %v3566_v20, %v3565_v39  ;;  %v363_v9 = vmul.f32 0.0030487804, %v321_v58  ;;  %v2744_v34 = vmul.f32 %v2703_v55, %v4565_v13 }
 0x201   : > { %v6742_v14 = vmul.f32 %v2504_v36, %v1017_v50  ;;  %vm977_vm12 = vmand %vm895_vm14, %vm936_vm3  ;;  %v444_v3 = vmul.f32 328.0, %v403_v33  ;;  %v2784_v17 = vadd.f32 %v2743_v41, %v2661_v57  ;;  %v2866_v44 = vmul.f32 %v6642_v1, %v4586_v22  ;;  %v3363_v57 = vld [vmem:[#allocation2 + $0x102] sm:$0xff] }
 0x202   : > { %v1018_v63 = vsel %vm977_vm12, 1.0, %v6650_v32  ;;  %4399 = vmatmul.mubr.bf16.gmra.mxu1 %v3594_v61  ;;  %v404_v24 = vfloor.f32 %v363_v9  ;;  %v2785_v23 = vadd.f32 %v2744_v34, %v2662_v37  ;;  %v2867_v43 = vmul.f32 %v6644_v62, %v4586_v22  ;;  %v3485_v37 = vld [vmem:[#allocation2 + $0xfb] sm:$0xff] }
 0x203   : > { %2586 = vst [vmem:[#allocation2 + $0x120] sm:$0xff] %v6742_v14  ;;  %v6755_v36 = vmul.f32 %v2505_v52, %v1018_v63  ;;  %v485_v19 = vsub.f32 %v279_v16, %v444_v3  ;;  %4402 = vmatprep.mubr.msk.bf16.mxu1 %vm4478_vm0, %v6650_v32  ;;  %v2907_v1 = vadd.f32 %v2866_v44, %v2784_v17  ;;  %v3362_v52 = vld [vmem:[#allocation2 + $0xfa] sm:$0xff]  ;;  %v3486_v3 = vld [vmem:[#allocation2 + $0x103] sm:$0xff] }
 0x204   : > { %v2950_v56 = vmul.f32 %v6738_v2, %v4599_v25  ;;  %v445_v39 = vmul.f32 328.0, %v404_v24  ;;  %v2908_v29 = vadd.f32 %v2867_v43, %v2785_v23  ;;  %v2951_v62 = vmul.f32 %v6745_v60, %v4599_v25  ;;  %v6773_v41 = vpop.f32.mrf.mxu1 }
 0x205   : > { %v3073_v55 = vmul.f32 %v3032_v38, %v4613_v27  ;;  %2587 = vst [vmem:[#allocation2 + $0x128] sm:$0xff] %v6755_v36  ;;  %v526_v16 = vadd.f32 0.5, %v485_v19  ;;  %v3074_v58 = vmul.f32 %v6485_v4, %v4613_v27  ;;  %v3196_v33 = vmul.f32 %v6672_v21, %v4625_v31 }
 0x206   : > { %v2991_v20 = vadd.f32 %v2950_v56, %v2907_v1  ;;  %v486_v50 = vsub.f32 %v280_v49, %v445_v39  ;;  %v2992_v61 = vadd.f32 %v2951_v62, %v2908_v29  ;;  %v3197_v9 = vmul.f32 %v6674_v48, %v4625_v31  ;;  %v4360_v38 = vpop.f32.mrf.mxu1 }
 0x207   : > { %v3280_v34 = vmul.f32 %v6761_v42, %v4635_v35  ;;  %v568_v17 = vmul.f32 0.055555556, %v526_v16  ;;  %v3281_v4 = vmul.f32 %v6766_v59, %v4635_v35  ;;  %v3403_v21 = vmul.f32 %v3362_v52, %v4651_v40  ;;  %v2623_v38 = vld [vmem:[#allocation2 + $0xed] sm:$0xff] }
 0x208   : > { %v3114_v44 = vadd.f32 %v3073_v55, %v2991_v20  ;;  %v527_v63 = vadd.f32 0.5, %v486_v50  ;;  %v3115_v24 = vadd.f32 %v3074_v58, %v2992_v61  ;;  %v3404_v49 = vmul.f32 %v3363_v57, %v4651_v40  ;;  %v6788_v39 = vpop.f32.mrf.mxu1 }
 0x209   : > { %v3526_v23 = vmul.f32 %v3485_v37, %v4668_v46  ;;  %v609_v43 = vfloor.f32 %v568_v17  ;;  %v3527_v1 = vmul.f32 %v3486_v3, %v4668_v46  ;;  %v6786_v56 = vadd.s32 296, %v5430_v12  ;;  %v6807_v17 = vld [vmem:[%s7271_s3] ss:$0 sm:$0xff] }
 0x20a   : > { %v3237_v48 = vadd.f32 %v3196_v33, %v3114_v44  ;;  %v569_v29 = vmul.f32 0.055555556, %v527_v63  ;;  %v3238_v62 = vadd.f32 %v3197_v9, %v3115_v24  ;;  %v6792_v55 = vadd.f32 %v6375_v54, %v6343_v45  ;;  %v4361_v58 = vpop.f32.mrf.mxu1  ;;  %v2704_v63 = vld [vmem:[#allocation2 + $0xe6] sm:$0xff] }
 0x20b   : > { %v6795_v52 = vadd.s32 304, %v5430_v12  ;;  %v650_v16 = vmul.f32 18.0, %v609_v43  ;;  %vm732_vm15 = vcmp.ge.f32.partialorder %v609_v43, 1.0  ;;  %vm773_vm5 = vcmp.le.f32.partialorder %v609_v43, 16.0  ;;  %v6825_v58 = vld [vmem:[#allocation2 + $0xf7] sm:$0xff] }
 0x20c   : > { %v3321_v20 = vadd.f32 %v3280_v34, %v3237_v48  ;;  %v610_v33 = vfloor.f32 %v569_v29  ;;  %v3322_v57 = vadd.f32 %v3281_v4, %v3238_v62  ;;  %v281_v37 = vcvt.s32.f32 %v6786_v56  ;;  %vm6799_vm8 = vmand %vm732_vm15, %vm773_vm5  ;;  %v2622_v4 = vld [vmem:[#allocation2 + $0xe5] sm:$0xff]  ;;  %v2705_v29 = vld [vmem:[#allocation2 + $0xee] sm:$0xff] }
 0x20d   : > { %v2508_v61 = vmax.f32 %v6792_v55, 0.0  ;;  %v691_v3 = vsub.f32 %v485_v19, %v650_v16  ;;  %v282_v54 = vcvt.s32.f32 %v6795_v52  ;;  %v6811_v34 = vadd.f32 %v6807_v17, %v6364_v15 }
 0x20e   : > { %v3444_v45 = vadd.f32 %v3403_v21, %v3321_v20  ;;  %v651_v44 = vmul.f32 18.0, %v610_v33  ;;  %vm733_vm1 = vcmp.ge.f32.partialorder %v610_v33, 1.0  ;;  %vm774_vm10 = vcmp.le.f32.partialorder %v610_v33, 16.0 }
 0x20f   : > { %v3445_v19 = vadd.f32 %v3404_v49, %v3322_v57  ;;  %vm855_vm11 = vcmp.ge.f32.partialorder %v691_v3, 1.0  ;;  %vm937_vm7 = vcmp.le.f32.partialorder %v691_v3, 16.0  ;;  %vm6813_vm6 = vmand %vm733_vm1, %vm774_vm10  ;;  %v322_v43 = vadd.f32 0.5, %v281_v37 }
 0x210   : > { %v3567_v24 = vadd.f32 %v3526_v23, %v3444_v45  ;;  %vm896_vm4 = vmand %vm6799_vm8, %vm855_vm11  ;;  %v692_v15 = vsub.f32 %v486_v50, %v651_v44  ;;  %v323_v56 = vadd.f32 0.5, %v282_v54  ;;  %v2663_v16 = vmul.f32 %v2622_v4, %v4542_v6  ;;  %v6835_v45 = vld [vmem:[#allocation2 + $0xff] sm:$0xff] }
 0x211   : > { %v3568_v48 = vadd.f32 %v3527_v1, %v3445_v19  ;;  %vm978_vm13 = vmand %vm896_vm4, %vm937_vm7  ;;  %v364_v62 = vmul.f32 0.0030487804, %v322_v43  ;;  %v2664_v20 = vmul.f32 %v2623_v38, %v4542_v6  ;;  %v2745_v23 = vmul.f32 %v2704_v63, %v4565_v13  ;;  %v3034_v44 = vld [vmem:[#allocation2 + $0xf8] sm:$0xff]  ;;  %v6847_v43 = vld [vmem:[#allocation2 + $0x109] sm:$0xff] }
 0x212   : > { %v1019_v33 = vsel %vm978_vm13, 1.0, %v6650_v32  ;;  %vm856_vm2 = vcmp.ge.f32.partialorder %v692_v15, 1.0  ;;  %vm938_vm3 = vcmp.le.f32.partialorder %v692_v15, 16.0  ;;  %v365_v3 = vmul.f32 0.0030487804, %v323_v56  ;;  %v6856_v56 = vld [vmem:[#allocation2 + $0x111] sm:$0xff] }
 0x213   : > { %v3595_v50 = vpack.c.bf16 %v3568_v48, %v3567_v24  ;;  %v6830_v1 = vmul.f32 %v2506_v10, %v1019_v33  ;;  %vm897_vm9 = vmand %vm6813_vm6, %vm856_vm2  ;;  %v405_v57 = vfloor.f32 %v364_v62  ;;  %v2746_v9 = vmul.f32 %v2705_v29, %v4565_v13  ;;  %v3365_v33 = vld [vmem:[#allocation2 + $0x112] sm:$0xff] }
 0x214   : > { %vm979_vm14 = vmand %vm897_vm9, %vm938_vm3  ;;  %v2786_v19 = vadd.f32 %v2745_v23, %v2663_v16  ;;  %v2868_v4 = vmul.f32 %v6738_v2, %v4586_v22  ;;  %v2869_v26 = vmul.f32 %v6745_v60, %v4586_v22  ;;  %v2952_v10 = vmul.f32 %v6825_v58, %v4599_v25  ;;  %v3364_v23 = vld [vmem:[#allocation2 + $0x10a] sm:$0xff] }
 0x215   : > { %4403 = vmatmul.mubr.bf16.gmra.mxu1 %v3595_v50  ;;  %2588 = vst [vmem:[#allocation2 + $0x130] sm:$0xff] %v6830_v1  ;;  %v1020_v38 = vsel %vm979_vm14, 1.0, %v6650_v32  ;;  %v446_v63 = vmul.f32 328.0, %v405_v57  ;;  %v406_v21 = vfloor.f32 %v365_v3  ;;  %v2787_v24 = vadd.f32 %v2746_v9, %v2664_v20  ;;  %v3487_v50 = vld [vmem:[#allocation2 + $0x10b] sm:$0xff]  ;;  %v3488_v3 = vld [vmem:[#allocation2 + $0x113] sm:$0xff] }
 0x216   : > { %4406 = vmatprep.mubr.msk.bf16.mxu1 %vm4478_vm0, %v6650_v32  ;;  %v6851_v2 = vmul.f32 %v2507_v11, %v1020_v38  ;;  %v2909_v60 = vadd.f32 %v2868_v4, %v2786_v19  ;;  %v2953_v15 = vmul.f32 %v6835_v45, %v4599_v25  ;;  %v3075_v48 = vmul.f32 %v3034_v44, %v4613_v27 }
 0x217   : > { %v487_v29 = vsub.f32 %v281_v37, %v446_v63  ;;  %v447_v62 = vmul.f32 328.0, %v406_v21  ;;  %v2910_v16 = vadd.f32 %v2869_v26, %v2787_v24  ;;  %v3076_v20 = vmul.f32 %v6562_v51, %v4613_v27  ;;  %v6867_v9 = vpop.f32.mrf.mxu1 }
 0x218   : > { %2589 = vst [vmem:[#allocation2 + $0x138] sm:$0xff] %v6851_v2  ;;  %v2993_v0 = vadd.f32 %v2952_v10, %v2909_v60  ;;  %v3198_v11 = vmul.f32 %v6761_v42, %v4625_v31  ;;  %v3199_v57 = vmul.f32 %v6766_v59, %v4625_v31  ;;  %v3282_v37 = vmul.f32 %v6847_v43, %v4635_v35 }
 0x219   : > { %v528_v44 = vadd.f32 0.5, %v487_v29  ;;  %v488_v51 = vsub.f32 %v282_v54, %v447_v62  ;;  %v2994_v19 = vadd.f32 %v2953_v15, %v2910_v16  ;;  %v3283_v4 = vmul.f32 %v6856_v56, %v4635_v35  ;;  %v4364_v38 = vpop.f32.mrf.mxu1 }
 0x21a   : > { %v3116_v26 = vadd.f32 %v3075_v48, %v2993_v0  ;;  %v3405_v42 = vmul.f32 %v3364_v23, %v4651_v40  ;;  %v3406_v10 = vmul.f32 %v3365_v33, %v4651_v40  ;;  %v3528_v59 = vmul.f32 %v3487_v50, %v4668_v46 }
 0x21b   : > { %v570_v63 = vmul.f32 0.055555556, %v528_v44  ;;  %v529_v21 = vadd.f32 0.5, %v488_v51  ;;  %v3117_v24 = vadd.f32 %v3076_v20, %v2994_v19  ;;  %v3529_v60 = vmul.f32 %v3488_v3, %v4668_v46  ;;  %v6887_v48 = vpop.f32.mrf.mxu1 }
 0x21c   : > { %v3239_v49 = vadd.f32 %v3198_v11, %v3116_v26  ;;  %v6878_v52 = vadd.s32 312, %v5430_v12  ;;  %v6882_v54 = vadd.f32 %v6807_v17, %v6423_v5  ;;  %v6885_v15 = vadd.s32 320, %v5430_v12 }
 0x21d   : > { %v611_v62 = vfloor.f32 %v570_v63  ;;  %v571_v16 = vmul.f32 0.055555556, %v529_v21  ;;  %v3240_v23 = vadd.f32 %v3199_v57, %v3117_v24  ;;  %v6891_v20 = vadd.f32 %v6807_v17, %v6442_v47  ;;  %v4365_v11 = vpop.f32.mrf.mxu1  ;;  %v3036_v47 = vld [vmem:[#allocation2 + $0x108] sm:$0xff] }
 0x21e   : > { %v3323_v33 = vadd.f32 %v3282_v37, %v3239_v49  ;;  %v283_v50 = vcvt.s32.f32 %v6878_v52  ;;  %v2510_v0 = vmax.f32 %v6882_v54, 0.0  ;;  %v284_v5 = vcvt.s32.f32 %v6885_v15  ;;  %v2624_v49 = vld [vmem:[#allocation2 + $0xf5] sm:$0xff]  ;;  %v2625_v52 = vld [vmem:[#allocation2 + $0xfd] sm:$0xff] }
 0x21f   : > { %v652_v3 = vmul.f32 18.0, %v611_v62  ;;  %vm734_vm12 = vcmp.ge.f32.partialorder %v611_v62, 1.0  ;;  %vm775_vm15 = vcmp.le.f32.partialorder %v611_v62, 16.0  ;;  %v612_v12 = vfloor.f32 %v571_v16  ;;  %v2706_v15 = vld [vmem:[#allocation2 + $0xf6] sm:$0xff] }
 0x220   : > { %v3324_v44 = vadd.f32 %v3283_v4, %v3240_v23  ;;  %v3446_v19 = vadd.f32 %v3405_v42, %v3323_v33  ;;  %v324_v26 = vadd.f32 0.5, %v283_v50  ;;  %v325_v57 = vadd.f32 0.5, %v284_v5  ;;  %vm6896_vm5 = vmand %vm734_vm12, %vm775_vm15  ;;  %v2628_v54 = vld [vmem:[#allocation2 + $0x115] sm:$0xff] }
 0x221   : > { %v693_v38 = vsub.f32 %v487_v29, %v652_v3  ;;  %v653_v17 = vmul.f32 18.0, %v612_v12  ;;  %vm735_vm8 = vcmp.ge.f32.partialorder %v612_v12, 1.0  ;;  %vm776_vm1 = vcmp.le.f32.partialorder %v612_v12, 16.0 }
 0x222   : > { %v3447_v37 = vadd.f32 %v3406_v10, %v3324_v44  ;;  %v3569_v63 = vadd.f32 %v3528_v59, %v3446_v19  ;;  %v366_v21 = vmul.f32 0.0030487804, %v324_v26  ;;  %v367_v24 = vmul.f32 0.0030487804, %v325_v57  ;;  %vm817_vm7 = vmand %vm735_vm8, %vm776_vm1  ;;  %v2707_v10 = vld [vmem:[#allocation2 + $0xfe] sm:$0xff]  ;;  %v6907_v44 = vld [vmem:[#allocation2 + $0x107] sm:$0xff] }
 0x223   : > { %vm857_vm10 = vcmp.ge.f32.partialorder %v693_v38, 1.0  ;;  %vm939_vm11 = vcmp.le.f32.partialorder %v693_v38, 16.0  ;;  %v694_v4 = vsub.f32 %v488_v51, %v653_v17  ;;  %v2511_v29 = vmax.f32 %v6891_v20, 0.0  ;;  %v6914_v57 = vld [vmem:[#allocation2 + $0x10f] sm:$0xff] }
 0x224   : > { %vm898_vm6 = vmand %vm6896_vm5, %vm857_vm10  ;;  %v3570_v42 = vadd.f32 %v3529_v60, %v3447_v37  ;;  %v407_v62 = vfloor.f32 %v366_v21  ;;  %v408_v16 = vfloor.f32 %v367_v24  ;;  %v2665_v23 = vmul.f32 %v2624_v49, %v4542_v6 }
 0x225   : > { %vm980_vm4 = vmand %vm898_vm6, %vm939_vm11  ;;  %vm858_vm13 = vcmp.ge.f32.partialorder %v694_v4, 1.0  ;;  %vm940_vm2 = vcmp.le.f32.partialorder %v694_v4, 16.0  ;;  %v2666_v59 = vmul.f32 %v2625_v52, %v4542_v6  ;;  %v2747_v33 = vmul.f32 %v2706_v15, %v4565_v13  ;;  %v6930_v52 = vld [vmem:[#allocation2 + $0x119] sm:$0xff] }
 0x226   : > { %v1021_v51 = vsel %vm980_vm4, 1.0, %v6650_v32  ;;  %vm899_vm3 = vmand %vm817_vm7, %vm858_vm13  ;;  %v3596_v11 = vpack.c.bf16 %v3570_v42, %v3569_v63  ;;  %v448_v3 = vmul.f32 328.0, %v407_v62  ;;  %v449_v12 = vmul.f32 328.0, %v408_v16  ;;  %v3366_v4 = vld [vmem:[#allocation2 + $0x11a] sm:$0xff] }
 0x227   : > { %v6911_v60 = vmul.f32 %v2508_v61, %v1021_v51  ;;  %vm981_vm9 = vmand %vm899_vm3, %vm940_vm2  ;;  %v2748_v19 = vmul.f32 %v2707_v10, %v4565_v13  ;;  %v2788_v26 = vadd.f32 %v2747_v33, %v2665_v23  ;;  %v2870_v38 = vmul.f32 %v6825_v58, %v4586_v22  ;;  %v3367_v10 = vld [vmem:[#allocation2 + $0x122] sm:$0xff] }
 0x228   : > { %v1022_v17 = vsel %vm981_vm9, 1.0, %v6650_v32  ;;  %4407 = vmatmul.mubr.bf16.gmra.mxu1 %v3596_v11  ;;  %v489_v49 = vsub.f32 %v283_v50, %v448_v3  ;;  %v490_v37 = vsub.f32 %v284_v5, %v449_v12  ;;  %v2871_v55 = vmul.f32 %v6835_v45, %v4586_v22  ;;  %v3490_v12 = vld [vmem:[#allocation2 + $0x123] sm:$0xff] }
 0x229   : > { %2590 = vst [vmem:[#allocation2 + $0x140] sm:$0xff] %v6911_v60  ;;  %v7454_v61 = vmax.f32 %v6811_v34, 0.0  ;;  %4410 = vmatprep.mubr.msk.bf16.mxu1 %vm4478_vm0, %v6650_v32  ;;  %v2789_v21 = vadd.f32 %v2748_v19, %v2666_v59  ;;  %v2911_v58 = vadd.f32 %v2870_v38, %v2788_v26  ;;  %v2954_v24 = vmul.f32 %v6907_v44, %v4599_v25  ;;  %v6935_v34 = vld [vmem:[#allocation2 + $0x121] sm:$0xff] }
 0x22a   : > { %v530_v50 = vadd.f32 0.5, %v489_v49  ;;  %v531_v5 = vadd.f32 0.5, %v490_v37  ;;  %v2955_v45 = vmul.f32 %v6914_v57, %v4599_v25  ;;  %v3077_v15 = vmul.f32 %v3036_v47, %v4613_v27  ;;  %v3489_v59 = vld [vmem:[#allocation2 + $0x11b] sm:$0xff]  ;;  %v2626_v19 = vld [vmem:[#allocation2 + $0x105] sm:$0xff] }
 0x22b   : > { %v6924_v63 = vmul.f32 %v7454_v61, %v1022_v17  ;;  %v2912_v42 = vadd.f32 %v2871_v55, %v2789_v21  ;;  %v2995_v62 = vadd.f32 %v2954_v24, %v2911_v58  ;;  %v3078_v16 = vmul.f32 %v6657_v7, %v4613_v27 }
 0x22c   : > { %v3200_v23 = vmul.f32 %v6847_v43, %v4625_v31  ;;  %v572_v33 = vmul.f32 0.055555556, %v530_v50  ;;  %v573_v51 = vmul.f32 0.055555556, %v531_v5  ;;  %v3201_v11 = vmul.f32 %v6856_v56, %v4625_v31  ;;  %v6949_v43 = vpop.f32.mrf.mxu1  ;;  %v2627_v50 = vld [vmem:[#allocation2 + $0x10d] sm:$0xff] }
 0x22d   : > { %2591 = vst [vmem:[#allocation2 + $0x148] sm:$0xff] %v6924_v63  ;;  %v3284_v3 = vmul.f32 %v6930_v52, %v4635_v35  ;;  %v2996_v26 = vadd.f32 %v2955_v45, %v2912_v42  ;;  %v3118_v38 = vadd.f32 %v3077_v15, %v2995_v62  ;;  %v3285_v7 = vmul.f32 %v6935_v34, %v4635_v35  ;;  %v2708_v45 = vld [vmem:[#allocation2 + $0x106] sm:$0xff]  ;;  %v2709_v62 = vld [vmem:[#allocation2 + $0x10e] sm:$0xff] }
 0x22e   : > { %v3407_v47 = vmul.f32 %v3366_v4, %v4651_v40  ;;  %v613_v17 = vfloor.f32 %v572_v33  ;;  %v614_v55 = vfloor.f32 %v573_v51  ;;  %v3408_v61 = vmul.f32 %v3367_v10, %v4651_v40  ;;  %v4368_v15 = vpop.f32.mrf.mxu1 }
 0x22f   : > { %v3530_v56 = vmul.f32 %v3489_v59, %v4668_v46  ;;  %v3119_v21 = vadd.f32 %v3078_v16, %v2996_v26  ;;  %v3241_v58 = vadd.f32 %v3200_v23, %v3118_v38  ;;  %v3531_v24 = vmul.f32 %v3490_v12, %v4668_v46  ;;  %v6964_v15 = vld [vmem:[#allocation2 + $0x117] sm:$0xff] }
 0x230   : > { %v2667_v5 = vmul.f32 %v2626_v19, %v4542_v6  ;;  %v654_v42 = vmul.f32 18.0, %v613_v17  ;;  %vm736_vm14 = vcmp.ge.f32.partialorder %v613_v17, 1.0  ;;  %vm777_vm12 = vcmp.le.f32.partialorder %v613_v17, 16.0  ;;  %v6955_v51 = vpop.f32.mrf.mxu1 }
 0x231   : > { %v655_v4 = vmul.f32 18.0, %v614_v55  ;;  %vm737_vm15 = vcmp.ge.f32.partialorder %v614_v55, 1.0  ;;  %vm778_vm5 = vcmp.le.f32.partialorder %v614_v55, 16.0  ;;  %v3242_v33 = vadd.f32 %v3201_v11, %v3119_v21  ;;  %vm6957_vm8 = vmand %vm736_vm14, %vm777_vm12  ;;  %v6966_v11 = vld [vmem:[#allocation2 + $0x11f] sm:$0xff] }
 0x232   : > { %v3325_v10 = vadd.f32 %v3284_v3, %v3241_v58  ;;  %v695_v16 = vsub.f32 %v489_v49, %v654_v42  ;;  %v2668_v12 = vmul.f32 %v2627_v50, %v4542_v6  ;;  %v2749_v19 = vmul.f32 %v2708_v45, %v4565_v13  ;;  %v4369_v3 = vpop.f32.mrf.mxu1  ;;  %vm6972_vm11 = vmand %vm737_vm15, %vm778_vm5  ;;  %v3163_v42 = vld [vmem:[#allocation2 + $0x129] sm:$0xff] }
 0x233   : > { %v696_v59 = vsub.f32 %v490_v37, %v655_v4  ;;  %v3326_v26 = vadd.f32 %v3285_v7, %v3242_v33  ;;  %v2750_v17 = vmul.f32 %v2709_v62, %v4565_v13  ;;  %v2872_v49 = vmul.f32 %v6907_v44, %v4586_v22  ;;  %v3368_v4 = vld [vmem:[#allocation2 + $0x12a] sm:$0xff]  ;;  %v2711_v3 = vld [vmem:[#allocation2 + $0x11e] sm:$0xff] }
 0x234   : > { %v3448_v38 = vadd.f32 %v3407_v47, %v3325_v10  ;;  %vm859_vm1 = vcmp.ge.f32.partialorder %v695_v16, 1.0  ;;  %vm941_vm10 = vcmp.le.f32.partialorder %v695_v16, 16.0  ;;  %v2790_v21 = vadd.f32 %v2749_v19, %v2667_v5  ;;  %v3164_v62 = vld [vmem:[#allocation2 + $0x131] sm:$0xff] }
 0x235   : > { %vm860_vm7 = vcmp.ge.f32.partialorder %v696_v59, 1.0  ;;  %vm942_vm6 = vcmp.le.f32.partialorder %v696_v59, 16.0  ;;  %vm900_vm4 = vmand %vm6957_vm8, %vm859_vm1  ;;  %v3449_v7 = vadd.f32 %v3408_v61, %v3326_v26  ;;  %v2791_v58 = vadd.f32 %v2750_v17, %v2668_v12  ;;  %v3491_v33 = vld [vmem:[#allocation2 + $0x12b] sm:$0xff]  ;;  %v3492_v12 = vld [vmem:[#allocation2 + $0x133] sm:$0xff] }
 0x236   : > { %v3571_v47 = vadd.f32 %v3530_v56, %v3448_v38  ;;  %vm982_vm13 = vmand %vm900_vm4, %vm941_vm10  ;;  %v2873_v44 = vmul.f32 %v6914_v57, %v4586_v22  ;;  %v2956_v55 = vmul.f32 %v6964_v15, %v4599_v25  ;;  %v2957_v50 = vmul.f32 %v6966_v11, %v4599_v25  ;;  %v2710_v17 = vld [vmem:[#allocation2 + $0x116] sm:$0xff] }
 0x237   : > { %v3079_v45 = vmul.f32 %v6678_v53, %v4613_v27  ;;  %v1023_v61 = vsel %vm982_vm13, 1.0, %v6650_v32  ;;  %vm901_vm2 = vmand %vm6972_vm11, %vm860_vm7  ;;  %v3572_v56 = vadd.f32 %v3531_v24, %v3449_v7  ;;  %v2913_v5 = vadd.f32 %v2872_v49, %v2790_v21  ;;  %v3369_v24 = vld [vmem:[#allocation2 + $0x132] sm:$0xff] }
 0x238   : > { %v3080_v57 = vmul.f32 %v6742_v14, %v4613_v27  ;;  %v6994_v10 = vmul.f32 %v2510_v0, %v1023_v61  ;;  %vm983_vm3 = vmand %vm901_vm2, %vm942_vm6  ;;  %v2914_v53 = vadd.f32 %v2873_v44, %v2791_v58  ;;  %v3202_v16 = vmul.f32 %v6930_v52, %v4625_v31  ;;  %v2629_v0 = vld [vmem:[#allocation2 + $0x11d] sm:$0xff]  ;;  %v2835_v58 = vld [vmem:[#allocation2 + $0x127] sm:$0xff] }
 0x239   : > { %v3203_v23 = vmul.f32 %v6935_v34, %v4625_v31  ;;  %v1024_v19 = vsel %vm983_vm3, 1.0, %v6650_v32  ;;  %v3597_v14 = vpack.c.bf16 %v3572_v56, %v3571_v47  ;;  %v2997_v26 = vadd.f32 %v2956_v55, %v2913_v5  ;;  %v2836_v44 = vld [vmem:[#allocation2 + $0x12f] sm:$0xff] }
 0x23a   : > { %v3286_v38 = vmul.f32 %v3163_v42, %v4635_v35  ;;  %2592 = vst [vmem:[#allocation2 + $0x150] sm:$0xff] %v6994_v10  ;;  %v7006_v59 = vmul.f32 %v2511_v29, %v1024_v19  ;;  %v2998_v52 = vadd.f32 %v2957_v50, %v2914_v53  ;;  %v3287_v34 = vmul.f32 %v3164_v62, %v4635_v35  ;;  %v3165_v53 = vld [vmem:[#allocation2 + $0x139] sm:$0xff] }
 0x23b   : > { %v3409_v49 = vmul.f32 %v3368_v4, %v4651_v40  ;;  %4411 = vmatmul.mubr.bf16.gmra.mxu1 %v3597_v14  ;;  %v3120_v37 = vadd.f32 %v3079_v45, %v2997_v26  ;;  %v3410_v7 = vmul.f32 %v3369_v24, %v4651_v40  ;;  %v3532_v47 = vmul.f32 %v3491_v33, %v4668_v46  ;;  %v7026_v24 = vld [vmem:[#allocation2 + $0x141] sm:$0xff] }
 0x23c   : > { %v3533_v21 = vmul.f32 %v3492_v12, %v4668_v46  ;;  %2593 = vst [vmem:[#allocation2 + $0x158] sm:$0xff] %v7006_v59  ;;  %4414 = vmatprep.mubr.msk.bf16.mxu1 %vm4478_vm0, %v6650_v32  ;;  %v3121_v20 = vadd.f32 %v3080_v57, %v2998_v52  ;;  %v2669_v29 = vmul.f32 %v2628_v54, %v4542_v6  ;;  %v3493_v52 = vld [vmem:[#allocation2 + $0x13b] sm:$0xff] }
 0x23d   : > { %v2670_v55 = vmul.f32 %v2629_v0, %v4542_v6  ;;  %v2751_v50 = vmul.f32 %v2710_v17, %v4565_v13  ;;  %v3243_v45 = vadd.f32 %v3202_v16, %v3120_v37  ;;  %v2752_v4 = vmul.f32 %v2711_v3, %v4565_v13  ;;  %v7028_v12 = vpop.f32.mrf.mxu1  ;;  %v3494_v3 = vld [vmem:[#allocation2 + $0x143] sm:$0xff] }
 0x23e   : > { %v2874_v61 = vmul.f32 %v6964_v15, %v4586_v22  ;;  %v2875_v56 = vmul.f32 %v6966_v11, %v4586_v22  ;;  %v3244_v5 = vadd.f32 %v3203_v23, %v3121_v20  ;;  %v2958_v32 = vmul.f32 %v2835_v58, %v4599_v25  ;;  %v3370_v11 = vld [vmem:[#allocation2 + $0x13a] sm:$0xff]  ;;  %v3371_v23 = vld [vmem:[#allocation2 + $0x142] sm:$0xff] }
 0x23f   : > { %v2792_v33 = vadd.f32 %v2751_v50, %v2669_v29  ;;  %v2959_v57 = vmul.f32 %v2836_v44, %v4599_v25  ;;  %v3327_v16 = vadd.f32 %v3286_v38, %v3243_v45  ;;  %v2793_v19 = vadd.f32 %v2752_v4, %v2670_v55  ;;  %v4372_v37 = vpop.f32.mrf.mxu1  ;;  %v2630_v55 = vld [vmem:[#allocation2 + $0x125] sm:$0xff] }
 0x240   : > { %v3081_v14 = vmul.f32 %v6755_v36, %v4613_v27  ;;  %v3082_v15 = vmul.f32 %v6830_v1, %v4613_v27  ;;  %v3328_v26 = vadd.f32 %v3287_v34, %v3244_v5  ;;  %v3204_v0 = vmul.f32 %v3163_v42, %v4625_v31  ;;  %v2631_v1 = vld [vmem:[#allocation2 + $0x12d] sm:$0xff] }
 0x241   : > { %v2915_v54 = vadd.f32 %v2874_v61, %v2792_v33  ;;  %v3205_v17 = vmul.f32 %v3164_v62, %v4625_v31  ;;  %v3450_v20 = vadd.f32 %v3409_v49, %v3327_v16  ;;  %v2916_v38 = vadd.f32 %v2875_v56, %v2793_v19  ;;  %v2712_v4 = vld [vmem:[#allocation2 + $0x126] sm:$0xff]  ;;  %v2713_v62 = vld [vmem:[#allocation2 + $0x12e] sm:$0xff]  ;;  %v7041_v61 = vpop.f32.mrf.mxu1  ;;  %v2837_v16 = vld [vmem:[#allocation2 + $0x137] sm:$0xff] }
 0x242   : > { %v3288_v29 = vmul.f32 %v3165_v53, %v4635_v35  ;;  %v3289_v36 = vmul.f32 %v7026_v24, %v4635_v35  ;;  %v3451_v50 = vadd.f32 %v3410_v7, %v3328_v26  ;;  %v3411_v34 = vmul.f32 %v3370_v11, %v4651_v40  ;;  %7459 = vst [vmem:[#allocation44_spill] sm:$0xff] %v7041_v61  ;;  %v2838_v11 = vld [vmem:[#allocation2 + $0x13f] sm:$0xff] }
 0x243   : > { %v2999_v45 = vadd.f32 %v2958_v32, %v2915_v54  ;;  %v3412_v42 = vmul.f32 %v3371_v23, %v4651_v40  ;;  %v3573_v5 = vadd.f32 %v3532_v47, %v3450_v20  ;;  %v3000_v49 = vadd.f32 %v2959_v57, %v2916_v38  ;;  %v4373_v26 = vpop.f32.mrf.mxu1 }
 0x244   : > { %v3534_v56 = vmul.f32 %v3493_v52, %v4668_v46  ;;  %v3535_v33 = vmul.f32 %v3494_v3, %v4668_v46  ;;  %v3574_v19 = vadd.f32 %v3533_v21, %v3451_v50  ;;  %v2671_v7 = vmul.f32 %v2630_v55, %v4542_v6  ;;  %v7053_v50 = vld [vmem:[#allocation2 + $0x151] sm:$0xff] }
 0x245   : > { %v3122_v37 = vadd.f32 %v3081_v14, %v2999_v45  ;;  %v2672_v32 = vmul.f32 %v2631_v1, %v4542_v6  ;;  %v3123_v23 = vadd.f32 %v3082_v15, %v3000_v49  ;;  %v2753_v54 = vmul.f32 %v2712_v4, %v4565_v13  ;;  %v3167_v1 = vld [vmem:[#allocation2 + $0x149] sm:$0xff]  ;;  %v3373_v4 = vld [vmem:[#allocation2 + $0x152] sm:$0xff] }
 0x246   : > { %v2754_v61 = vmul.f32 %v2713_v62, %v4565_v13  ;;  %v2876_v47 = vmul.f32 %v2835_v58, %v4586_v22  ;;  %v3598_v57 = vpack.c.bf16 %v3574_v19, %v3573_v5  ;;  %v2877_v3 = vmul.f32 %v2836_v44, %v4586_v22  ;;  %v3372_v15 = vld [vmem:[#allocation2 + $0x14a] sm:$0xff]  ;;  %v3496_v19 = vld [vmem:[#allocation2 + $0x153] sm:$0xff] }
 0x247   : > { %v3245_v52 = vadd.f32 %v3204_v0, %v3122_v37  ;;  %v2960_v21 = vmul.f32 %v2837_v16, %v4599_v25  ;;  %v3246_v14 = vadd.f32 %v3205_v17, %v3123_v23  ;;  %v2794_v20 = vadd.f32 %v2753_v54, %v2671_v7  ;;  %v7060_v17 = vld [vmem:[#allocation2] sm:$0xff]  ;;  %v3495_v49 = vld [vmem:[#allocation2 + $0x14b] sm:$0xff] }
 0x248   : > { %v2795_v38 = vadd.f32 %v2754_v61, %v2672_v32  ;;  %v2961_v55 = vmul.f32 %v2838_v11, %v4599_v25  ;;  %4415 = vmatmul.mubr.bf16.gmra.mxu1 %v3598_v57  ;;  %v3083_v58 = vmul.f32 %v6851_v2, %v4613_v27  ;;  %v3084_v0 = vmul.f32 %v6911_v60, %v4613_v27  ;;  %v2632_v2 = vld [vmem:[#allocation2 + $0x135] sm:$0xff]  ;;  %v2633_v32 = vld [vmem:[#allocation2 + $0x13d] sm:$0xff] }
 0x249   : > { %v3329_v45 = vadd.f32 %v3288_v29, %v3245_v52  ;;  %v3206_v44 = vmul.f32 %v3165_v53, %v4625_v31  ;;  %4418 = vmatprep.mubr.msk.bf16.mxu1 %vm4478_vm0, %v7060_v17  ;;  %v3330_v62 = vadd.f32 %v3289_v36, %v3246_v14  ;;  %v2917_v61 = vadd.f32 %v2876_v47, %v2794_v20  ;;  %v2714_v47 = vld [vmem:[#allocation2 + $0x136] sm:$0xff]  ;;  %v2715_v57 = vld [vmem:[#allocation2 + $0x13e] sm:$0xff]  ;;  %v2839_v14 = vld [vmem:[#allocation2 + $0x147] sm:$0xff] }
 0x24a   : > { %v2918_v5 = vadd.f32 %v2877_v3, %v2795_v38  ;;  %v3207_v29 = vmul.f32 %v7026_v24, %v4625_v31  ;;  %v3290_v60 = vmul.f32 %v3167_v1, %v4635_v35  ;;  %v3291_v53 = vmul.f32 %v7053_v50, %v4635_v35 }
 0x24b   : > { %v3452_v37 = vadd.f32 %v3411_v34, %v3329_v45  ;;  %v3413_v7 = vmul.f32 %v3372_v15, %v4651_v40  ;;  %v3453_v26 = vadd.f32 %v3412_v42, %v3330_v62  ;;  %v3001_v23 = vadd.f32 %v2960_v21, %v2917_v61  ;;  %v2922_v42 = vld [vmem:[#allocation2 + $0x14f] sm:$0xff] }
 0x24c   : > { %v3002_v36 = vadd.f32 %v2961_v55, %v2918_v5  ;;  %v3414_v54 = vmul.f32 %v3373_v4, %v4651_v40  ;;  %v3536_v52 = vmul.f32 %v3495_v49, %v4668_v46  ;;  %v3537_v34 = vmul.f32 %v3496_v19, %v4668_v46  ;;  %v3169_v19 = vld [vmem:[#allocation2 + $0x159] sm:$0xff] }
 0x24d   : > { %v3575_v24 = vadd.f32 %v3534_v56, %v3452_v37  ;;  %v2673_v3 = vmul.f32 %v2632_v2, %v4542_v6  ;;  %v3576_v20 = vadd.f32 %v3535_v33, %v3453_v26  ;;  %v3124_v38 = vadd.f32 %v3083_v58, %v3001_v23  ;;  %v3252_v37 = vld [vmem:[#allocation2 + $0x161] sm:$0xff] }
 0x24e   : > { %v3125_v45 = vadd.f32 %v3084_v0, %v3002_v36  ;;  %v2674_v15 = vmul.f32 %v2633_v32, %v4542_v6  ;;  %v2755_v21 = vmul.f32 %v2714_v47, %v4565_v13  ;;  %v2756_v55 = vmul.f32 %v2715_v57, %v4565_v13  ;;  %v3374_v32 = vld [vmem:[#allocation2 + $0x15a] sm:$0xff] }
 0x24f   : > { %v2878_v4 = vmul.f32 %v2837_v16, %v4586_v22  ;;  %v2879_v56 = vmul.f32 %v2838_v11, %v4586_v22  ;;  %v3599_v62 = vpack.c.bf16 %v3576_v20, %v3575_v24  ;;  %v3247_v61 = vadd.f32 %v3206_v44, %v3124_v38  ;;  %v3497_v23 = vld [vmem:[#allocation2 + $0x15b] sm:$0xff]  ;;  %v2634_v24 = vld [vmem:[#allocation2 + $0x145] sm:$0xff] }
 0x250   : > { %v3248_v5 = vadd.f32 %v3207_v29, %v3125_v45  ;;  %v2962_v49 = vmul.f32 %v2839_v14, %v4599_v25  ;;  %v2796_v33 = vadd.f32 %v2755_v21, %v2673_v3  ;;  %v2797_v58 = vadd.f32 %v2756_v55, %v2674_v15  ;;  %v3375_v29 = vld [vmem:[#allocation2 + $0x162] sm:$0xff] }
 0x251   : > { %v2963_v0 = vmul.f32 %v2922_v42, %v4599_v25  ;;  %v3085_v2 = vmul.f32 %v6924_v63, %v4613_v27  ;;  %4419 = vmatmul.mubr.bf16.gmra.mxu1 %v3599_v62  ;;  %v3331_v26 = vadd.f32 %v3290_v60, %v3247_v61  ;;  %v3086_v11 = vmul.f32 %v6994_v10, %v4613_v27  ;;  %v7086_v36 = vpop.f32.mrf.mxu1  ;;  %v2716_v38 = vld [vmem:[#allocation2 + $0x146] sm:$0xff] }
 0x252   : > { %v3332_v16 = vadd.f32 %v3291_v53, %v3248_v5  ;;  %v3208_v44 = vmul.f32 %v3167_v1, %v4625_v31  ;;  %4422 = vmatprep.mubr.msk.bf16.mxu1 %vm4478_vm0, %v7060_v17  ;;  %v2919_v47 = vadd.f32 %v2878_v4, %v2796_v33  ;;  %v2920_v57 = vadd.f32 %v2879_v56, %v2797_v58  ;;  %v3498_v53 = vld [vmem:[#allocation2 + $0x163] sm:$0xff]  ;;  %v2923_v4 = vld [vmem:[#allocation2 + $0x157] sm:$0xff] }
 0x253   : > { %v3209_v63 = vmul.f32 %v7053_v50, %v4625_v31  ;;  %v3292_v60 = vmul.f32 %v3169_v19, %v4635_v35  ;;  %v3454_v3 = vadd.f32 %v3413_v7, %v3331_v26  ;;  %v3293_v1 = vmul.f32 %v3252_v37, %v4635_v35  ;;  %v4376_v45 = vpop.f32.mrf.mxu1  ;;  %v3499_v37 = vld [vmem:[#allocation2 + $0x16b] sm:$0xff] }
 0x254   : > { %v3455_v10 = vadd.f32 %v3414_v54, %v3332_v16  ;;  %v3415_v20 = vmul.f32 %v3374_v32, %v4651_v40  ;;  %v3003_v15 = vadd.f32 %v2962_v49, %v2919_v47  ;;  %v3004_v42 = vadd.f32 %v2963_v0, %v2920_v57  ;;  %v3253_v54 = vld [vmem:[#allocation2 + $0x169] sm:$0xff] }
 0x255   : > { %v3416_v21 = vmul.f32 %v3375_v29, %v4651_v40  ;;  %v3538_v55 = vmul.f32 %v3497_v23, %v4668_v46  ;;  %v3577_v50 = vadd.f32 %v3536_v52, %v3454_v3  ;;  %v3539_v62 = vmul.f32 %v3498_v53, %v4668_v46  ;;  %v7099_v61 = vpop.f32.mrf.mxu1  ;;  %v3376_v0 = vld [vmem:[#allocation2 + $0x16a] sm:$0xff]  ;;  %v7106_v52 = vld [vmem:[%s7271_s3 + $0x1] ss:$0 sm:$0xff] }
 0x256   : > { %v3578_v56 = vadd.f32 %v3537_v34, %v3455_v10  ;;  %v2675_v7 = vmul.f32 %v2634_v24, %v4542_v6  ;;  %v3126_v5 = vadd.f32 %v3085_v2, %v3003_v15  ;;  %v3127_v33 = vadd.f32 %v3086_v11, %v3004_v42  ;;  %v7463_v3 = vld [vmem:[#allocation6_spill] sm:$0xff]  ;;  %v7464_v10 = vld [vmem:[#allocation7_spill] sm:$0xff] }
 0x257   : > { %v2757_v58 = vmul.f32 %v2716_v38, %v4565_v13  ;;  %v2880_v49 = vmul.f32 %v2839_v14, %v4586_v22  ;;  %v2964_v6 = vmul.f32 %v2923_v4, %v4599_v25  ;;  %v3087_v32 = vmul.f32 %v7006_v59, %v4613_v27  ;;  %v4377_v26 = vpop.f32.mrf.mxu1 }
 0x258   : > { %v3600_v34 = vpack.c.bf16 %v3578_v56, %v3577_v50  ;;  %v3210_v2 = vmul.f32 %v3169_v19, %v4625_v31  ;;  %v3249_v13 = vadd.f32 %v3208_v44, %v3126_v5  ;;  %v3250_v16 = vadd.f32 %v3209_v63, %v3127_v33  ;;  %v7466_v5 = vld [vmem:[#allocation9_spill] sm:$0xff] }
 0x259   : > { %v2798_v22 = vadd.f32 %v2757_v58, %v2675_v7  ;;  %v3294_v14 = vmul.f32 %v3253_v54, %v4635_v35  ;;  %v3417_v11 = vmul.f32 %v3376_v0, %v4651_v40  ;;  %v7115_v29 = vmul.f32 %v3499_v37, %v4668_v46  ;;  %v7460_v40 = vld [vmem:[#allocation3_spill] sm:$0xff]  ;;  %v7461_v46 = vld [vmem:[#allocation4_spill] sm:$0xff] }
 0x25a   : > { %4423 = vmatmul.mubr.bf16.gmra.mxu1 %v3600_v34  ;;  %v3706_v25 = vadd.f32 %v7106_v52, %v6632_v30  ;;  %v3709_v27 = vadd.f32 %v7106_v52, %v6653_v28  ;;  %v3333_v31 = vadd.f32 %v3292_v60, %v3249_v13  ;;  %v3334_v59 = vadd.f32 %v3293_v1, %v3250_v16  ;;  %v7462_v60 = vld [vmem:[#allocation5_spill] sm:$0xff]  ;;  %v7465_v7 = vld [vmem:[#allocation8_spill] sm:$0xff]  ;;  %v7468_v0 = vld [vmem:[#allocation11_spill] sm:$0xff] }
 0x25b   : > { %4426 = vmatprep.mubr.msk.bf16.mxu1 %vm4478_vm0, %v7060_v17  ;;  %v2921_v19 = vadd.f32 %v2880_v49, %v2798_v22  ;;  %v3714_v35 = vadd.f32 %v7106_v52, %v6686_v18  ;;  %v3717_v47 = vadd.f32 %v7106_v52, %v6702_v8  ;;  %v3722_v30 = vadd.f32 %v7106_v52, %v6773_v41  ;;  %v7469_v37 = vld [vmem:[#allocation44_spill] sm:$0xff] }
 0x25c   : > { %v3871_v44 = vadd.f32 %v7460_v40, %v3706_v25  ;;  %v3872_v23 = vadd.f32 %v7461_v46, %v3709_v27  ;;  %v3456_v28 = vadd.f32 %v3415_v20, %v3333_v31  ;;  %v3457_v57 = vadd.f32 %v3416_v21, %v3334_v59 }
 0x25d   : > { %v3005_v63 = vadd.f32 %v2964_v6, %v2921_v19  ;;  %v3873_v18 = vadd.f32 %v7462_v60, %v3714_v35  ;;  %v3874_v8 = vadd.f32 %v7463_v3, %v3717_v47  ;;  %v3875_v1 = vadd.f32 %v7464_v10, %v3722_v30  ;;  %v7475_v30 = vld [vmem:[#allocation17_spill] sm:$0xff] }
 0x25e   : > { %v3912_v53 = vmax.f32 %v3871_v44, 0.0  ;;  %v3913_v24 = vmax.f32 %v3872_v23, 0.0  ;;  %v3579_v41 = vadd.f32 %v3538_v55, %v3456_v28  ;;  %v3580_v20 = vadd.f32 %v3539_v62, %v3457_v57  ;;  %v7473_v44 = vld [vmem:[#allocation15_spill] sm:$0xff]  ;;  %v7474_v23 = vld [vmem:[#allocation16_spill] sm:$0xff] }
 0x25f   : > { %v3128_v38 = vadd.f32 %v3087_v32, %v3005_v63  ;;  %v3914_v45 = vmax.f32 %v3873_v18, 0.0  ;;  %v3915_v15 = vmax.f32 %v3874_v8, 0.0  ;;  %v3916_v42 = vmax.f32 %v3875_v1, 0.0  ;;  %v7470_v32 = vld [vmem:[#allocation12_spill] sm:$0xff] }
 0x260   : > { %3953 = vst [vmem:[%s7135_s17] sm:$0xff] %v3912_v53  ;;  %3954 = vst [vmem:[%s7135_s17 + $0x8] sm:$0xff] %v3913_v24  ;;  %v3725_v21 = vadd.f32 %v7106_v52, %v6788_v39  ;;  %v3730_v4 = vadd.f32 %v7106_v52, %v6867_v9  ;;  %v3601_v50 = vpack.c.bf16 %v3580_v20, %v3579_v41  ;;  %v7476_v24 = vld [vmem:[#allocation18_spill] sm:$0xff]  ;;  %v7477_v20 = vld [vmem:[#allocation19_spill] sm:$0xff] }
 0x261   : > { %v3251_v56 = vadd.f32 %v3210_v2, %v3128_v38  ;;  %3955 = vst [vmem:[%s7135_s17 + $0x10] sm:$0xff] %v3914_v45  ;;  %v3733_v55 = vadd.f32 %v7106_v52, %v6887_v48  ;;  %v3738_v62 = vadd.f32 %v7106_v52, %v6949_v43  ;;  %3956 = vst [vmem:[%s7135_s17 + $0x18] sm:$0xff] %v3915_v15  ;;  %v7467_v48 = vld [vmem:[#allocation10_spill] sm:$0xff] }
 0x262   : > { %3957 = vst [vmem:[%s7135_s17 + $0x20] sm:$0xff] %v3916_v42  ;;  %v3876_v54 = vadd.f32 %v7465_v7, %v3725_v21  ;;  %v3877_v33 = vadd.f32 %v7466_v5, %v3730_v4  ;;  %v3741_v39 = vadd.f32 %v7106_v52, %v6955_v51  ;;  %v3746_v9 = vadd.f32 %v7106_v52, %v7028_v12  ;;  %v7471_v12 = vld [vmem:[#allocation13_spill] sm:$0xff]  ;;  %v7478_v4 = vld [vmem:[#allocation20_spill] sm:$0xff] }
 0x263   : > { %4427 = vmatmul.mubr.bf16.gmra.mxu1 %v3601_v50  ;;  %v3335_v58 = vadd.f32 %v3294_v14, %v3251_v56  ;;  %v3878_v49 = vadd.f32 %v7467_v48, %v3733_v55  ;;  %v3879_v43 = vadd.f32 %v7468_v0, %v3738_v62  ;;  %v3749_v34 = vadd.f32 %v7106_v52, %v7469_v37  ;;  %v7472_v14 = vld [vmem:[#allocation14_spill] sm:$0xff] }
 0x264   : > { %4430 = vmatprep.mubr.msk.bf16.mxu1 %vm4478_vm0, %v7060_v17  ;;  %v3917_v6 = vmax.f32 %v3876_v54, 0.0  ;;  %v3918_v51 = vmax.f32 %v3877_v33, 0.0  ;;  %v3880_v2 = vadd.f32 %v7470_v32, %v3741_v39  ;;  %v3881_v26 = vadd.f32 %v7471_v12, %v3746_v9  ;;  %v3761_v19 = vpop.f32.mrf.mxu1  ;;  %v7479_v54 = vld [vmem:[#allocation21_spill] sm:$0xff]  ;;  %v7480_v48 = vld [vmem:[#allocation22_spill] sm:$0xff] }
 0x265   : > { %v3458_v13 = vadd.f32 %v3417_v11, %v3335_v58  ;;  %v3919_v16 = vmax.f32 %v3878_v49, 0.0  ;;  %v3920_v22 = vmax.f32 %v3879_v43, 0.0  ;;  %v3882_v25 = vadd.f32 %v7472_v14, %v3749_v34 }
 0x266   : > { %3958 = vst [vmem:[%s7135_s17 + $0x28] sm:$0xff] %v3917_v6  ;;  %3959 = vst [vmem:[%s7135_s17 + $0x30] sm:$0xff] %v3918_v51  ;;  %v3921_v27 = vmax.f32 %v3880_v2, 0.0  ;;  %v3922_v17 = vmax.f32 %v3881_v26, 0.0  ;;  %v3754_v31 = vadd.f32 %v7106_v52, %v7086_v36  ;;  %v3757_v59 = vadd.f32 %v7106_v52, %v7099_v61  ;;  %v4380_v47 = vpop.f32.mrf.mxu1  ;;  %v7481_v6 = vld [vmem:[#allocation23_spill] sm:$0xff] }
 0x267   : > { %v3581_v11 = vadd.f32 %v7115_v29, %v3458_v13  ;;  %3960 = vst [vmem:[%s7135_s17 + $0x38] sm:$0xff] %v3919_v16  ;;  %3961 = vst [vmem:[%s7135_s17 + $0x40] sm:$0xff] %v3920_v22  ;;  %v3923_v35 = vmax.f32 %v3882_v25, 0.0  ;;  %v3762_v40 = vadd.f32 %v7106_v52, %v3761_v19  ;;  %v7482_v13 = vld [vmem:[#allocation24_spill] sm:$0xff] }
 0x268   : > { %3962 = vst [vmem:[%s7135_s17 + $0x48] sm:$0xff] %v3921_v27  ;;  %3963 = vst [vmem:[%s7135_s17 + $0x50] sm:$0xff] %v3922_v17  ;;  %v3883_v46 = vadd.f32 %v7473_v44, %v3754_v31  ;;  %v3884_v36 = vadd.f32 %v7474_v23, %v3757_v59  ;;  %v3764_v63 = vpop.f32.mrf.mxu1  ;;  %v7483_v17 = vld [vmem:[#allocation25_spill] sm:$0xff] }
 0x269   : > { %v3602_v61 = vpack.c.bf16 %v3581_v11, %v3581_v11  ;;  %3964 = vst [vmem:[%s7135_s17 + $0x58] sm:$0xff] %v3923_v35  ;;  %v3885_v29 = vadd.f32 %v7475_v30, %v3762_v40  ;;  %v3765_v18 = vadd.f32 %v7106_v52, %v3764_v63  ;;  %v7484_v40 = vld [vmem:[#allocation26_spill] sm:$0xff] }
 0x26a   : > { %v3924_v28 = vmax.f32 %v3883_v46, 0.0  ;;  %v3925_v57 = vmax.f32 %v3884_v36, 0.0  ;;  %v4381_v53 = vpop.f32.mrf.mxu1 }
 0x26b   : > { %4431 = vmatmul.mubr.bf16.gmra.mxu1 %v3602_v61  ;;  %v3926_v60 = vmax.f32 %v3885_v29, 0.0  ;;  %v3886_v3 = vadd.f32 %v7476_v24, %v3765_v18  ;;  %v7485_v61 = vld [vmem:[#allocation27_spill] sm:$0xff] }
 0x26c   : > { %3965 = vst [vmem:[%s7135_s17 + $0x60] sm:$0xff] %v3924_v28  ;;  %3966 = vst [vmem:[%s7135_s17 + $0x68] sm:$0xff] %v3925_v57 }
 0x26d   : > { %3967 = vst [vmem:[%s7135_s17 + $0x70] sm:$0xff] %v3926_v60  ;;  %v3927_v8 = vmax.f32 %v3886_v3, 0.0  ;;  %v7486_v60 = vld [vmem:[#allocation28_spill] sm:$0xff] }
 0x26f   : > { %3968 = vst [vmem:[%s7135_s17 + $0x78] sm:$0xff] %v3927_v8 }
 0x276   : > { %v3769_v10 = vpop.f32.mrf.mxu1 }
 0x277   : > { %v3770_v1 = vadd.f32 %v7106_v52, %v3769_v10  ;;  %v7487_v10 = vld [vmem:[#allocation29_spill] sm:$0xff] }
 0x278   : > { %v4384_v41 = vpop.f32.mrf.mxu1 }
 0x279   : > { %v3887_v38 = vadd.f32 %v7477_v20, %v3770_v1 }
 0x27a   : > { %v3772_v45 = vpop.f32.mrf.mxu1 }
 0x27b   : > { %v3928_v15 = vmax.f32 %v3887_v38, 0.0  ;;  %v3773_v42 = vadd.f32 %v7106_v52, %v3772_v45 }
 0x27c   : > { %v4385_v21 = vpop.f32.mrf.mxu1 }
 0x27d   : > { %3969 = vst [vmem:[%s7135_s17 + $0x80] sm:$0xff] %v3928_v15  ;;  %v3888_v50 = vadd.f32 %v7478_v4, %v3773_v42  ;;  %v7488_v15 = vld [vmem:[#allocation30_spill] sm:$0xff] }
 0x27f   : > { %v3929_v56 = vmax.f32 %v3888_v50, 0.0 }
 0x281   : > { %3970 = vst [vmem:[%s7135_s17 + $0x88] sm:$0xff] %v3929_v56 }
 0x28a   : > { %v3777_v55 = vpop.f32.mrf.mxu1 }
 0x28b   : > { %v3778_v62 = vadd.f32 %v7106_v52, %v3777_v55  ;;  %v7489_v55 = vld [vmem:[#allocation31_spill] sm:$0xff] }
 0x28c   : > { %v4388_v7 = vpop.f32.mrf.mxu1 }
 0x28d   : > { %v3889_v5 = vadd.f32 %v7479_v54, %v3778_v62 }
 0x28e   : > { %v3780_v33 = vpop.f32.mrf.mxu1 }
 0x28f   : > { %v3930_v39 = vmax.f32 %v3889_v5, 0.0  ;;  %v3781_v9 = vadd.f32 %v7106_v52, %v3780_v33 }
 0x290   : > { %v4389_v58 = vpop.f32.mrf.mxu1 }
 0x291   : > { %3971 = vst [vmem:[%s7135_s17 + $0x90] sm:$0xff] %v3930_v39  ;;  %v3890_v49 = vadd.f32 %v7480_v48, %v3781_v9  ;;  %v7490_v39 = vld [vmem:[#allocation32_spill] sm:$0xff] }
 0x293   : > { %v3931_v0 = vmax.f32 %v3890_v49, 0.0 }
 0x295   : > { %3972 = vst [vmem:[%s7135_s17 + $0x98] sm:$0xff] %v3931_v0 }
 0x29d   : > { %v3785_v43 = vpop.f32.mrf.mxu1 }
 0x29e   : > { %v3786_v37 = vadd.f32 %v7106_v52, %v3785_v43  ;;  %v7491_v43 = vld [vmem:[#allocation33_spill] sm:$0xff] }
 0x29f   : > { %v4392_v34 = vpop.f32.mrf.mxu1 }
 0x2a0   : > { %v3891_v51 = vadd.f32 %v7481_v6, %v3786_v37 }
 0x2a1   : > { %v3788_v32 = vpop.f32.mrf.mxu1 }
 0x2a2   : > { %v3932_v2 = vmax.f32 %v3891_v51, 0.0  ;;  %v3789_v12 = vadd.f32 %v7106_v52, %v3788_v32 }
 0x2a3   : > { %v4393_v26 = vpop.f32.mrf.mxu1 }
 0x2a4   : > { %3973 = vst [vmem:[%s7135_s17 + $0xa0] sm:$0xff] %v3932_v2  ;;  %v3892_v16 = vadd.f32 %v7482_v13, %v3789_v12  ;;  %v7492_v2 = vld [vmem:[#allocation34_spill] sm:$0xff] }
 0x2a6   : > { %v3933_v22 = vmax.f32 %v3892_v16, 0.0 }
 0x2a8   : > { %3974 = vst [vmem:[%s7135_s17 + $0xa8] sm:$0xff] %v3933_v22 }
 0x2af   : > { %v3793_v14 = vpop.f32.mrf.mxu1 }
 0x2b0   : > { %v3794_v25 = vadd.f32 %v7106_v52, %v3793_v14  ;;  %v7493_v14 = vld [vmem:[#allocation35_spill] sm:$0xff] }
 0x2b1   : > { %v4396_v27 = vpop.f32.mrf.mxu1 }
 0x2b2   : > { %v3893_v31 = vadd.f32 %v7483_v17, %v3794_v25 }
 0x2b3   : > { %v3796_v59 = vpop.f32.mrf.mxu1 }
 0x2b4   : > { %v3934_v19 = vmax.f32 %v3893_v31, 0.0  ;;  %v3797_v11 = vadd.f32 %v7106_v52, %v3796_v59 }
 0x2b5   : > { %v4397_v35 = vpop.f32.mrf.mxu1 }
 0x2b6   : > { %3975 = vst [vmem:[%s7135_s17 + $0xb0] sm:$0xff] %v3934_v19  ;;  %v3894_v44 = vadd.f32 %v7484_v40, %v3797_v11  ;;  %v7494_v19 = vld [vmem:[#allocation36_spill] sm:$0xff] }
 0x2b8   : > { %v3935_v46 = vmax.f32 %v3894_v44, 0.0 }
 0x2ba   : > { %3976 = vst [vmem:[%s7135_s17 + $0xb8] sm:$0xff] %v3935_v46 }
 0x2c2   : > { %v3801_v23 = vpop.f32.mrf.mxu1 }
 0x2c3   : > { %v3802_v36 = vadd.f32 %v7106_v52, %v3801_v23  ;;  %v7495_v23 = vld [vmem:[#allocation37_spill] sm:$0xff] }
 0x2c4   : > { %v4400_v47 = vpop.f32.mrf.mxu1 }
 0x2c5   : > { %v3895_v30 = vadd.f32 %v7485_v61, %v3802_v36 }
 0x2c6   : > { %v3804_v29 = vpop.f32.mrf.mxu1 }
 0x2c7   : > { %v3936_v28 = vmax.f32 %v3895_v30, 0.0  ;;  %v3805_v57 = vadd.f32 %v7106_v52, %v3804_v29 }
 0x2c8   : > { %v4401_v63 = vpop.f32.mrf.mxu1 }
 0x2c9   : > { %3977 = vst [vmem:[%s7135_s17 + $0xc0] sm:$0xff] %v3936_v28  ;;  %v3896_v18 = vadd.f32 %v7486_v60, %v3805_v57  ;;  %v7496_v28 = vld [vmem:[#allocation38_spill] sm:$0xff] }
 0x2cb   : > { %v3937_v53 = vmax.f32 %v3896_v18, 0.0 }
 0x2cd   : > { %3978 = vst [vmem:[%s7135_s17 + $0xc8] sm:$0xff] %v3937_v53 }
 0x2d5   : > { %v3809_v24 = vpop.f32.mrf.mxu1 }
 0x2d6   : > { %v3810_v3 = vadd.f32 %v7106_v52, %v3809_v24  ;;  %v7497_v24 = vld [vmem:[#allocation39_spill] sm:$0xff] }
 0x2d7   : > { %v4404_v8 = vpop.f32.mrf.mxu1 }
 0x2d8   : > { %v3897_v1 = vadd.f32 %v7487_v10, %v3810_v3 }
 0x2d9   : > { %v3812_v41 = vpop.f32.mrf.mxu1 }
 0x2da   : > { %v3938_v20 = vmax.f32 %v3897_v1, 0.0  ;;  %v3813_v38 = vadd.f32 %v7106_v52, %v3812_v41 }
 0x2db   : > { %v4405_v45 = vpop.f32.mrf.mxu1 }
 0x2dc   : > { %3979 = vst [vmem:[%s7135_s17 + $0xd0] sm:$0xff] %v3938_v20  ;;  %v3898_v42 = vadd.f32 %v7488_v15, %v3813_v38  ;;  %v7498_v20 = vld [vmem:[#allocation40_spill] sm:$0xff] }
 0x2de   : > { %v3939_v21 = vmax.f32 %v3898_v42, 0.0 }
 0x2e0   : > { %3980 = vst [vmem:[%s7135_s17 + $0xd8] sm:$0xff] %v3939_v21 }
 0x2e8   : > { %v3817_v4 = vpop.f32.mrf.mxu1 }
 0x2e9   : > { %v3818_v50 = vadd.f32 %v7106_v52, %v3817_v4  ;;  %v7499_v4 = vld [vmem:[#allocation41_spill] sm:$0xff] }
 0x2ea   : > { %v4408_v56 = vpop.f32.mrf.mxu1 }
 0x2eb   : > { %v3899_v62 = vadd.f32 %v7489_v55, %v3818_v50 }
 0x2ec   : > { %v3820_v7 = vpop.f32.mrf.mxu1 }
 0x2ed   : > { %v3940_v54 = vmax.f32 %v3899_v62, 0.0  ;;  %v3821_v5 = vadd.f32 %v7106_v52, %v3820_v7 }
 0x2ee   : > { %v4409_v33 = vpop.f32.mrf.mxu1 }
 0x2ef   : > { %3981 = vst [vmem:[%s7135_s17 + $0xe0] sm:$0xff] %v3940_v54  ;;  %v3900_v9 = vadd.f32 %v7490_v39, %v3821_v5  ;;  %v7500_v54 = vld [vmem:[#allocation42_spill] sm:$0xff] }
 0x2f1   : > { %v3941_v58 = vmax.f32 %v3900_v9, 0.0 }
 0x2f3   : > { %3982 = vst [vmem:[%s7135_s17 + $0xe8] sm:$0xff] %v3941_v58 }
 0x2fb   : > { %v3825_v48 = vpop.f32.mrf.mxu1 }
 0x2fc   : > { %v3826_v49 = vadd.f32 %v7106_v52, %v3825_v48  ;;  %v7501_v48 = vld [vmem:[#allocation43_spill] sm:$0xff] }
 0x2fd   : > { %v4412_v0 = vpop.f32.mrf.mxu1 }
 0x2fe   : > { %v3901_v37 = vadd.f32 %v7491_v43, %v3826_v49 }
 0x2ff   : > { %v3828_v34 = vpop.f32.mrf.mxu1 }
 0x300   : > { %v3942_v6 = vmax.f32 %v3901_v37, 0.0  ;;  %v3829_v51 = vadd.f32 %v7106_v52, %v3828_v34 }
 0x301   : > { %v4413_v32 = vpop.f32.mrf.mxu1 }
 0x302   : > { %3983 = vst [vmem:[%s7135_s17 + $0xf0] sm:$0xff] %v3942_v6  ;;  %v3902_v12 = vadd.f32 %v7492_v2, %v3829_v51 }
 0x304   : > { %v3943_v26 = vmax.f32 %v3902_v12, 0.0 }
 0x306   : > { %3984 = vst [vmem:[%s7135_s17 + $0xf8] sm:$0xff] %v3943_v26 }
 0x308   : > { %v3833_v13 = vpop.f32.mrf.mxu1 }
 0x309   : > { %v3834_v16 = vadd.f32 %v7106_v52, %v3833_v13 }
 0x30a   : > { %v4416_v22 = vpop.f32.mrf.mxu1 }
 0x30b   : > { %v3903_v25 = vadd.f32 %v7493_v14, %v3834_v16 }
 0x30c   : > { %v3836_v27 = vpop.f32.mrf.mxu1 }
 0x30d   : > { %v3944_v17 = vmax.f32 %v3903_v25, 0.0  ;;  %v3837_v31 = vadd.f32 %v7106_v52, %v3836_v27 }
 0x30e   : > { %v4417_v59 = vpop.f32.mrf.mxu1 }
 0x30f   : > { %3985 = vst [vmem:[%s7135_s17 + $0x100] sm:$0xff] %v3944_v17  ;;  %v3904_v11 = vadd.f32 %v7494_v19, %v3837_v31 }
 0x311   : > { %v3945_v35 = vmax.f32 %v3904_v11, 0.0  ;;  %v3841_v40 = vpop.f32.mrf.mxu1 }
 0x312   : > { %v3842_v44 = vadd.f32 %v7106_v52, %v3841_v40 }
 0x313   : > { %3986 = vst [vmem:[%s7135_s17 + $0x108] sm:$0xff] %v3945_v35  ;;  %v4420_v46 = vpop.f32.mrf.mxu1 }
 0x314   : > { %v3905_v36 = vadd.f32 %v7495_v23, %v3842_v44 }
 0x315   : > { %v3844_v47 = vpop.f32.mrf.mxu1 }
 0x316   : > { %v3946_v61 = vmax.f32 %v3905_v36, 0.0  ;;  %v3845_v30 = vadd.f32 %v7106_v52, %v3844_v47 }
 0x317   : > { %v4421_v29 = vpop.f32.mrf.mxu1 }
 0x318   : > { %3987 = vst [vmem:[%s7135_s17 + $0x110] sm:$0xff] %v3946_v61  ;;  %v3906_v57 = vadd.f32 %v7496_v28, %v3845_v30 }
 0x31a   : > { %v3849_v63 = vpop.f32.mrf.mxu1  ;;  %v3947_v60 = vmax.f32 %v3906_v57, 0.0 }
 0x31b   : > { %v3850_v18 = vadd.f32 %v7106_v52, %v3849_v63 }
 0x31c   : > { %v4424_v53 = vpop.f32.mrf.mxu1  ;;  %3988 = vst [vmem:[%s7135_s17 + $0x118] sm:$0xff] %v3947_v60 }
 0x31d   : > { %v3907_v3 = vadd.f32 %v7497_v24, %v3850_v18 }
 0x31e   : > { %v3852_v8 = vpop.f32.mrf.mxu1 }
 0x31f   : > { %v3948_v10 = vmax.f32 %v3907_v3, 0.0  ;;  %v3853_v1 = vadd.f32 %v7106_v52, %v3852_v8 }
 0x320   : > { %v4425_v41 = vpop.f32.mrf.mxu1 }
 0x321   : > { %3989 = vst [vmem:[%s7135_s17 + $0x120] sm:$0xff] %v3948_v10  ;;  %v3908_v38 = vadd.f32 %v7498_v20, %v3853_v1 }
 0x323   : > { %v3949_v45 = vmax.f32 %v3908_v38, 0.0  ;;  %v3857_v15 = vpop.f32.mrf.mxu1 }
 0x324   : > { %v3858_v42 = vadd.f32 %v7106_v52, %v3857_v15 }
 0x325   : > { %3990 = vst [vmem:[%s7135_s17 + $0x128] sm:$0xff] %v3949_v45  ;;  %v4428_v21 = vpop.f32.mrf.mxu1 }
 0x326   : > { %v3909_v50 = vadd.f32 %v7499_v4, %v3858_v42 }
 0x327   : > { %v3860_v56 = vpop.f32.mrf.mxu1 }
 0x328   : > { %v3950_v55 = vmax.f32 %v3909_v50, 0.0  ;;  %v3861_v62 = vadd.f32 %v7106_v52, %v3860_v56 }
 0x329   : > { %v4429_v7 = vpop.f32.mrf.mxu1 }
 0x32a   : > { %3991 = vst [vmem:[%s7135_s17 + $0x130] sm:$0xff] %v3950_v55  ;;  %v3910_v5 = vadd.f32 %v7500_v54, %v3861_v62 }
 0x32b   : > { %v3865_v33 = vpop.f32.mrf.mxu1 }
 0x32c   : > { %v3951_v39 = vmax.f32 %v3910_v5, 0.0  ;;  %v3866_v9 = vadd.f32 %v7106_v52, %v3865_v33 }
 0x32d   : > { %v4432_v58 = vpop.f32.mrf.mxu1 }
 0x32e   : > { %3992 = vst [vmem:[%s7135_s17 + $0x138] sm:$0xff] %v3951_v39  ;;  %v3911_v49 = vadd.f32 %v3866_v9, %v7501_v48 }
 0x32f   : > { %v3868_v0 = vpop.f32.mrf.mxu1 }
 0x330   : > { %v3952_v43 = vmax.f32 %v3911_v49, 0.0 }
 0x331   : > { %v4433_v37 = vpop.f32.mrf.mxu1 }
 0x332   : > { %3993 = vst [vmem:[%s7135_s17 + $0x140] sm:$0xff] %v3952_v43 }
 0x333 PF: > { %s14_s15 = sadd.s32 1, %s4475_s15  }
 0x334   : > { %p11_p4 = scmp.ge.s32.totalorder %s14_s15, 4  }
 0x336   :  { %13 = sbr.rel (!%p11_p4) target bundleno = 1 (0x1), region = 66 }

</bundles_post_ra>
